<compile_context>
chip_gen: v7x
topology: tpu7x:2x2x1
jax: 0.10.0
libtpu: 0.0.40
codegen_flags: <defaults>
</compile_context>

<pallas_src>
import functools

import jax
import jax.numpy as jnp
import numpy as np
from jax.experimental import pallas as pl
from jax.experimental.pallas import tpu as pltpu


def _round_up(x, m):
    return (x + m - 1) // m * m


def _pick_cin_pad(cin, p):
    """Smallest channel pad (<=2x) making the flattened row p*cin_pad lane-dense
    (multiple of 128); prefer pads that divide 128 so group boundaries are
    vreg-aligned.  Falls back to no padding (still legal: block == full dim)."""
    best = None
    for cand in range(cin, 2 * cin + 1):
        if (p * cand) % 128 == 0:
            if 128 % cand == 0:
                return cand
            if best is None:
                best = cand
    return best if best is not None else cin


def _pick_group(p, cin_pad):
    """Largest divisor of p whose per-group input row fits one vreg row (128
    lanes).  Bounds the block-diagonal FLOP inflation (matters on v5e) while
    keeping the matmul output lane-dense."""
    g_max = max(1, 128 // cin_pad)
    g = 1
    for cand in range(1, min(p, g_max) + 1):
        if p % cand == 0:
            g = cand
    return g


def _default_vmem_limit():
    try:
        return int(0.75 * pltpu.get_tpu_info().vmem_capacity_bytes)
    except Exception:  # no TPU info available at trace time
        return 48 * 1024 * 1024


def _max_over_point_groups(y, p, ch):
    """y: (tn, p*ch) -> (tn, ch), max over the p groups of ch consecutive lanes."""
    if p & (p - 1) == 0:                       # power of two -> log2(p) tree folds
        m, width = y, p * ch
        while width > ch:
            width //= 2
            m = jnp.maximum(m[:, :width], m[:, width:2 * width])
        return m
    m = y[:, :ch]                              # general p: static unrolled fold
    for i in range(1, p):
        m = jnp.maximum(m, y[:, i * ch:(i + 1) * ch])
    return m


def _pfn_kernel(x_ref, w_ref, shift_ref, *out_refs, p, ch, cin_pad, group, last_vfe):
    # x_ref:     (tile_n, p*cin_pad)     lane-dense flattened pillar features
    # w_ref:     (group*cin_pad, group*ch)  grouped block-diagonal folded weight
    # shift_ref: (1, p*ch) f32           folded BN shift, tiled per point
    # out_refs:  last_vfe: (max,)        max:   (tile_n, ch)
    #            else:     (x, max)      x:     (tile_n, p*ch)  lane-dense
    gi = group * cin_pad
    n_groups = p // group
    w = w_ref[...]

    # Grouped block-diagonal matmul: each (tile_n, gi) input slice produces a
    # (tile_n, group*ch) lane-dense output slice directly -> no relayouts.
    parts = []
    for g in range(n_groups):                  # small static loop (e.g. 4 dots)
        xg = x_ref[:, g * gi:(g + 1) * gi]
        parts.append(jnp.dot(xg, w, preferred_element_type=jnp.float32))
    y = parts[0] if n_groups == 1 else jnp.concatenate(parts, axis=1)  # (tn, p*ch) f32

    # Folded eval-mode BatchNorm shift (scale baked into the weight) + ReLU.
    y = jnp.maximum(y + shift_ref[...], 0.0)

    # torch.max(x, dim=1, keepdim=True)[0]  -> lane-group tree reduction.
    m = _max_over_point_groups(y, p, ch)       # (tn, ch) f32

    if last_vfe:
        (max_ref,) = out_refs
        max_ref[...] = m.astype(max_ref.dtype)
    else:
        x_out_ref, max_ref = out_refs
        x_out_ref[...] = y.astype(x_out_ref.dtype)   # unmasked full-lane stores
        max_ref[...] = m.astype(max_ref.dtype)


def pfn_layer(inputs, weight, gamma, beta, running_mean, running_var, *,
              eps=1e-3, last_vfe=False, tile_n=512, io_dtype=jnp.bfloat16,
              vmem_limit_bytes=None):
    """inputs: (N, P, Cin).  weight: (Ch, Cin) as in nn.Linear(bias=False).

    io_dtype: dtype used for the kernel's HBM I/O (bf16 halves DMA bytes; the
    MXU accumulates in f32 and shift/ReLU/max are done in f32).  Pass
    jnp.float32 for bit-tight parity with the f32 reference.

    tile_n: pillars per grid step.  With lane-dense bf16 layouts the footprint
    is ~10 KiB/pillar incl. double buffering, so 512 fits comfortably on
    v5e/v6e (128 MiB VMEM) and v7x (64 MiB).  It is automatically capped so the
    grid has >=2 tiles (v7x dual-TensorCore sharding of the parallel axis).
    """
    N, P, Cin = inputs.shape
    Ch = weight.shape[0]
    out_dtype = inputs.dtype

    # ---- fold eval-mode BN into the linear weight / a per-channel shift ----
    scale = (gamma / jnp.sqrt(running_var + eps)).astype(jnp.float32)          # (Ch,)
    shift = beta.astype(jnp.float32) - running_mean.astype(jnp.float32) * scale
    w_folded = weight.T.astype(jnp.float32) * scale[None, :]                   # (Cin, Ch)

    # ---- lane-dense layouts: pad Cin, flatten points into lanes ----
    cin_pad = _pick_cin_pad(Cin, P)
    group = _pick_group(P, cin_pad)
    w_pad = jnp.pad(w_folded, ((0, cin_pad - Cin), (0, 0)))                    # (cin_pad, Ch)
    eye = jnp.eye(group, dtype=jnp.float32)
    w_bdg = (eye[:, None, :, None] * w_pad[None, :, None, :]).reshape(
        group * cin_pad, group * Ch)                                           # block-diagonal
    shift_tiled = jnp.tile(shift.reshape(1, Ch), (1, P))                       # (1, P*Ch) f32

    x = inputs.astype(io_dtype)
    if cin_pad != Cin:
        x = jnp.pad(x, ((0, 0), (0, 0), (0, cin_pad - Cin)))
    x = x.reshape(N, P * cin_pad)                                              # lane-dense

    # ---- tiling: sublane-aligned, >=2 tiles when possible (megacore) ----
    tile_n = int(tile_n)
    tile_n = max(16, min(tile_n, _round_up(pl.cdiv(N, 2), 16)))
    tile_n = _round_up(tile_n, 16)
    n_pad = (-N) % tile_n
    if n_pad:
        x = jnp.pad(x, ((0, n_pad), (0, 0)))
    n_padded = N + n_pad

    if vmem_limit_bytes is None:
        vmem_limit_bytes = _default_vmem_limit()

    kernel = functools.partial(_pfn_kernel, p=P, ch=Ch, cin_pad=cin_pad,
                               group=group, last_vfe=last_vfe)

    if last_vfe:
        out_shape = jax.ShapeDtypeStruct((n_padded, Ch), io_dtype)
        out_specs = pl.BlockSpec((tile_n, Ch), lambda i: (i, 0))
    else:
        out_shape = (jax.ShapeDtypeStruct((n_padded, P * Ch), io_dtype),
                     jax.ShapeDtypeStruct((n_padded, Ch), io_dtype))
        out_specs = (pl.BlockSpec((tile_n, P * Ch), lambda i: (i, 0)),
                     pl.BlockSpec((tile_n, Ch), lambda i: (i, 0)))

    result = pl.pallas_call(
        kernel,
        out_shape=out_shape,
        grid_spec=pltpu.PrefetchScalarGridSpec(
            num_scalar_prefetch=0,
            grid=(n_padded // tile_n,),
            in_specs=[
                pl.BlockSpec((tile_n, P * cin_pad), lambda i: (i, 0)),
                pl.BlockSpec((group * cin_pad, group * Ch), lambda i: (0, 0)),
                pl.BlockSpec((1, P * Ch), lambda i: (0, 0)),
            ],
            out_specs=out_specs,
        ),
        compiler_params=pltpu.CompilerParams(
            dimension_semantics=("parallel",),
            vmem_limit_bytes=vmem_limit_bytes,
        ),
    )(x, w_bdg.astype(io_dtype), shift_tiled)

    if last_vfe:
        return result[:N].reshape(N, 1, Ch).astype(out_dtype)

    x_out, xm = result
    x_out = x_out[:N].reshape(N, P, Ch)
    xm = xm[:N].reshape(N, 1, Ch)
    # Reassemble the module's exact (N, P, 2*Ch) concat outside the kernel so
    # the bandwidth-bound kernel never writes the P-times-duplicated max.
    # (Consumers that can take x / x_max separately should skip this concat.)
    out = jnp.concatenate([x_out, jnp.broadcast_to(xm, (N, P, Ch))], axis=2)
    return out.astype(out_dtype)


def pfn_layer_ref(inputs, weight, gamma, beta, running_mean, running_var,
                  *, eps=1e-3, last_vfe=False):
    """Pure-JAX reference mirroring the PyTorch forward (eval-mode BN)."""
    x = jnp.einsum("npc,dc->npd", inputs, weight)
    x = (x - running_mean) / jnp.sqrt(running_var + eps) * gamma + beta
    x = jnp.maximum(x, 0.0)
    x_max = jnp.max(x, axis=1, keepdims=True)
    if last_vfe:
        return x_max
    return jnp.concatenate([x, jnp.broadcast_to(x_max, x.shape)], axis=2)


if __name__ == "__main__":
    # Module config: PFNLayer(in_channels=10, out_channels=64,
    #                         use_norm=True, last_layer=False)
    #   -> internal linear out dim Ch = 64 // 2 = 32.
    in_channels = 10
    out_channels = 64
    Ch = out_channels // 2
    N, P = 500, 32   # non-divisible pillar count exercises the padded tail

    key = jax.random.PRNGKey(0)
    k_in, k_w, k_g, k_b, k_m, k_v = jax.random.split(key, 6)

    inputs = jax.random.normal(k_in, (N, P, in_channels), dtype=jnp.float32)
    # nn.Linear(in_channels, Ch, bias=False) weight: (Ch, in_channels)
    weight = (jax.random.normal(k_w, (Ch, in_channels), dtype=jnp.float32)
              * (1.0 / np.sqrt(in_channels)))
    # BatchNorm1d(Ch, eps=0.001) parameters / running stats (deterministic).
    gamma = 1.0 + 0.1 * jax.random.normal(k_g, (Ch,), dtype=jnp.float32)
    beta = 0.1 * jax.random.normal(k_b, (Ch,), dtype=jnp.float32)
    running_mean = 0.05 * jax.random.normal(k_m, (Ch,), dtype=jnp.float32)
    running_var = 1.0 + 0.1 * jax.random.uniform(k_v, (Ch,), dtype=jnp.float32)

    ref = pfn_layer_ref(inputs, weight, gamma, beta, running_mean, running_var,
                        eps=1e-3, last_vfe=False)
    ref_last = pfn_layer_ref(inputs, weight, gamma, beta, running_mean,
                             running_var, eps=1e-3, last_vfe=True)

    # ---- f32 I/O path: tight parity with the reference ----
    out = pfn_layer(inputs, weight, gamma, beta, running_mean, running_var,
                    eps=1e-3, last_vfe=False, io_dtype=jnp.float32)
    out = jax.block_until_ready(out)
    assert out.shape == (N, P, out_channels), out.shape
    np.testing.assert_allclose(np.asarray(out), np.asarray(ref),
                               rtol=1e-4, atol=1e-5)

    out_last = pfn_layer(inputs, weight, gamma, beta, running_mean, running_var,
                         eps=1e-3, last_vfe=True, io_dtype=jnp.float32)
    out_last = jax.block_until_ready(out_last)
    assert out_last.shape == (N, 1, Ch), out_last.shape
    np.testing.assert_allclose(np.asarray(out_last), np.asarray(ref_last),
                               rtol=1e-4, atol=1e-5)

    # ---- default bf16 I/O path (half the kernel HBM bytes): looser tolerance ----
    out_bf16 = pfn_layer(inputs, weight, gamma, beta, running_mean, running_var,
                         eps=1e-3, last_vfe=False)
    out_bf16 = jax.block_until_ready(out_bf16)
    assert out_bf16.shape == (N, P, out_channels), out_bf16.shape
    np.testing.assert_allclose(np.asarray(out_bf16, dtype=np.float32),
                               np.asarray(ref), rtol=3e-2, atol=3e-2)

    out_last_bf16 = pfn_layer(inputs, weight, gamma, beta, running_mean,
                              running_var, eps=1e-3, last_vfe=True)
    out_last_bf16 = jax.block_until_ready(out_last_bf16)
    assert out_last_bf16.shape == (N, 1, Ch), out_last_bf16.shape
    np.testing.assert_allclose(np.asarray(out_last_bf16, dtype=np.float32),
                               np.asarray(ref_last), rtol=3e-2, atol=3e-2)

    print("KERNEL_OK")
</pallas_src>

<mosaic_0001>
module attributes {stable_mosaic.version = 11 : i64} {
  func.func @_pfn_kernel(%arg0: i32, %arg1: memref<256x512xf32, #tpu.memory_space<vmem>>, %arg2: memref<128x256xf32, #tpu.memory_space<vmem>>, %arg3: memref<1x1024xf32, #tpu.memory_space<vmem>>, %arg4: memref<256x1024xf32, #tpu.memory_space<vmem>>, %arg5: memref<256x32xf32, #tpu.memory_space<vmem>>) attributes {dimension_semantics = [#tpu.dimension_semantics<parallel>], iteration_bounds = array<i64: 2>, scalar_prefetch = 0 : i64, scratch_operands = 0 : i64, tpu.core_type = #tpu.core_type<tc>, window_params = [{transform_indices = @transform_0, window_bounds = array<i64: 256, 512>}, {pipeline_mode = #tpu.pipeline_mode<synchronous>, transform_indices = @transform_1, window_bounds = array<i64: 128, 256>}, {pipeline_mode = #tpu.pipeline_mode<synchronous>, transform_indices = @transform_2, window_bounds = array<i64: 1, 1024>}, {transform_indices = @transform_3, window_bounds = array<i64: 256, 1024>}, {transform_indices = @transform_4, window_bounds = array<i64: 256, 32>}]} {
    %c0 = arith.constant 0 : index
    %c0_0 = arith.constant 0 : index
    %0 = vector.load %arg2[%c0, %c0_0] : memref<128x256xf32, #tpu.memory_space<vmem>>, vector<128x256xf32>
    %c0_1 = arith.constant 0 : index
    %c0_2 = arith.constant 0 : index
    %1 = vector.load %arg1[%c0_1, %c0_2] : memref<256x512xf32, #tpu.memory_space<vmem>>, vector<256x128xf32>
    %cst = arith.constant dense<0.000000e+00> : vector<256x256xf32>
    %2 = tpu.matmul %1, %0, %cst {dimension_numbers = #tpu.dot_dimension_numbers<[1], [0], [0], [1], [0, 0, 1, 1], [], []>} : vector<256x128xf32>, vector<128x256xf32>, vector<256x256xf32> -> vector<256x256xf32>
    %c0_3 = arith.constant 0 : index
    %c128 = arith.constant 128 : index
    %3 = vector.load %arg1[%c0_3, %c128] : memref<256x512xf32, #tpu.memory_space<vmem>>, vector<256x128xf32>
    %cst_4 = arith.constant dense<0.000000e+00> : vector<256x256xf32>
    %4 = tpu.matmul %3, %0, %cst_4 {dimension_numbers = #tpu.dot_dimension_numbers<[1], [0], [0], [1], [0, 0, 1, 1], [], []>} : vector<256x128xf32>, vector<128x256xf32>, vector<256x256xf32> -> vector<256x256xf32>
    %c0_5 = arith.constant 0 : index
    %c256 = arith.constant 256 : index
    %5 = vector.load %arg1[%c0_5, %c256] : memref<256x512xf32, #tpu.memory_space<vmem>>, vector<256x128xf32>
    %cst_6 = arith.constant dense<0.000000e+00> : vector<256x256xf32>
    %6 = tpu.matmul %5, %0, %cst_6 {dimension_numbers = #tpu.dot_dimension_numbers<[1], [0], [0], [1], [0, 0, 1, 1], [], []>} : vector<256x128xf32>, vector<128x256xf32>, vector<256x256xf32> -> vector<256x256xf32>
    %c0_7 = arith.constant 0 : index
    %c384 = arith.constant 384 : index
    %7 = vector.load %arg1[%c0_7, %c384] : memref<256x512xf32, #tpu.memory_space<vmem>>, vector<256x128xf32>
    %cst_8 = arith.constant dense<0.000000e+00> : vector<256x256xf32>
    %8 = tpu.matmul %7, %0, %cst_8 {dimension_numbers = #tpu.dot_dimension_numbers<[1], [0], [0], [1], [0, 0, 1, 1], [], []>} : vector<256x128xf32>, vector<128x256xf32>, vector<256x256xf32> -> vector<256x256xf32>
    %9 = tpu.concatenate %2, %4, %6, %8 in 1 : vector<256x256xf32>, vector<256x256xf32>, vector<256x256xf32>, vector<256x256xf32> -> vector<256x1024xf32>
    %c0_9 = arith.constant 0 : index
    %c0_10 = arith.constant 0 : index
    %10 = vector.load %arg3[%c0_9, %c0_10] : memref<1x1024xf32, #tpu.memory_space<vmem>>, vector<1x1024xf32>
    %11 = vector.broadcast %10 : vector<1x1024xf32> to vector<256x1024xf32>
    %12 = arith.addf %9, %11 : vector<256x1024xf32>
    %cst_11 = arith.constant 0.000000e+00 : f32
    %13 = vector.broadcast %cst_11 : f32 to vector<256x1024xf32>
    %14 = arith.maximumf %12, %13 : vector<256x1024xf32>
    %15 = vector.extract_strided_slice %14 {offsets = [0, 0], sizes = [256, 512], strides = [1, 1]} : vector<256x1024xf32> to vector<256x512xf32>
    %16 = vector.extract_strided_slice %14 {offsets = [0, 512], sizes = [256, 512], strides = [1, 1]} : vector<256x1024xf32> to vector<256x512xf32>
    %17 = arith.maximumf %15, %16 : vector<256x512xf32>
    %18 = vector.extract_strided_slice %17 {offsets = [0, 0], sizes = [256, 256], strides = [1, 1]} : vector<256x512xf32> to vector<256x256xf32>
    %19 = vector.extract_strided_slice %17 {offsets = [0, 256], sizes = [256, 256], strides = [1, 1]} : vector<256x512xf32> to vector<256x256xf32>
    %20 = arith.maximumf %18, %19 : vector<256x256xf32>
    %21 = vector.extract_strided_slice %20 {offsets = [0, 0], sizes = [256, 128], strides = [1, 1]} : vector<256x256xf32> to vector<256x128xf32>
    %22 = vector.extract_strided_slice %20 {offsets = [0, 128], sizes = [256, 128], strides = [1, 1]} : vector<256x256xf32> to vector<256x128xf32>
    %23 = arith.maximumf %21, %22 : vector<256x128xf32>
    %24 = vector.extract_strided_slice %23 {offsets = [0, 0], sizes = [256, 64], strides = [1, 1]} : vector<256x128xf32> to vector<256x64xf32>
    %25 = vector.extract_strided_slice %23 {offsets = [0, 64], sizes = [256, 64], strides = [1, 1]} : vector<256x128xf32> to vector<256x64xf32>
    %26 = arith.maximumf %24, %25 : vector<256x64xf32>
    %27 = vector.extract_strided_slice %26 {offsets = [0, 0], sizes = [256, 32], strides = [1, 1]} : vector<256x64xf32> to vector<256x32xf32>
    %28 = vector.extract_strided_slice %26 {offsets = [0, 32], sizes = [256, 32], strides = [1, 1]} : vector<256x64xf32> to vector<256x32xf32>
    %29 = arith.maximumf %27, %28 : vector<256x32xf32>
    %c0_12 = arith.constant 0 : index
    %c0_13 = arith.constant 0 : index
    %30 = vector.load %arg4[%c0_12, %c0_13] : memref<256x1024xf32, #tpu.memory_space<vmem>>, vector<256x1024xf32>
    tpu.vector_store %arg4[%c0_12, %c0_13], %14 {strides = array<i32>} : memref<256x1024xf32, #tpu.memory_space<vmem>>, vector<256x1024xf32>,
    %c0_14 = arith.constant 0 : index
    %c0_15 = arith.constant 0 : index
    %31 = vector.load %arg5[%c0_14, %c0_15] : memref<256x32xf32, #tpu.memory_space<vmem>>, vector<256x32xf32>
    tpu.vector_store %arg5[%c0_14, %c0_15], %29 {strides = array<i32>} : memref<256x32xf32, #tpu.memory_space<vmem>>, vector<256x32xf32>,
    return
  }
  func.func @transform_0(%arg0: i32) -> (i32, i32) {
    %c0_i32 = arith.constant 0 : i32
    %c0_i32_0 = arith.constant 0 : i32
    return %arg0, %c0_i32 : i32, i32
  }
  func.func @transform_1(%arg0: i32) -> (i32, i32) {
    %c0_i32 = arith.constant 0 : i32
    %c0_i32_0 = arith.constant 0 : i32
    %c0_i32_1 = arith.constant 0 : i32
    return %c0_i32, %c0_i32_0 : i32, i32
  }
  func.func @transform_2(%arg0: i32) -> (i32, i32) {
    %c0_i32 = arith.constant 0 : i32
    %c0_i32_0 = arith.constant 0 : i32
    %c0_i32_1 = arith.constant 0 : i32
    return %c0_i32, %c0_i32_0 : i32, i32
  }
  func.func @transform_3(%arg0: i32) -> (i32, i32) {
    %c0_i32 = arith.constant 0 : i32
    %c0_i32_0 = arith.constant 0 : i32
    return %arg0, %c0_i32 : i32, i32
  }
  func.func @transform_4(%arg0: i32) -> (i32, i32) {
    %c0_i32 = arith.constant 0 : i32
    %c0_i32_0 = arith.constant 0 : i32
    return %arg0, %c0_i32 : i32, i32
  }
}

</mosaic_0001>

<bundles_post_ra>
// kernel: tpu_custom_call.1
= control target key start
LH: loop header
LB: loop body
LE: loop exit
PB: predicated region body
PF: predicated region fallthrough
CT: control target
= control target key end

     0   :  { %10 = vsyncpa [#allocation3], 0  ;;  %s5178_s0 = inlined_call_operand.hbm [shape: f32[512,512], index: 0, kind: input, shape index: {}]   ;;  %s5179_s1 = inlined_call_operand.hbm [shape: f32[128,256], index: 1, kind: input, shape index: {}]   ;;  %s5180_s2 = inlined_call_operand.hbm [shape: f32[1,1024], index: 2, kind: input, shape index: {}]   ;;  %s5181_s3 = inlined_call_operand.hbm [shape: f32[512,1024], index: 3, kind: output, shape index: {0}]   ;;  %s5182_s4 = inlined_call_operand.vmem [shape: f32[512,32], index: 4, kind: output, shape index: {1}]  }
   0x1   :  { %12 = vsyncpa [#allocation3 + $0x1], 0 }
   0x2   :  { %13 = vsyncpa [#allocation6], 0 }
   0x3   :  { %14 = vsyncpa [#allocation4], 0 }
   0x4   :  { %16 = vsyncpa [#allocation4 + $0x1], 0  ;;  %s3529_s15 = smov 0   ;;  %s3531_s16 = smov 0  }
   0x5   :  { %s3533_s17 = smov 0   ;;  %s3535_s18 = smov 0  }
   0x6 LB: > { %s3550_s19 = sadd.s32 4294967295, %s3490_s18   ;;  %s2976_s20 = sadd.s32 4294967294, %s3490_s18   ;;  %s3490_s18 = sphi %s3535_s18, %s5202_s18   ;;  %s3486_s17 = sphi %s3533_s17, %s5201_s17   ;;  %s3482_s16 = sphi %s3531_s16, %s5200_s16   ;;  %s3478_s15 = sphi %s3529_s15, %s5199_s15  }
   0x7   : > { %p42_p0 = scmp.ne.s32.totalorder %s3482_s16, %s3478_s15  ;;  %p5183_p1 = scmp.eq.s32.totalorder %s3550_s19, 0 }
   0x8   : > { %p114_p3 = scmp.eq.s32.totalorder %s2976_s20, 1  ;;  %p2977_p5 = scmp.ge.s32.totalorder %s3490_s18, 1 }
   0x9   : > { %p3559_p4 = por %p5183_p1, %p42_p0  ;;  %p147_p7 = scmp.lt.s32.totalorder %s3490_s18, 3 }
   0xa   : > { %p3564_p6 = por %p114_p3, %p42_p0  ;;  %s3492_s24 = smov [#allocation5]  }
   0xb   : > { %s5186_s21 = scalar_select %p3559_p4, 1, 0 }
   0xc   : > { %s5187_s22 = scalar_select %p3564_p6, 1, 0 }
   0xd   : > { %p3569_p8 = pnand %p2977_p5, %p147_p7  ;;  %s159_s25 = sshll.u32 %s3492_s24, 4  ;;  %s3573_s25 = int_to_ptr.vmem [resolvable:$true] %s159_s25 }
   0xe   : > { %s3493_s27 = smov [#allocation7]   ;;  %s3334_s5 = scalar_lea.hbm %s5179_s1, 4096 }
   0xf   : > { %p3142_p9 = pneg %p3569_p8  ;;  %s173_s28 = sshll.u32 %s3493_s27, 4  ;;  %s3584_s28 = int_to_ptr.vmem [resolvable:$true] %s173_s28 }
  0x10   : > { %p3335_p12 = scmp.ne.s32.totalorder %s5179_s1, %s3334_s5  ;;  %p3341_p5 = scmp.lt.u32.totalorder %s3334_s5, %s5179_s1 }
  0x11   : > { %p3580_p11 = pnand %p3142_p9, %p5183_p1 }
  0x13   : > { %p3336_p13 = pneg %p3580_p11 }
  0x15   : > { %p3337_p0 = pnand %p3336_p13, %p3335_p12 }
  0x17   : > { %p3338_p3 = pneg %p3337_p0 }
  0x19   : > { %p3343_p7 = pnand %p3341_p5, %p3338_p3 }
  0x1b   : > { %3346 = shalt.err (!%p3343_p7)
}
  0x1c   : > { %s3347_s10 = scalar_lea.vmem %s3573_s25, 4096  ;;  %p3355_p2 = scmp.lt.s32.totalorder %s3573_s25, %s3573_s25 }
  0x1d   : > { %p3348_p9 = scmp.ne.s32.totalorder %s3573_s25, %s3347_s10  ;;  %p3356_p12 = scmp.lt.s32.totalorder %s3347_s10, %s3347_s10 }
  0x1f   : > { %p3350_p10 = pnand %p3348_p9, %p3336_p13  ;;  %p3357_p0 = por %p3356_p12, %p3355_p2 }
  0x21   : > { %p3351_p1 = pneg %p3350_p10 }
  0x23   : > { %p3358_p6 = pnand %p3357_p0, %p3351_p1 }
  0x25   : > { %3361 = shalt.err (!%p3358_p6)
}
  0x26   : > { %s3494_s11 = smov 256   ;;  %s3495_s12 = smov 16  }
  0x27   : > { %3145 = dma.hbm_to_vmem [thread:$0]  (!%p3580_p11), %s5179_s1, 4096, %s3573_s25, [#allocation6], %s3494_s11, %s3494_s11, %s3495_s12  }
  0x28   : > { %s3362_s27 = scalar_lea.hbm %s5180_s2, 128 }
  0x29   : > { %p3363_p2 = scmp.ne.s32.totalorder %s5180_s2, %s3362_s27  ;;  %p3369_p10 = scmp.lt.u32.totalorder %s3362_s27, %s5180_s2 }
  0x2b   : > { %p3365_p1 = pnand %p3363_p2, %p3336_p13 }
  0x2d   : > { %p3366_p6 = pneg %p3365_p1 }
  0x2f   : > { %p3371_p3 = pnand %p3369_p10, %p3366_p6 }
  0x31   : > { %3374 = shalt.err (!%p3371_p3)
}
  0x32   : > { %s3375_s25 = scalar_lea.vmem %s3584_s28, 128  ;;  %p3383_p12 = scmp.lt.s32.totalorder %s3584_s28, %s3584_s28 }
  0x33   : > { %p3376_p5 = scmp.ne.s32.totalorder %s3584_s28, %s3375_s25  ;;  %p3384_p0 = scmp.lt.s32.totalorder %s3375_s25, %s3375_s25 }
  0x35   : > { %p3378_p7 = pnand %p3376_p5, %p3336_p13  ;;  %p3385_p2 = por %p3384_p0, %p3383_p12 }
  0x37   : > { %p3379_p9 = pneg %p3378_p7 }
  0x39   : > { %p3386_p1 = pnand %p3385_p2, %p3379_p9 }
  0x3b   : > { %3389 = shalt.err (!%p3386_p1)
}
  0x3c   : > { %3148 = dma.hbm_to_vmem [thread:$0]  (!%p3580_p11), %s5180_s2, 128, %s3584_s28, [#allocation6]  }
  0x3d   : > { %s3639_s9 = sadd.s32 1, %s3490_s18   ;;  %s29_s26 = sadd.s32 1, %s3486_s17 }
  0x3e   : > { %s26_s10 = ssub.s32 %s3490_s18, %s3639_s9  ;;  %p36_p13 = scmp.ne.s32.totalorder %s3486_s17, %s3482_s16 }
  0x3f   : > { %p27_p6 = scmp.eq.s32.totalorder %s26_s10, 0  ;;  %p37_p10 = scmp.eq.s32.totalorder %s3490_s18, 0 }
  0x40   : > { %p5190_p3 = scmp.eq.s32.totalorder %s3550_s19, 1  ;;  %p3159_p7 = scmp.lt.s32.totalorder %s3490_s18, 2 }
  0x41   : > { %s3655_s12 = scalar_select %p27_p6, %s3486_s17, %s29_s26  }
  0x42   : > { %p3649_p5 = por %p5190_p3, %p36_p13  ;;  %p38_p9 = por %p37_p10, %p36_p13 }
  0x43   : > { %s184_s13 = sand.u32 1, %s3486_s17   ;;  %s2999_s28 = sshll.u32 %s3490_s18, 14 }
  0x44   : > { %s5191_s11 = scalar_select %p3649_p5, 1, 0 }
  0x45   : > { %s2981_s14 = sshll.u32 %s184_s13, 10  ;;  %s3662_s27 = scalar_lea.hbm %s5178_s0, %s2999_s28 }
  0x46   : > { %s188_s29 = scalar_lea.vmem [#allocation2], %s2981_s14  ;;  %p3666_p11 = pnand %p3159_p7, %p38_p9 }
  0x47   : > { %s196_s30 = sshll.u32 %s188_s29, 4  ;;  %s3670_s6 = scalar_lea.sflag [#allocation3], %s184_s13  ;;  %s3664_s30 = int_to_ptr.vmem [resolvable:$true] %s196_s30 }
  0x48   : > { %s3390_s25 = scalar_lea.hbm %s3662_s27, 16384  ;;  %p3392_p0 = pneg %p3666_p11 }
  0x49   : > { %p3391_p12 = scmp.ne.s32.totalorder %s3662_s27, %s3390_s25  ;;  %s3395_s26 = scalar_lea.hbm %s5178_s0, 32768 }
  0x4a   : > { %p3396_p13 = scmp.lt.u32.totalorder %s3662_s27, %s5178_s0  ;;  %p3397_p6 = scmp.lt.u32.totalorder %s3395_s26, %s3390_s25 }
  0x4b   : > { %p3393_p2 = pnand %p3392_p0, %p3391_p12  ;;  %p3399_p3 = scmp.lt.u32.totalorder %s3390_s25, %s3662_s27 }
  0x4c   : > { %p3398_p10 = por %p3397_p6, %p3396_p13 }
  0x4d   : > { %p3394_p1 = pneg %p3393_p2 }
  0x4e   : > { %p3400_p7 = por %p3399_p3, %p3398_p10 }
  0x50   : > { %p3401_p9 = pnand %p3400_p7, %p3394_p1 }
  0x52   : > { %3404 = shalt.err (!%p3401_p9)
}
  0x53   : > { %s3405_s13 = scalar_lea.vmem %s3664_s30, 16384  ;;  %s3496_s28 = smov [#allocation2]  }
  0x54   : > { %p3406_p12 = scmp.ne.s32.totalorder %s3664_s30, %s3405_s13  ;;  %s3410_s20 = sshll.u32 %s3496_s28, 4  ;;  %s3411_s20 = int_to_ptr.vmem [resolvable:$false] %s3410_s20 }
  0x55   : > { %s3412_s24 = scalar_lea.vmem %s3411_s20, 32768  ;;  %p3413_p4 = scmp.lt.s32.totalorder %s3664_s30, %s3411_s20 }
  0x56   : > { %p3408_p2 = pnand %p3406_p12, %p3392_p0  ;;  %p3414_p13 = scmp.lt.s32.totalorder %s3412_s24, %s3405_s13 }
  0x58   : > { %p3409_p5 = pneg %p3408_p2  ;;  %p3415_p6 = por %p3414_p13, %p3413_p4 }
  0x5a   : > { %p3416_p10 = pnand %p3415_p6, %p3409_p5 }
  0x5c   : > { %3419 = shalt.err (!%p3416_p10)
}
  0x5d   : > { %s3497_s29 = smov 512   ;;  %s3498_s25 = smov 32  }
  0x5e   : > { %3152 = dma.hbm_to_vmem [thread:$0]  (!%p3666_p11), %s3662_s27, 16384, %s3664_s30, %s3670_s6, %s3497_s29, %s3497_s29, %s3498_s25  }
  0x5f   : > { %208 = sbr.rel (%p3569_p8) target bundleno = 864 (0x360), region = 32  ;;  %s3701_s7 = sand.u32 (!%p3569_p8), 1, %s3482_s16  }
  0x60   : > { %s2986_s8 = sshll.u32 (!%p3569_p8), %s3701_s7, 10  ;;  %s211_s26 = scalar_lea.sflag (!%p3569_p8), [#allocation3], %s3701_s7 }
  0x61   : > { %s3705_s10 = scalar_lea.vmem (!%p3569_p8), [#allocation2], %s2986_s8  ;;  %p5193_p4 = scmp.ne.s32.totalorder (!%p3569_p8), %s5186_s21, 0 }
  0x66   : > { %3465 = dma.done.wait (%p5193_p4), %s211_s26, 16384  }
  0x67   : > { %3467 = vsyncadd (%p5193_p4), %s211_s26, 4294950912  ;;  %p5194_p5 = scmp.eq.s32.totalorder %s3550_s19, 0 }
  0x69   : > { %3469 = dma.done.wait (%p5194_p5), [#allocation6], 4224   ;;  %p5195_p8 = pmov %p5194_p5 }
  0x6a   : > { %v3499_v0 = vmov 0.0   ;;  %v261_v1 = vld [vmem:[#allocation5 + $0x8] sm:$0xff]  ;;  %v263_v2 = vld [vmem:[#allocation5 + $0x18] sm:$0xff]  ;;  %v260_v3 = vld [vmem:[#allocation5] sm:$0xff]  ;;  %s2989_s21 = sshll.u32 %s3701_s7, 11  ;;  %s3500_s27 = smov 64  }
  0x6b   : > { %3471 = vsyncadd (%p5195_p8), [#allocation6], 4294963072  ;;  %388 = vmatprep.mubr.f32.mxu0 %v3499_v0  ;;  %677 = vmatprep.mubr.f32.mxu1 %v3499_v0  ;;  %v3717_v4 = vpack.c.bf16 %v263_v2, %v261_v1  ;;  %v262_v5 = vld [vmem:[#allocation5 + $0x10] sm:$0xff]  ;;  %v265_v6 = vld [vmem:[#allocation5 + $0x28] sm:$0xff]  ;;  %s4050_s23 = scalar_lea.vmem [#allocation8], %s2989_s21  ;;  %s3501_s30 = smov 96  }
  0x6c   : > { %v267_v7 = vld [vmem:[#allocation5 + $0x38] sm:$0xff]  ;;  %v3719_v8 = vpack.c.bf16 %v262_v5, %v260_v3  ;;  %v264_v10 = vld [vmem:[#allocation5 + $0x20] sm:$0xff]  ;;  %v266_v11 = vld [vmem:[#allocation5 + $0x30] sm:$0xff]  ;;  %s2990_s5 = sshll.u32 %s3550_s19, 5  ;;  %s3001_s20 = sshll.u32 %s3550_s19, 15  ;;  %vm2802_vm0 = vcmask 261120  }
  0x6d   : > { %v3721_v9 = vpack.c.bf16 %v267_v7, %v265_v6  ;;  %v269_v12 = vld [vmem:[#allocation5 + $0x48] sm:$0xff]  ;;  %3003 = vmatprep.subr.bf16.mxu0 %v3717_v4  ;;  %3035 = vmatprep.subr.bf16.mxu1 %v3717_v4  ;;  %v271_v13 = vld [vmem:[#allocation5 + $0x58] sm:$0xff]  ;;  %v3727_v14 = vpack.c.bf16 %v266_v11, %v264_v10  ;;  %v268_v16 = vld [vmem:[#allocation5 + $0x40] sm:$0xff]  ;;  %p255_p11 = scmp.lt.s32.totalorder %s2990_s5, 63  ;;  %s2855_s24 = sshll.u32 %s4050_s23, 4  ;;  %s5025_s24 = int_to_ptr.vmem [resolvable:$true] %s2855_s24 }
  0x6e   : > { %3005 = vmatpush1.bf16.msra.mxu0 %v3719_v8  ;;  %3037 = vmatpush1.bf16.msra.mxu1 %v3719_v8  ;;  %v3731_v15 = vpack.c.bf16 %v271_v13, %v269_v12  ;;  %v270_v17 = vld [vmem:[#allocation5 + $0x50] sm:$0xff]  ;;  %v273_v18 = vld [vmem:[#allocation5 + $0x68] sm:$0xff]  ;;  %v275_v19 = vld [vmem:[#allocation5 + $0x78] sm:$0xff]  ;;  %s5020_s8 = scalar_lea.hbm %s5181_s3, %s3001_s20  ;;  %s2836_s19 = scalar_lea.sflag [#allocation4], %s3701_s7 }
  0x6f   : > { %3007 = vmatprep.subr.bf16.mxu0 %v3721_v9  ;;  %3039 = vmatprep.subr.bf16.mxu1 %v3721_v9  ;;  %v3735_v20 = vpack.c.bf16 %v270_v17, %v268_v16  ;;  %v3739_v21 = vpack.c.bf16 %v275_v19, %v273_v18  ;;  %v272_v22 = vld [vmem:[#allocation5 + $0x60] sm:$0xff]  ;;  %v274_v23 = vld [vmem:[#allocation5 + $0x70] sm:$0xff]  ;;  %v277_v24 = vld [vmem:[#allocation5 + $0x88] sm:$0xff]  ;;  %s5204_s5 = smov (!%p255_p11, %s2990_s5), 63  ;;  %s3420_s26 = scalar_lea.vmem %s5025_s24, 32768 }
  0x70   : > { %v279_v25 = vld [vmem:[#allocation5 + $0x98] sm:$0xff]  ;;  %v3743_v26 = vpack.c.bf16 %v274_v23, %v272_v22  ;;  %v276_v28 = vld [vmem:[#allocation5 + $0x80] sm:$0xff]  ;;  %v278_v29 = vld [vmem:[#allocation5 + $0x90] sm:$0xff]  ;;  %s2991_s6 = sshll.u32 %s5204_s5, 3  ;;  %p3421_p0 = scmp.ne.s32.totalorder %s5025_s24, %s3420_s26 }
  0x71   : > { %v3747_v27 = vpack.c.bf16 %v279_v25, %v277_v24  ;;  %v281_v30 = vld [vmem:[#allocation5 + $0xa8] sm:$0xff]  ;;  %v283_v31 = vld [vmem:[#allocation5 + $0xb8] sm:$0xff]  ;;  %v3751_v32 = vpack.c.bf16 %v278_v29, %v276_v28  ;;  %v280_v34 = vld [vmem:[#allocation5 + $0xa0] sm:$0xff]  ;;  %s5011_s28 = scalar_lea.vmem %s5182_s4, %s2991_s6  ;;  %p5196_p1 = scmp.ne.s32.totalorder %s5191_s11, 0 }
  0x72   : > { %3009 = vmatpush1.bf16.msra.mxu0 %v3727_v14  ;;  %3041 = vmatpush1.bf16.msra.mxu1 %v3727_v14  ;;  %v3755_v33 = vpack.c.bf16 %v283_v31, %v281_v30  ;;  %v282_v35 = vld [vmem:[#allocation5 + $0xb0] sm:$0xff]  ;;  %v285_v36 = vld [vmem:[#allocation5 + $0xc8] sm:$0xff]  ;;  %v287_v37 = vld [vmem:[#allocation5 + $0xd8] sm:$0xff] }
  0x73   : > { %3011 = vmatprep.subr.bf16.mxu0 %v3731_v15  ;;  %3043 = vmatprep.subr.bf16.mxu1 %v3731_v15  ;;  %v3759_v38 = vpack.c.bf16 %v282_v35, %v280_v34  ;;  %v3763_v39 = vpack.c.bf16 %v287_v37, %v285_v36  ;;  %v284_v40 = vld [vmem:[#allocation5 + $0xc0] sm:$0xff]  ;;  %v286_v41 = vld [vmem:[#allocation5 + $0xd0] sm:$0xff]  ;;  %v289_v42 = vld [vmem:[#allocation5 + $0xe8] sm:$0xff]  ;;  %p3422_p3 = pnand %p3421_p0, %p5196_p1 }
  0x74   : > { %v291_v43 = vld [vmem:[#allocation5 + $0xf8] sm:$0xff]  ;;  %v3767_v44 = vpack.c.bf16 %v286_v41, %v284_v40  ;;  %v288_v46 = vld [vmem:[#allocation5 + $0xe0] sm:$0xff]  ;;  %v290_v47 = vld [vmem:[#allocation5 + $0xf0] sm:$0xff] }
  0x75   : > { %v3771_v45 = vpack.c.bf16 %v291_v43, %v289_v42  ;;  %v3775_v48 = vpack.c.bf16 %v290_v47, %v288_v46  ;;  %v292_v49 = vld [vmem:[%s3705_s10] sm:$0xff]  ;;  %v581_v50 = vld [vmem:[%s3705_s10 + $0x8] sm:$0xff]  ;;  %p3423_p7 = pneg %p3422_p3 }
  0x76   : > { %3013 = vmatpush1.bf16.msra.mxu0 %v3735_v20  ;;  %3045 = vmatpush1.bf16.msra.mxu1 %v3735_v20  ;;  %v293_v51 = vld [vmem:[%s3705_s10 + $0x20] sm:$0xff]  ;;  %v582_v52 = vld [vmem:[%s3705_s10 + $0x28] sm:$0xff] }
  0x77   : > { %3015 = vmatprep.subr.bf16.mxu0 %v3739_v21  ;;  %3047 = vmatprep.subr.bf16.mxu1 %v3739_v21  ;;  %v294_v53 = vld [vmem:[%s3705_s10 + $0x40] sm:$0xff]  ;;  %v583_v54 = vld [vmem:[%s3705_s10 + $0x48] sm:$0xff] }
  0x78   : > { %v295_v55 = vld [vmem:[%s3705_s10 + $0x60] sm:$0xff]  ;;  %v584_v56 = vld [vmem:[%s3705_s10 + $0x68] sm:$0xff] }
  0x79   : > { %v296_v57 = vld [vmem:[%s3705_s10 + $0x80] sm:$0xff]  ;;  %v585_v58 = vld [vmem:[%s3705_s10 + $0x88] sm:$0xff] }
  0x7a   : > { %3017 = vmatpush1.bf16.msra.mxu0 %v3743_v26  ;;  %3049 = vmatpush1.bf16.msra.mxu1 %v3743_v26  ;;  %v297_v59 = vld [vmem:[%s3705_s10 + $0xa0] sm:$0xff]  ;;  %v586_v60 = vld [vmem:[%s3705_s10 + $0xa8] sm:$0xff] }
  0x7b   : > { %3019 = vmatprep.subr.bf16.mxu0 %v3747_v27  ;;  %3051 = vmatprep.subr.bf16.mxu1 %v3747_v27  ;;  %v298_v61 = vld [vmem:[%s3705_s10 + $0xc0] sm:$0xff]  ;;  %v587_v62 = vld [vmem:[%s3705_s10 + $0xc8] sm:$0xff] }
  0x7c   : > { %v299_v63 = vld [vmem:[%s3705_s10 + $0xe0] sm:$0xff]  ;;  %v588_v1 = vld [vmem:[%s3705_s10 + $0xe8] sm:$0xff] }
  0x7d   : > { %v300_v2 = vld [vmem:[%s3705_s10 + $0x100] sm:$0xff]  ;;  %v589_v3 = vld [vmem:[%s3705_s10 + $0x108] sm:$0xff] }
  0x7e   : > { %3021 = vmatpush1.bf16.msra.mxu0 %v3751_v32  ;;  %3053 = vmatpush1.bf16.msra.mxu1 %v3751_v32  ;;  %v590_v5 = vld [vmem:[%s3705_s10 + $0x128] sm:$0xff]  ;;  %v302_v6 = vld [vmem:[%s3705_s10 + $0x140] sm:$0xff] }
  0x7f   : > { %3023 = vmatprep.subr.bf16.mxu0 %v3755_v33  ;;  %3055 = vmatprep.subr.bf16.mxu1 %v3755_v33  ;;  %v591_v7 = vld [vmem:[%s3705_s10 + $0x148] sm:$0xff]  ;;  %v304_v10 = vld [vmem:[%s3705_s10 + $0x180] sm:$0xff] }
  0x80   : > { %v593_v11 = vld [vmem:[%s3705_s10 + $0x188] sm:$0xff]  ;;  %v305_v12 = vld [vmem:[%s3705_s10 + $0x1a0] sm:$0xff] }
  0x81   : > { %v594_v13 = vld [vmem:[%s3705_s10 + $0x1a8] sm:$0xff]  ;;  %v307_v16 = vld [vmem:[%s3705_s10 + $0x1e0] sm:$0xff] }
  0x82   : > { %3025 = vmatpush1.bf16.msra.mxu0 %v3759_v38  ;;  %3057 = vmatpush1.bf16.msra.mxu1 %v3759_v38  ;;  %v596_v17 = vld [vmem:[%s3705_s10 + $0x1e8] sm:$0xff]  ;;  %v308_v18 = vld [vmem:[%s3705_s10 + $0x200] sm:$0xff] }
  0x83   : > { %3027 = vmatprep.subr.bf16.mxu0 %v3763_v39  ;;  %3059 = vmatprep.subr.bf16.mxu1 %v3763_v39  ;;  %v597_v19 = vld [vmem:[%s3705_s10 + $0x208] sm:$0xff]  ;;  %v310_v22 = vld [vmem:[%s3705_s10 + $0x240] sm:$0xff] }
  0x84   : > { %v599_v23 = vld [vmem:[%s3705_s10 + $0x248] sm:$0xff]  ;;  %v311_v24 = vld [vmem:[%s3705_s10 + $0x260] sm:$0xff] }
  0x85   : > { %v600_v25 = vld [vmem:[%s3705_s10 + $0x268] sm:$0xff]  ;;  %v313_v28 = vld [vmem:[%s3705_s10 + $0x2a0] sm:$0xff] }
  0x86   : > { %3029 = vmatpush1.bf16.msra.mxu0 %v3767_v44  ;;  %3061 = vmatpush1.bf16.msra.mxu1 %v3767_v44  ;;  %v602_v29 = vld [vmem:[%s3705_s10 + $0x2a8] sm:$0xff]  ;;  %v314_v30 = vld [vmem:[%s3705_s10 + $0x2c0] sm:$0xff] }
  0x87   : > { %3031 = vmatprep.subr.bf16.mxu0 %v3771_v45  ;;  %3063 = vmatprep.subr.bf16.mxu1 %v3771_v45  ;;  %v603_v31 = vld [vmem:[%s3705_s10 + $0x2c8] sm:$0xff]  ;;  %v316_v34 = vld [vmem:[%s3705_s10 + $0x300] sm:$0xff] }
  0x88   : > { %v605_v35 = vld [vmem:[%s3705_s10 + $0x308] sm:$0xff]  ;;  %v317_v36 = vld [vmem:[%s3705_s10 + $0x320] sm:$0xff] }
  0x89   : > { %v606_v37 = vld [vmem:[%s3705_s10 + $0x328] sm:$0xff]  ;;  %v319_v40 = vld [vmem:[%s3705_s10 + $0x360] sm:$0xff] }
  0x8a   : > { %3033 = vmatpush1.bf16.msra.mxu0 %v3775_v48  ;;  %3065 = vmatpush1.bf16.msra.mxu1 %v3775_v48  ;;  %v608_v41 = vld [vmem:[%s3705_s10 + $0x368] sm:$0xff]  ;;  %v320_v42 = vld [vmem:[%s3705_s10 + $0x380] sm:$0xff] }
  0x8b   : > { %3067 = vmatprep.subr.bf16.mxu0 %v3717_v4  ;;  %3099 = vmatprep.subr.bf16.mxu1 %v3717_v4  ;;  %v301_v4 = vld [vmem:[%s3705_s10 + $0x120] sm:$0xff]  ;;  %v609_v43 = vld [vmem:[%s3705_s10 + $0x388] sm:$0xff] }
  0x8c   : > { %v322_v46 = vld [vmem:[%s3705_s10 + $0x3c0] sm:$0xff]  ;;  %v611_v47 = vld [vmem:[%s3705_s10 + $0x3c8] sm:$0xff] }
  0x8d   : > { %389 = vmatmul.mubr.f32.vlgmr.msra.gmra.mrb[0].mxu0 %v292_v49  ;;  %678 = vmatmul.mubr.f32.vlgmr.msra.gmra.mrb[0].mxu1 %v581_v50  ;;  %v612_v49 = vld [vmem:[%s3705_s10 + $0x3e8] sm:$0xff]  ;;  %v870_v50 = vld [vmem:[%s3705_s10 + $0x10] sm:$0xff] }
  0x8e   : > { %3069 = vmatpush1.bf16.msra.mxu0 %v3719_v8  ;;  %3101 = vmatpush1.bf16.msra.mxu1 %v3719_v8  ;;  %v303_v8 = vld [vmem:[%s3705_s10 + $0x160] sm:$0xff] }
  0x8f   : > { %394 = vmatprep.mubr.f32.mxu0 %v3499_v0  ;;  %683 = vmatprep.mubr.f32.mxu1 %v3499_v0 }
  0x90   : > { %3071 = vmatprep.subr.bf16.mxu0 %v3721_v9  ;;  %3103 = vmatprep.subr.bf16.mxu1 %v3721_v9  ;;  %v592_v9 = vld [vmem:[%s3705_s10 + $0x168] sm:$0xff] }
  0x91   : > { %395 = vmatmul.mubr.f32.gmra.mrb[2].mxu0 %v293_v51  ;;  %684 = vmatmul.mubr.f32.gmra.mrb[2].mxu1 %v582_v52  ;;  %v1159_v51 = vld [vmem:[%s3705_s10 + $0x18] sm:$0xff]  ;;  %v871_v52 = vld [vmem:[%s3705_s10 + $0x30] sm:$0xff] }
  0x92   : > { %400 = vmatprep.mubr.f32.mxu0 %v3499_v0  ;;  %689 = vmatprep.mubr.f32.mxu1 %v3499_v0 }
  0x93   : > { %3073 = vmatpush1.bf16.msra.mxu0 %v3727_v14  ;;  %3105 = vmatpush1.bf16.msra.mxu1 %v3727_v14  ;;  %v306_v14 = vld [vmem:[%s3705_s10 + $0x1c0] sm:$0xff] }
  0x94   : > { %3075 = vmatprep.subr.bf16.mxu0 %v3731_v15  ;;  %3107 = vmatprep.subr.bf16.mxu1 %v3731_v15  ;;  %v595_v15 = vld [vmem:[%s3705_s10 + $0x1c8] sm:$0xff] }
  0x95   : > { %401 = vmatmul.mubr.f32.gmra.mrb[4].mxu0 %v294_v53  ;;  %690 = vmatmul.mubr.f32.gmra.mrb[4].mxu1 %v583_v54  ;;  %v1160_v53 = vld [vmem:[%s3705_s10 + $0x38] sm:$0xff]  ;;  %v872_v54 = vld [vmem:[%s3705_s10 + $0x50] sm:$0xff] }
  0x96   : > { %406 = vmatprep.mubr.f32.mxu0 %v3499_v0  ;;  %695 = vmatprep.mubr.f32.mxu1 %v3499_v0 }
  0x97   : > { %3077 = vmatpush1.bf16.msra.mxu0 %v3735_v20  ;;  %3109 = vmatpush1.bf16.msra.mxu1 %v3735_v20  ;;  %v309_v20 = vld [vmem:[%s3705_s10 + $0x220] sm:$0xff] }
  0x98   : > { %3079 = vmatprep.subr.bf16.mxu0 %v3739_v21  ;;  %3111 = vmatprep.subr.bf16.mxu1 %v3739_v21  ;;  %v598_v21 = vld [vmem:[%s3705_s10 + $0x228] sm:$0xff] }
  0x99   : > { %407 = vmatmul.mubr.f32.gmra.mrb[6].mxu0 %v295_v55  ;;  %696 = vmatmul.mubr.f32.gmra.mrb[6].mxu1 %v584_v56  ;;  %v1161_v55 = vld [vmem:[%s3705_s10 + $0x58] sm:$0xff]  ;;  %v873_v56 = vld [vmem:[%s3705_s10 + $0x70] sm:$0xff] }
  0x9a   : > { %412 = vmatprep.mubr.f32.mxu0 %v3499_v0  ;;  %701 = vmatprep.mubr.f32.mxu1 %v3499_v0 }
  0x9b   : > { %3081 = vmatpush1.bf16.msra.mxu0 %v3743_v26  ;;  %3113 = vmatpush1.bf16.msra.mxu1 %v3743_v26  ;;  %v312_v26 = vld [vmem:[%s3705_s10 + $0x280] sm:$0xff] }
  0x9c   : > { %3083 = vmatprep.subr.bf16.mxu0 %v3747_v27  ;;  %3115 = vmatprep.subr.bf16.mxu1 %v3747_v27  ;;  %v601_v27 = vld [vmem:[%s3705_s10 + $0x288] sm:$0xff] }
  0x9d   : > { %413 = vmatmul.mubr.f32.gmra.mrb[8].mxu0 %v296_v57  ;;  %702 = vmatmul.mubr.f32.gmra.mrb[8].mxu1 %v585_v58  ;;  %v1162_v57 = vld [vmem:[%s3705_s10 + $0x78] sm:$0xff]  ;;  %v874_v58 = vld [vmem:[%s3705_s10 + $0x90] sm:$0xff] }
  0x9e   : > { %418 = vmatprep.mubr.f32.mxu0 %v3499_v0  ;;  %707 = vmatprep.mubr.f32.mxu1 %v3499_v0 }
  0x9f   : > { %3085 = vmatpush1.bf16.msra.mxu0 %v3751_v32  ;;  %3117 = vmatpush1.bf16.msra.mxu1 %v3751_v32  ;;  %v315_v32 = vld [vmem:[%s3705_s10 + $0x2e0] sm:$0xff] }
  0xa0   : > { %3087 = vmatprep.subr.bf16.mxu0 %v3755_v33  ;;  %3119 = vmatprep.subr.bf16.mxu1 %v3755_v33  ;;  %v604_v33 = vld [vmem:[%s3705_s10 + $0x2e8] sm:$0xff] }
  0xa1   : > { %419 = vmatmul.mubr.f32.gmra.mrb[10].mxu0 %v297_v59  ;;  %708 = vmatmul.mubr.f32.gmra.mrb[10].mxu1 %v586_v60  ;;  %v1163_v59 = vld [vmem:[%s3705_s10 + $0x98] sm:$0xff]  ;;  %v875_v60 = vld [vmem:[%s3705_s10 + $0xb0] sm:$0xff] }
  0xa2   : > { %424 = vmatprep.mubr.f32.mxu0 %v3499_v0  ;;  %713 = vmatprep.mubr.f32.mxu1 %v3499_v0 }
  0xa3   : > { %3089 = vmatpush1.bf16.msra.mxu0 %v3759_v38  ;;  %3121 = vmatpush1.bf16.msra.mxu1 %v3759_v38  ;;  %v318_v38 = vld [vmem:[%s3705_s10 + $0x340] sm:$0xff] }
  0xa4   : > { %3091 = vmatprep.subr.bf16.mxu0 %v3763_v39  ;;  %3123 = vmatprep.subr.bf16.mxu1 %v3763_v39  ;;  %v607_v39 = vld [vmem:[%s3705_s10 + $0x348] sm:$0xff] }
  0xa5   : > { %425 = vmatmul.mubr.f32.gmra.mrb[12].mxu0 %v298_v61  ;;  %714 = vmatmul.mubr.f32.gmra.mrb[12].mxu1 %v587_v62  ;;  %v1164_v61 = vld [vmem:[%s3705_s10 + $0xb8] sm:$0xff]  ;;  %v876_v62 = vld [vmem:[%s3705_s10 + $0xd0] sm:$0xff] }
  0xa6   : > { %430 = vmatprep.mubr.f32.mxu0 %v3499_v0  ;;  %719 = vmatprep.mubr.f32.mxu1 %v3499_v0 }
  0xa7   : > { %3093 = vmatpush1.bf16.msra.mxu0 %v3767_v44  ;;  %3125 = vmatpush1.bf16.msra.mxu1 %v3767_v44  ;;  %v321_v44 = vld [vmem:[%s3705_s10 + $0x3a0] sm:$0xff] }
  0xa8   : > { %3095 = vmatprep.subr.bf16.mxu0 %v3771_v45  ;;  %3127 = vmatprep.subr.bf16.mxu1 %v3771_v45  ;;  %v610_v45 = vld [vmem:[%s3705_s10 + $0x3a8] sm:$0xff] }
  0xa9   : > { %431 = vmatmul.mubr.f32.gmra.mrb[14].mxu0 %v299_v63  ;;  %720 = vmatmul.mubr.f32.gmra.mrb[14].mxu1 %v588_v1  ;;  %v1165_v63 = vld [vmem:[%s3705_s10 + $0xd8] sm:$0xff]  ;;  %v877_v1 = vld [vmem:[%s3705_s10 + $0xf0] sm:$0xff] }
  0xaa   : > { %436 = vmatprep.mubr.f32.mxu0 %v3499_v0  ;;  %725 = vmatprep.mubr.f32.mxu1 %v3499_v0 }
  0xab   : > { %3097 = vmatpush1.bf16.msra.mxu0 %v3775_v48  ;;  %3129 = vmatpush1.bf16.msra.mxu1 %v3775_v48  ;;  %v323_v48 = vld [vmem:[%s3705_s10 + $0x3e0] sm:$0xff] }
  0xad   : > { %437 = vmatmul.mubr.f32.gmra.mrb[16].mxu0 %v300_v2  ;;  %726 = vmatmul.mubr.f32.gmra.mrb[16].mxu1 %v589_v3  ;;  %v1166_v2 = vld [vmem:[%s3705_s10 + $0xf8] sm:$0xff]  ;;  %v878_v3 = vld [vmem:[%s3705_s10 + $0x110] sm:$0xff] }
  0xae   : > { %442 = vmatprep.mubr.f32.mxu0 %v3499_v0  ;;  %731 = vmatprep.mubr.f32.mxu1 %v3499_v0 }
  0xb1   : > { %443 = vmatmul.mubr.f32.gmra.mrb[18].mxu0 %v301_v4  ;;  %732 = vmatmul.mubr.f32.gmra.mrb[18].mxu1 %v590_v5  ;;  %v1167_v4 = vld [vmem:[%s3705_s10 + $0x118] sm:$0xff]  ;;  %v879_v5 = vld [vmem:[%s3705_s10 + $0x130] sm:$0xff] }
  0xb2   : > { %448 = vmatprep.mubr.f32.mxu0 %v3499_v0  ;;  %737 = vmatprep.mubr.f32.mxu1 %v3499_v0 }
  0xb5   : > { %449 = vmatmul.mubr.f32.gmra.mrb[20].mxu0 %v302_v6  ;;  %738 = vmatmul.mubr.f32.gmra.mrb[20].mxu1 %v591_v7  ;;  %v1168_v6 = vld [vmem:[%s3705_s10 + $0x138] sm:$0xff]  ;;  %v880_v7 = vld [vmem:[%s3705_s10 + $0x150] sm:$0xff] }
  0xb6   : > { %454 = vmatprep.mubr.f32.mxu0 %v3499_v0  ;;  %743 = vmatprep.mubr.f32.mxu1 %v3499_v0 }
  0xb9   : > { %455 = vmatmul.mubr.f32.gmra.mrb[22].mxu0 %v303_v8  ;;  %744 = vmatmul.mubr.f32.gmra.mrb[22].mxu1 %v592_v9  ;;  %v1169_v8 = vld [vmem:[%s3705_s10 + $0x158] sm:$0xff]  ;;  %v881_v9 = vld [vmem:[%s3705_s10 + $0x170] sm:$0xff] }
  0xba   : > { %460 = vmatprep.mubr.f32.mxu0 %v3499_v0  ;;  %749 = vmatprep.mubr.f32.mxu1 %v3499_v0 }
  0xbd   : > { %461 = vmatmul.mubr.f32.gmra.mrb[24].mxu0 %v304_v10  ;;  %750 = vmatmul.mubr.f32.gmra.mrb[24].mxu1 %v593_v11  ;;  %v1170_v10 = vld [vmem:[%s3705_s10 + $0x178] sm:$0xff]  ;;  %v882_v11 = vld [vmem:[%s3705_s10 + $0x190] sm:$0xff] }
  0xbe   : > { %466 = vmatprep.mubr.f32.mxu0 %v3499_v0  ;;  %755 = vmatprep.mubr.f32.mxu1 %v3499_v0 }
  0xc1   : > { %467 = vmatmul.mubr.f32.gmra.mrb[26].mxu0 %v305_v12  ;;  %756 = vmatmul.mubr.f32.gmra.mrb[26].mxu1 %v594_v13  ;;  %v1171_v12 = vld [vmem:[%s3705_s10 + $0x198] sm:$0xff]  ;;  %v883_v13 = vld [vmem:[%s3705_s10 + $0x1b0] sm:$0xff] }
  0xc2   : > { %472 = vmatprep.mubr.f32.mxu0 %v3499_v0  ;;  %761 = vmatprep.mubr.f32.mxu1 %v3499_v0 }
  0xc5   : > { %473 = vmatmul.mubr.f32.gmra.mrb[28].mxu0 %v306_v14  ;;  %762 = vmatmul.mubr.f32.gmra.mrb[28].mxu1 %v595_v15  ;;  %v1172_v14 = vld [vmem:[%s3705_s10 + $0x1b8] sm:$0xff]  ;;  %v884_v15 = vld [vmem:[%s3705_s10 + $0x1d0] sm:$0xff] }
  0xc6   : > { %478 = vmatprep.mubr.f32.mxu0 %v3499_v0  ;;  %767 = vmatprep.mubr.f32.mxu1 %v3499_v0 }
  0xc9   : > { %479 = vmatmul.mubr.f32.gmra.mrb[30].mxu0 %v307_v16  ;;  %768 = vmatmul.mubr.f32.gmra.mrb[30].mxu1 %v596_v17  ;;  %v1173_v16 = vld [vmem:[%s3705_s10 + $0x1d8] sm:$0xff]  ;;  %v885_v17 = vld [vmem:[%s3705_s10 + $0x1f0] sm:$0xff] }
  0xca   : > { %484 = vmatprep.mubr.f32.mxu0 %v3499_v0  ;;  %773 = vmatprep.mubr.f32.mxu1 %v3499_v0 }
  0xcd   : > { %485 = vmatmul.mubr.f32.gmra.mrb[32].mxu0 %v308_v18  ;;  %774 = vmatmul.mubr.f32.gmra.mrb[32].mxu1 %v597_v19  ;;  %v1174_v18 = vld [vmem:[%s3705_s10 + $0x1f8] sm:$0xff]  ;;  %v886_v19 = vld [vmem:[%s3705_s10 + $0x210] sm:$0xff] }
  0xce   : > { %490 = vmatprep.mubr.f32.mxu0 %v3499_v0  ;;  %779 = vmatprep.mubr.f32.mxu1 %v3499_v0 }
  0xd1   : > { %491 = vmatmul.mubr.f32.gmra.mrb[34].mxu0 %v309_v20  ;;  %780 = vmatmul.mubr.f32.gmra.mrb[34].mxu1 %v598_v21  ;;  %v1175_v20 = vld [vmem:[%s3705_s10 + $0x218] sm:$0xff]  ;;  %v887_v21 = vld [vmem:[%s3705_s10 + $0x230] sm:$0xff] }
  0xd2   : > { %496 = vmatprep.mubr.f32.mxu0 %v3499_v0  ;;  %785 = vmatprep.mubr.f32.mxu1 %v3499_v0 }
  0xd5   : > { %497 = vmatmul.mubr.f32.gmra.mrb[36].mxu0 %v310_v22  ;;  %786 = vmatmul.mubr.f32.gmra.mrb[36].mxu1 %v599_v23  ;;  %v1176_v22 = vld [vmem:[%s3705_s10 + $0x238] sm:$0xff]  ;;  %v1450_v23 = vlaneseq }
  0xd6   : > { %502 = vmatprep.mubr.f32.mxu0 %v3499_v0  ;;  %791 = vmatprep.mubr.f32.mxu1 %v3499_v0 }
  0xd9   : > { %503 = vmatmul.mubr.f32.gmra.mrb[38].mxu0 %v311_v24  ;;  %792 = vmatmul.mubr.f32.gmra.mrb[38].mxu1 %v600_v25  ;;  %v888_v24 = vld [vmem:[%s3705_s10 + $0x250] sm:$0xff]  ;;  %v1177_v25 = vld [vmem:[%s3705_s10 + $0x258] sm:$0xff] }
  0xda   : > { %508 = vmatprep.mubr.f32.mxu0 %v3499_v0  ;;  %797 = vmatprep.mubr.f32.mxu1 %v3499_v0 }
  0xdd   : > { %509 = vmatmul.mubr.f32.gmra.mrb[40].mxu0 %v312_v26  ;;  %798 = vmatmul.mubr.f32.gmra.mrb[40].mxu1 %v601_v27  ;;  %v4015_v26 = vshrl.u32 %v1450_v23, 7  ;;  %v889_v27 = vld [vmem:[%s3705_s10 + $0x270] sm:$0xff] }
  0xde   : > { %514 = vmatprep.mubr.f32.mxu0 %v3499_v0  ;;  %803 = vmatprep.mubr.f32.mxu1 %v3499_v0 }
  0xe1   : > { %515 = vmatmul.mubr.f32.gmra.mrb[42].mxu0 %v313_v28  ;;  %804 = vmatmul.mubr.f32.gmra.mrb[42].mxu1 %v602_v29  ;;  %v1178_v28 = vld [vmem:[%s3705_s10 + $0x278] sm:$0xff]  ;;  %v1452_v29 = vsub.s32 0, %v4015_v26 }
  0xe2   : > { %520 = vmatprep.mubr.f32.mxu0 %v3499_v0  ;;  %809 = vmatprep.mubr.f32.mxu1 %v3499_v0 }
  0xe5   : > { %521 = vmatmul.mubr.f32.gmra.mrb[44].mxu0 %v314_v30  ;;  %810 = vmatmul.mubr.f32.gmra.mrb[44].mxu1 %v603_v31  ;;  %v1460_v30 = vsub.s32 2, %v4015_v26  ;;  %v890_v31 = vld [vmem:[%s3705_s10 + $0x290] sm:$0xff] }
  0xe6   : > { %526 = vmatprep.mubr.f32.mxu0 %v3499_v0  ;;  %815 = vmatprep.mubr.f32.mxu1 %v3499_v0 }
  0xe9   : > { %527 = vmatmul.mubr.f32.gmra.mrb[46].mxu0 %v315_v32  ;;  %816 = vmatmul.mubr.f32.gmra.mrb[46].mxu1 %v604_v33  ;;  %v1179_v32 = vld [vmem:[%s3705_s10 + $0x298] sm:$0xff]  ;;  %v1448_v33 = vld [vmem:[#allocation7] sm:$0xff] }
  0xea   : > { %532 = vmatprep.mubr.f32.mxu0 %v3499_v0  ;;  %821 = vmatprep.mubr.f32.mxu1 %v3499_v0 }
  0xed   : > { %533 = vmatmul.mubr.f32.gmra.mrb[48].mxu0 %v316_v34  ;;  %822 = vmatmul.mubr.f32.gmra.mrb[48].mxu1 %v605_v35  ;;  %v1456_v34 = vsub.s32 1, %v4015_v26  ;;  %v1464_v35 = vsub.s32 3, %v4015_v26 }
  0xee   : > { %538 = vmatprep.mubr.f32.mxu0 %v3499_v0  ;;  %827 = vmatprep.mubr.f32.mxu1 %v3499_v0 }
  0xf1   : > { %539 = vmatmul.mubr.f32.gmra.mrb[50].mxu0 %v317_v36  ;;  %828 = vmatmul.mubr.f32.gmra.mrb[50].mxu1 %v606_v37  ;;  %v4029_v36 = vrot.slane %v1448_v33, %v1452_v29  ;;  %v4031_v37 = vrot.slane %v1448_v33, %v1460_v30  ;;  %v895_v30 = vld [vmem:[%s3705_s10 + $0x330] sm:$0xff] }
  0xf2   : > { %544 = vmatprep.mubr.f32.mxu0 %v3499_v0  ;;  %833 = vmatprep.mubr.f32.mxu1 %v3499_v0 }
  0xf5   : > { %545 = vmatmul.mubr.f32.gmra.mrb[52].mxu0 %v318_v38  ;;  %834 = vmatmul.mubr.f32.gmra.mrb[52].mxu1 %v607_v39  ;;  %v4035_v38 = vrot.slane %v1448_v33, %v1456_v34  ;;  %v4037_v39 = vrot.slane %v1448_v33, %v1464_v35 }
  0xf6   : > { %550 = vmatprep.mubr.f32.mxu0 %v3499_v0  ;;  %839 = vmatprep.mubr.f32.mxu1 %v3499_v0 }
  0xf9   : > { %551 = vmatmul.mubr.f32.gmra.mrb[54].mxu0 %v319_v40  ;;  %840 = vmatmul.mubr.f32.gmra.mrb[54].mxu1 %v608_v41  ;;  %v891_v40 = vld [vmem:[%s3705_s10 + $0x2b0] sm:$0xff]  ;;  %v1180_v41 = vld [vmem:[%s3705_s10 + $0x2b8] sm:$0xff] }
  0xfa   : > { %556 = vmatprep.mubr.f32.mxu0 %v3499_v0  ;;  %845 = vmatprep.mubr.f32.mxu1 %v3499_v0 }
  0xfd   : > { %557 = vmatmul.mubr.f32.gmra.mrb[56].mxu0 %v320_v42  ;;  %846 = vmatmul.mubr.f32.gmra.mrb[56].mxu1 %v609_v43 }
  0xfe   : > { %562 = vmatprep.mubr.f32.mxu0 %v3499_v0  ;;  %851 = vmatprep.mubr.f32.mxu1 %v3499_v0 }
 0x101   : > { %563 = vmatmul.mubr.f32.gmra.mrb[58].mxu0 %v321_v44  ;;  %852 = vmatmul.mubr.f32.gmra.mrb[58].mxu1 %v610_v45 }
 0x102   : > { %568 = vmatprep.mubr.f32.mxu0 %v3499_v0  ;;  %857 = vmatprep.mubr.f32.mxu1 %v3499_v0 }
 0x105   : > { %569 = vmatmul.mubr.f32.gmra.mrb[60].mxu0 %v322_v46  ;;  %858 = vmatmul.mubr.f32.gmra.mrb[60].mxu1 %v611_v47 }
 0x106   : > { %574 = vmatprep.mubr.f32.mxu0 %v3499_v0  ;;  %863 = vmatprep.mubr.f32.mxu1 %v3499_v0 }
 0x109   : > { %575 = vmatmul.mubr.f32.gmra.mrb[62].mxu0 %v323_v48  ;;  %864 = vmatmul.mubr.f32.gmra.mrb[62].mxu1 %v612_v49 }
 0x10a   : > { %966 = vmatprep.mubr.f32.mxu0 %v3499_v0  ;;  %1255 = vmatprep.mubr.f32.mxu1 %v3499_v0 }
 0x10d   : > { %967 = vmatmul.mubr.f32.vlgmr.msra.gmra.mrb[64].mxu0 %v870_v50  ;;  %1256 = vmatmul.mubr.f32.vlgmr.msra.gmra.mrb[64].mxu1 %v1159_v51  ;;  %v892_v50 = vld [vmem:[%s3705_s10 + $0x2d0] sm:$0xff]  ;;  %v1181_v51 = vld [vmem:[%s3705_s10 + $0x2d8] sm:$0xff] }
 0x10e   : > { %972 = vmatprep.mubr.f32.mxu0 %v3499_v0  ;;  %1261 = vmatprep.mubr.f32.mxu1 %v3499_v0 }
 0x111   : > { %973 = vmatmul.mubr.f32.gmra.mrb[66].mxu0 %v871_v52  ;;  %1262 = vmatmul.mubr.f32.gmra.mrb[66].mxu1 %v1160_v53 }
 0x112   : > { %978 = vmatprep.mubr.f32.mxu0 %v3499_v0  ;;  %1267 = vmatprep.mubr.f32.mxu1 %v3499_v0 }
 0x115   : > { %979 = vmatmul.mubr.f32.gmra.mrb[68].mxu0 %v872_v54  ;;  %1268 = vmatmul.mubr.f32.gmra.mrb[68].mxu1 %v1161_v55 }
 0x116   : > { %984 = vmatprep.mubr.f32.mxu0 %v3499_v0  ;;  %1273 = vmatprep.mubr.f32.mxu1 %v3499_v0 }
 0x119   : > { %985 = vmatmul.mubr.f32.gmra.mrb[70].mxu0 %v873_v56  ;;  %1274 = vmatmul.mubr.f32.gmra.mrb[70].mxu1 %v1162_v57 }
 0x11a   : > { %990 = vmatprep.mubr.f32.mxu0 %v3499_v0  ;;  %1279 = vmatprep.mubr.f32.mxu1 %v3499_v0 }
 0x11d   : > { %991 = vmatmul.mubr.f32.gmra.mrb[72].mxu0 %v874_v58  ;;  %1280 = vmatmul.mubr.f32.gmra.mrb[72].mxu1 %v1163_v59 }
 0x11e   : > { %996 = vmatprep.mubr.f32.mxu0 %v3499_v0  ;;  %1285 = vmatprep.mubr.f32.mxu1 %v3499_v0 }
 0x121   : > { %997 = vmatmul.mubr.f32.gmra.mrb[74].mxu0 %v875_v60  ;;  %1286 = vmatmul.mubr.f32.gmra.mrb[74].mxu1 %v1164_v61 }
 0x122   : > { %1002 = vmatprep.mubr.f32.mxu0 %v3499_v0  ;;  %1291 = vmatprep.mubr.f32.mxu1 %v3499_v0 }
 0x125   : > { %1003 = vmatmul.mubr.f32.gmra.mrb[76].mxu0 %v876_v62  ;;  %1292 = vmatmul.mubr.f32.gmra.mrb[76].mxu1 %v1165_v63 }
 0x126   : > { %1008 = vmatprep.mubr.f32.mxu0 %v3499_v0  ;;  %1297 = vmatprep.mubr.f32.mxu1 %v3499_v0 }
 0x129   : > { %1009 = vmatmul.mubr.f32.gmra.mrb[78].mxu0 %v877_v1  ;;  %1298 = vmatmul.mubr.f32.gmra.mrb[78].mxu1 %v1166_v2  ;;  %v893_v1 = vld [vmem:[%s3705_s10 + $0x2f0] sm:$0xff]  ;;  %v1182_v2 = vld [vmem:[%s3705_s10 + $0x2f8] sm:$0xff] }
 0x12a   : > { %1014 = vmatprep.mubr.f32.mxu0 %v3499_v0  ;;  %1303 = vmatprep.mubr.f32.mxu1 %v3499_v0 }
 0x12d   : > { %1015 = vmatmul.mubr.f32.gmra.mrb[80].mxu0 %v878_v3  ;;  %1304 = vmatmul.mubr.f32.gmra.mrb[80].mxu1 %v1167_v4 }
 0x12e   : > { %1020 = vmatprep.mubr.f32.mxu0 %v3499_v0  ;;  %1309 = vmatprep.mubr.f32.mxu1 %v3499_v0 }
 0x131   : > { %1021 = vmatmul.mubr.f32.gmra.mrb[82].mxu0 %v879_v5  ;;  %1310 = vmatmul.mubr.f32.gmra.mrb[82].mxu1 %v1168_v6 }
 0x132   : > { %1026 = vmatprep.mubr.f32.mxu0 %v3499_v0  ;;  %1315 = vmatprep.mubr.f32.mxu1 %v3499_v0 }
 0x135   : > { %1027 = vmatmul.mubr.f32.gmra.mrb[84].mxu0 %v880_v7  ;;  %1316 = vmatmul.mubr.f32.gmra.mrb[84].mxu1 %v1169_v8 }
 0x136   : > { %1032 = vmatprep.mubr.f32.mxu0 %v3499_v0  ;;  %1321 = vmatprep.mubr.f32.mxu1 %v3499_v0 }
 0x139   : > { %1033 = vmatmul.mubr.f32.gmra.mrb[86].mxu0 %v881_v9  ;;  %1322 = vmatmul.mubr.f32.gmra.mrb[86].mxu1 %v1170_v10 }
 0x13a   : > { %1038 = vmatprep.mubr.f32.mxu0 %v3499_v0  ;;  %1327 = vmatprep.mubr.f32.mxu1 %v3499_v0 }
 0x13d   : > { %1039 = vmatmul.mubr.f32.gmra.mrb[88].mxu0 %v882_v11  ;;  %1328 = vmatmul.mubr.f32.gmra.mrb[88].mxu1 %v1171_v12 }
 0x13e   : > { %1044 = vmatprep.mubr.f32.mxu0 %v3499_v0  ;;  %1333 = vmatprep.mubr.f32.mxu1 %v3499_v0 }
 0x141   : > { %1045 = vmatmul.mubr.f32.gmra.mrb[90].mxu0 %v883_v13  ;;  %1334 = vmatmul.mubr.f32.gmra.mrb[90].mxu1 %v1172_v14 }
 0x142   : > { %1050 = vmatprep.mubr.f32.mxu0 %v3499_v0  ;;  %1339 = vmatprep.mubr.f32.mxu1 %v3499_v0 }
 0x145   : > { %1051 = vmatmul.mubr.f32.gmra.mrb[92].mxu0 %v884_v15  ;;  %1340 = vmatmul.mubr.f32.gmra.mrb[92].mxu1 %v1173_v16  ;;  %v894_v15 = vld [vmem:[%s3705_s10 + $0x310] sm:$0xff]  ;;  %v1183_v16 = vld [vmem:[%s3705_s10 + $0x318] sm:$0xff] }
 0x146   : > { %1056 = vmatprep.mubr.f32.mxu0 %v3499_v0  ;;  %1345 = vmatprep.mubr.f32.mxu1 %v3499_v0 }
 0x149   : > { %1057 = vmatmul.mubr.f32.gmra.mrb[94].mxu0 %v885_v17  ;;  %1346 = vmatmul.mubr.f32.gmra.mrb[94].mxu1 %v1174_v18 }
 0x14a   : > { %1062 = vmatprep.mubr.f32.mxu0 %v3499_v0  ;;  %1351 = vmatprep.mubr.f32.mxu1 %v3499_v0 }
 0x14d   : > { %1063 = vmatmul.mubr.f32.gmra.mrb[96].mxu0 %v886_v19  ;;  %1352 = vmatmul.mubr.f32.gmra.mrb[96].mxu1 %v1175_v20 }
 0x14e   : > { %1068 = vmatprep.mubr.f32.mxu0 %v3499_v0  ;;  %1357 = vmatprep.mubr.f32.mxu1 %v3499_v0 }
 0x151   : > { %1069 = vmatmul.mubr.f32.gmra.mrb[98].mxu0 %v887_v21  ;;  %1358 = vmatmul.mubr.f32.gmra.mrb[98].mxu1 %v1176_v22 }
 0x152   : > { %1074 = vmatprep.mubr.f32.mxu0 %v3499_v0  ;;  %1363 = vmatprep.mubr.f32.mxu1 %v3499_v0 }
 0x155   : > { %1075 = vmatmul.mubr.f32.gmra.mrb[100].mxu0 %v888_v24  ;;  %1364 = vmatmul.mubr.f32.gmra.mrb[100].mxu1 %v1177_v25 }
 0x156   : > { %1080 = vmatprep.mubr.f32.mxu0 %v3499_v0  ;;  %1369 = vmatprep.mubr.f32.mxu1 %v3499_v0 }
 0x159   : > { %1081 = vmatmul.mubr.f32.gmra.mrb[102].mxu0 %v889_v27  ;;  %1370 = vmatmul.mubr.f32.gmra.mrb[102].mxu1 %v1178_v28 }
 0x15a   : > { %1086 = vmatprep.mubr.f32.mxu0 %v3499_v0  ;;  %1375 = vmatprep.mubr.f32.mxu1 %v3499_v0 }
 0x15d   : > { %1087 = vmatmul.mubr.f32.gmra.mrb[104].mxu0 %v890_v31  ;;  %1376 = vmatmul.mubr.f32.gmra.mrb[104].mxu1 %v1179_v32  ;;  %v1184_v31 = vld [vmem:[%s3705_s10 + $0x338] sm:$0xff] }
 0x15e   : > { %1092 = vmatprep.mubr.f32.mxu0 %v3499_v0  ;;  %1381 = vmatprep.mubr.f32.mxu1 %v3499_v0 }
 0x160   : > { %v390_v42 = vpop.f32.mrb[0].mxu0  ;;  %v679_v43 = vpop.f32.mrb[0].mxu1 }
 0x161   : > { %v1490_v44 = vadd.f32 %v4029_v36, %v390_v42  ;;  %v1492_v45 = vadd.f32 %v4031_v37, %v679_v43  ;;  %v392_v46 = vpop.f32.mrb[1].mxu0  ;;  %v681_v47 = vpop.f32.mrb[1].mxu1  ;;  %1093 = vmatmul.mubr.f32.gmra.mrb[106].mxu0 %v891_v40  ;;  %1382 = vmatmul.mubr.f32.gmra.mrb[106].mxu1 %v1180_v41 }
 0x162   : > { %v1491_v48 = vadd.f32 %v4035_v38, %v392_v46  ;;  %v1493_v49 = vadd.f32 %v4037_v39, %v681_v47  ;;  %1098 = vmatprep.mubr.f32.mxu0 %v3499_v0  ;;  %1387 = vmatprep.mubr.f32.mxu1 %v3499_v0 }
 0x163   : > { %v1746_v52 = vmax.f32 %v1490_v44, 0.0  ;;  %v1748_v53 = vmax.f32 %v1492_v45, 0.0 }
 0x164   : > { %v1747_v54 = vmax.f32 %v1491_v48, 0.0  ;;  %v1749_v55 = vmax.f32 %v1493_v49, 0.0  ;;  %v396_v56 = vpop.f32.mrb[2].mxu0  ;;  %v685_v57 = vpop.f32.mrb[2].mxu1  ;;  %v896_v48 = vld [vmem:[%s3705_s10 + $0x350] sm:$0xff]  ;;  %v1185_v49 = vld [vmem:[%s3705_s10 + $0x358] sm:$0xff] }
 0x165   : > { %2546 = vst [vmem:[%s4050_s23] sm:$0xff] %v1746_v52  ;;  %2548 = vst [vmem:[%s4050_s23 + $0x10] sm:$0xff] %v1748_v53  ;;  %v1498_v58 = vadd.f32 %v4029_v36, %v396_v56  ;;  %v1500_v59 = vadd.f32 %v4031_v37, %v685_v57  ;;  %v398_v60 = vpop.f32.mrb[3].mxu0  ;;  %v687_v61 = vpop.f32.mrb[3].mxu1  ;;  %1099 = vmatmul.mubr.f32.gmra.mrb[108].mxu0 %v892_v50  ;;  %1388 = vmatmul.mubr.f32.gmra.mrb[108].mxu1 %v1181_v51 }
 0x166   : > { %2547 = vst [vmem:[%s4050_s23 + $0x8] sm:$0xff] %v1747_v54  ;;  %2549 = vst [vmem:[%s4050_s23 + $0x18] sm:$0xff] %v1749_v55  ;;  %v1499_v62 = vadd.f32 %v4035_v38, %v398_v60  ;;  %v1501_v63 = vadd.f32 %v4037_v39, %v687_v61  ;;  %1104 = vmatprep.mubr.f32.mxu0 %v3499_v0  ;;  %1393 = vmatprep.mubr.f32.mxu1 %v3499_v0 }
 0x167   : > { %v1754_v3 = vmax.f32 %v1498_v58, 0.0  ;;  %v1756_v4 = vmax.f32 %v1500_v59, 0.0 }
 0x168   : > { %v1755_v5 = vmax.f32 %v1499_v62, 0.0  ;;  %v1757_v6 = vmax.f32 %v1501_v63, 0.0  ;;  %v402_v7 = vpop.f32.mrb[4].mxu0  ;;  %v691_v8 = vpop.f32.mrb[4].mxu1  ;;  %v897_v62 = vld [vmem:[%s3705_s10 + $0x370] sm:$0xff]  ;;  %v1186_v63 = vld [vmem:[%s3705_s10 + $0x378] sm:$0xff] }
 0x169   : > { %2554 = vst [vmem:[%s4050_s23 + $0x40] sm:$0xff] %v1754_v3  ;;  %2556 = vst [vmem:[%s4050_s23 + $0x50] sm:$0xff] %v1756_v4  ;;  %v1506_v9 = vadd.f32 %v4029_v36, %v402_v7  ;;  %v1508_v10 = vadd.f32 %v4031_v37, %v691_v8  ;;  %v404_v11 = vpop.f32.mrb[5].mxu0  ;;  %v693_v12 = vpop.f32.mrb[5].mxu1  ;;  %1105 = vmatmul.mubr.f32.gmra.mrb[110].mxu0 %v893_v1  ;;  %1394 = vmatmul.mubr.f32.gmra.mrb[110].mxu1 %v1182_v2 }
 0x16a   : > { %2555 = vst [vmem:[%s4050_s23 + $0x48] sm:$0xff] %v1755_v5  ;;  %2557 = vst [vmem:[%s4050_s23 + $0x58] sm:$0xff] %v1757_v6  ;;  %v1507_v13 = vadd.f32 %v4035_v38, %v404_v11  ;;  %v1509_v14 = vadd.f32 %v4037_v39, %v693_v12  ;;  %1110 = vmatprep.mubr.f32.mxu0 %v3499_v0  ;;  %1399 = vmatprep.mubr.f32.mxu1 %v3499_v0 }
 0x16b   : > { %v1762_v17 = vmax.f32 %v1506_v9, 0.0  ;;  %v1764_v18 = vmax.f32 %v1508_v10, 0.0 }
 0x16c   : > { %v1763_v19 = vmax.f32 %v1507_v13, 0.0  ;;  %v1765_v20 = vmax.f32 %v1509_v14, 0.0  ;;  %v408_v21 = vpop.f32.mrb[6].mxu0  ;;  %v697_v22 = vpop.f32.mrb[6].mxu1  ;;  %v898_v13 = vld [vmem:[%s3705_s10 + $0x390] sm:$0xff]  ;;  %v1187_v14 = vld [vmem:[%s3705_s10 + $0x398] sm:$0xff] }
 0x16d   : > { %2562 = vst [vmem:[%s4050_s23 + $0x80] sm:$0xff] %v1762_v17  ;;  %2564 = vst [vmem:[%s4050_s23 + $0x90] sm:$0xff] %v1764_v18  ;;  %v1514_v23 = vadd.f32 %v4029_v36, %v408_v21  ;;  %v1516_v24 = vadd.f32 %v4031_v37, %v697_v22  ;;  %v410_v25 = vpop.f32.mrb[7].mxu0  ;;  %v699_v27 = vpop.f32.mrb[7].mxu1  ;;  %1111 = vmatmul.mubr.f32.gmra.mrb[112].mxu0 %v894_v15  ;;  %1400 = vmatmul.mubr.f32.gmra.mrb[112].mxu1 %v1183_v16 }
 0x16e   : > { %2563 = vst [vmem:[%s4050_s23 + $0x88] sm:$0xff] %v1763_v19  ;;  %2565 = vst [vmem:[%s4050_s23 + $0x98] sm:$0xff] %v1765_v20  ;;  %v1515_v28 = vadd.f32 %v4035_v38, %v410_v25  ;;  %v1517_v29 = vadd.f32 %v4037_v39, %v699_v27  ;;  %1116 = vmatprep.mubr.f32.mxu0 %v3499_v0  ;;  %1405 = vmatprep.mubr.f32.mxu1 %v3499_v0 }
 0x16f   : > { %v1770_v32 = vmax.f32 %v1514_v23, 0.0  ;;  %v1772_v33 = vmax.f32 %v1516_v24, 0.0 }
 0x170   : > { %v1771_v34 = vmax.f32 %v1515_v28, 0.0  ;;  %v1773_v35 = vmax.f32 %v1517_v29, 0.0  ;;  %v414_v40 = vpop.f32.mrb[8].mxu0  ;;  %v703_v41 = vpop.f32.mrb[8].mxu1  ;;  %v899_v28 = vld [vmem:[%s3705_s10 + $0x3b0] sm:$0xff]  ;;  %v1188_v29 = vld [vmem:[%s3705_s10 + $0x3b8] sm:$0xff] }
 0x171   : > { %2570 = vst [vmem:[%s4050_s23 + $0xc0] sm:$0xff] %v1770_v32  ;;  %2572 = vst [vmem:[%s4050_s23 + $0xd0] sm:$0xff] %v1772_v33  ;;  %v1522_v42 = vadd.f32 %v4029_v36, %v414_v40  ;;  %v1524_v43 = vadd.f32 %v4031_v37, %v703_v41  ;;  %v416_v44 = vpop.f32.mrb[9].mxu0  ;;  %v705_v45 = vpop.f32.mrb[9].mxu1  ;;  %1117 = vmatmul.mubr.f32.gmra.mrb[114].mxu0 %v895_v30  ;;  %1406 = vmatmul.mubr.f32.gmra.mrb[114].mxu1 %v1184_v31 }
 0x172   : > { %2571 = vst [vmem:[%s4050_s23 + $0xc8] sm:$0xff] %v1771_v34  ;;  %2573 = vst [vmem:[%s4050_s23 + $0xd8] sm:$0xff] %v1773_v35  ;;  %v1523_v46 = vadd.f32 %v4035_v38, %v416_v44  ;;  %v1525_v47 = vadd.f32 %v4037_v39, %v705_v45  ;;  %1122 = vmatprep.mubr.f32.mxu0 %v3499_v0  ;;  %1411 = vmatprep.mubr.f32.mxu1 %v3499_v0 }
 0x173   : > { %v1778_v50 = vmax.f32 %v1522_v42, 0.0  ;;  %v1780_v51 = vmax.f32 %v1524_v43, 0.0 }
 0x174   : > { %v1779_v52 = vmax.f32 %v1523_v46, 0.0  ;;  %v1781_v53 = vmax.f32 %v1525_v47, 0.0  ;;  %v420_v54 = vpop.f32.mrb[10].mxu0  ;;  %v709_v55 = vpop.f32.mrb[10].mxu1  ;;  %v900_v46 = vld [vmem:[%s3705_s10 + $0x3d0] sm:$0xff]  ;;  %v1189_v47 = vld [vmem:[%s3705_s10 + $0x3d8] sm:$0xff] }
 0x175   : > { %2578 = vst [vmem:[%s4050_s23 + $0x100] sm:$0xff] %v1778_v50  ;;  %2580 = vst [vmem:[%s4050_s23 + $0x110] sm:$0xff] %v1780_v51  ;;  %v1530_v56 = vadd.f32 %v4029_v36, %v420_v54  ;;  %v1532_v57 = vadd.f32 %v4031_v37, %v709_v55  ;;  %v422_v58 = vpop.f32.mrb[11].mxu0  ;;  %v711_v59 = vpop.f32.mrb[11].mxu1  ;;  %1123 = vmatmul.mubr.f32.gmra.mrb[116].mxu0 %v896_v48  ;;  %1412 = vmatmul.mubr.f32.gmra.mrb[116].mxu1 %v1185_v49 }
 0x176   : > { %2579 = vst [vmem:[%s4050_s23 + $0x108] sm:$0xff] %v1779_v52  ;;  %2581 = vst [vmem:[%s4050_s23 + $0x118] sm:$0xff] %v1781_v53  ;;  %v1531_v60 = vadd.f32 %v4035_v38, %v422_v58  ;;  %v1533_v61 = vadd.f32 %v4037_v39, %v711_v59  ;;  %1128 = vmatprep.mubr.f32.mxu0 %v3499_v0  ;;  %1417 = vmatprep.mubr.f32.mxu1 %v3499_v0 }
 0x177   : > { %v1786_v1 = vmax.f32 %v1530_v56, 0.0  ;;  %v1788_v2 = vmax.f32 %v1532_v57, 0.0 }
 0x178   : > { %v1787_v3 = vmax.f32 %v1531_v60, 0.0  ;;  %v1789_v4 = vmax.f32 %v1533_v61, 0.0  ;;  %v426_v5 = vpop.f32.mrb[12].mxu0  ;;  %v715_v6 = vpop.f32.mrb[12].mxu1  ;;  %v901_v60 = vld [vmem:[%s3705_s10 + $0x3f0] sm:$0xff]  ;;  %v1190_v61 = vld [vmem:[%s3705_s10 + $0x3f8] sm:$0xff] }
 0x179   : > { %2586 = vst [vmem:[%s4050_s23 + $0x140] sm:$0xff] %v1786_v1  ;;  %2588 = vst [vmem:[%s4050_s23 + $0x150] sm:$0xff] %v1788_v2  ;;  %v1538_v7 = vadd.f32 %v4029_v36, %v426_v5  ;;  %v1540_v8 = vadd.f32 %v4031_v37, %v715_v6  ;;  %v428_v9 = vpop.f32.mrb[13].mxu0  ;;  %v717_v10 = vpop.f32.mrb[13].mxu1  ;;  %1129 = vmatmul.mubr.f32.gmra.mrb[118].mxu0 %v897_v62  ;;  %1418 = vmatmul.mubr.f32.gmra.mrb[118].mxu1 %v1186_v63  ;;  %s3502_s10 = smov [#allocation8]  }
 0x17a   : > { %2587 = vst [vmem:[%s4050_s23 + $0x148] sm:$0xff] %v1787_v3  ;;  %2589 = vst [vmem:[%s4050_s23 + $0x158] sm:$0xff] %v1789_v4  ;;  %v1539_v11 = vadd.f32 %v4035_v38, %v428_v9  ;;  %v1541_v12 = vadd.f32 %v4037_v39, %v717_v10  ;;  %1134 = vmatprep.mubr.f32.mxu0 %v3499_v0  ;;  %1423 = vmatprep.mubr.f32.mxu1 %v3499_v0  ;;  %s3424_s21 = sshll.u32 %s3502_s10, 4  ;;  %s3425_s21 = int_to_ptr.vmem [resolvable:$false] %s3424_s21 }
 0x17b   : > { %v1794_v15 = vmax.f32 %v1538_v7, 0.0  ;;  %v1796_v16 = vmax.f32 %v1540_v8, 0.0  ;;  %p3427_p9 = scmp.lt.s32.totalorder %s5025_s24, %s3425_s21 }
 0x17c   : > { %v1795_v17 = vmax.f32 %v1539_v11, 0.0  ;;  %v1797_v18 = vmax.f32 %v1541_v12, 0.0  ;;  %v432_v19 = vpop.f32.mrb[14].mxu0  ;;  %v721_v20 = vpop.f32.mrb[14].mxu1 }
 0x17d   : > { %2594 = vst [vmem:[%s4050_s23 + $0x180] sm:$0xff] %v1794_v15  ;;  %2596 = vst [vmem:[%s4050_s23 + $0x190] sm:$0xff] %v1796_v16  ;;  %v1546_v21 = vadd.f32 %v4029_v36, %v432_v19  ;;  %v1548_v22 = vadd.f32 %v4031_v37, %v721_v20  ;;  %v434_v23 = vpop.f32.mrb[15].mxu0  ;;  %v723_v24 = vpop.f32.mrb[15].mxu1  ;;  %1135 = vmatmul.mubr.f32.gmra.mrb[120].mxu0 %v898_v13  ;;  %1424 = vmatmul.mubr.f32.gmra.mrb[120].mxu1 %v1187_v14 }
 0x17e   : > { %2595 = vst [vmem:[%s4050_s23 + $0x188] sm:$0xff] %v1795_v17  ;;  %2597 = vst [vmem:[%s4050_s23 + $0x198] sm:$0xff] %v1797_v18  ;;  %v1547_v25 = vadd.f32 %v4035_v38, %v434_v23  ;;  %v1549_v27 = vadd.f32 %v4037_v39, %v723_v24  ;;  %1140 = vmatprep.mubr.f32.mxu0 %v3499_v0  ;;  %1429 = vmatprep.mubr.f32.mxu1 %v3499_v0 }
 0x17f   : > { %v1802_v30 = vmax.f32 %v1546_v21, 0.0  ;;  %v1804_v31 = vmax.f32 %v1548_v22, 0.0 }
 0x180   : > { %v1803_v32 = vmax.f32 %v1547_v25, 0.0  ;;  %v1805_v33 = vmax.f32 %v1549_v27, 0.0  ;;  %v438_v34 = vpop.f32.mrb[16].mxu0  ;;  %v727_v35 = vpop.f32.mrb[16].mxu1 }
 0x181   : > { %2602 = vst [vmem:[%s4050_s23 + $0x1c0] sm:$0xff] %v1802_v30  ;;  %2604 = vst [vmem:[%s4050_s23 + $0x1d0] sm:$0xff] %v1804_v31  ;;  %v1554_v40 = vadd.f32 %v4029_v36, %v438_v34  ;;  %v1556_v41 = vadd.f32 %v4031_v37, %v727_v35  ;;  %v440_v42 = vpop.f32.mrb[17].mxu0  ;;  %v729_v43 = vpop.f32.mrb[17].mxu1  ;;  %1141 = vmatmul.mubr.f32.gmra.mrb[122].mxu0 %v899_v28  ;;  %1430 = vmatmul.mubr.f32.gmra.mrb[122].mxu1 %v1188_v29 }
 0x182   : > { %2603 = vst [vmem:[%s4050_s23 + $0x1c8] sm:$0xff] %v1803_v32  ;;  %2605 = vst [vmem:[%s4050_s23 + $0x1d8] sm:$0xff] %v1805_v33  ;;  %v1555_v44 = vadd.f32 %v4035_v38, %v440_v42  ;;  %v1557_v45 = vadd.f32 %v4037_v39, %v729_v43  ;;  %1146 = vmatprep.mubr.f32.mxu0 %v3499_v0  ;;  %1435 = vmatprep.mubr.f32.mxu1 %v3499_v0 }
 0x183   : > { %v1810_v48 = vmax.f32 %v1554_v40, 0.0  ;;  %v1812_v49 = vmax.f32 %v1556_v41, 0.0 }
 0x184   : > { %v1811_v50 = vmax.f32 %v1555_v44, 0.0  ;;  %v1813_v51 = vmax.f32 %v1557_v45, 0.0  ;;  %v444_v52 = vpop.f32.mrb[18].mxu0  ;;  %v733_v53 = vpop.f32.mrb[18].mxu1 }
 0x185   : > { %2610 = vst [vmem:[%s4050_s23 + $0x200] sm:$0xff] %v1810_v48  ;;  %2612 = vst [vmem:[%s4050_s23 + $0x210] sm:$0xff] %v1812_v49  ;;  %v1562_v54 = vadd.f32 %v4029_v36, %v444_v52  ;;  %v1564_v55 = vadd.f32 %v4031_v37, %v733_v53  ;;  %v446_v56 = vpop.f32.mrb[19].mxu0  ;;  %v735_v57 = vpop.f32.mrb[19].mxu1  ;;  %1147 = vmatmul.mubr.f32.gmra.mrb[124].mxu0 %v900_v46  ;;  %1436 = vmatmul.mubr.f32.gmra.mrb[124].mxu1 %v1189_v47 }
 0x186   : > { %2611 = vst [vmem:[%s4050_s23 + $0x208] sm:$0xff] %v1811_v50  ;;  %2613 = vst [vmem:[%s4050_s23 + $0x218] sm:$0xff] %v1813_v51  ;;  %v1563_v58 = vadd.f32 %v4035_v38, %v446_v56  ;;  %v1565_v59 = vadd.f32 %v4037_v39, %v735_v57  ;;  %1152 = vmatprep.mubr.f32.mxu0 %v3499_v0  ;;  %1441 = vmatprep.mubr.f32.mxu1 %v3499_v0 }
 0x187   : > { %v1818_v62 = vmax.f32 %v1562_v54, 0.0  ;;  %v1820_v63 = vmax.f32 %v1564_v55, 0.0 }
 0x188   : > { %v1819_v1 = vmax.f32 %v1563_v58, 0.0  ;;  %v1821_v2 = vmax.f32 %v1565_v59, 0.0  ;;  %v450_v3 = vpop.f32.mrb[20].mxu0  ;;  %v739_v4 = vpop.f32.mrb[20].mxu1 }
 0x189   : > { %2618 = vst [vmem:[%s4050_s23 + $0x240] sm:$0xff] %v1818_v62  ;;  %2620 = vst [vmem:[%s4050_s23 + $0x250] sm:$0xff] %v1820_v63  ;;  %v1570_v5 = vadd.f32 %v4029_v36, %v450_v3  ;;  %v1572_v6 = vadd.f32 %v4031_v37, %v739_v4  ;;  %v452_v7 = vpop.f32.mrb[21].mxu0  ;;  %v741_v0 = vpop.f32.mrb[21].mxu1  ;;  %1153 = vmatmul.mubr.f32.gmra.mrb[126].mxu0 %v901_v60  ;;  %1442 = vmatmul.mubr.f32.gmra.mrb[126].mxu1 %v1190_v61 }
 0x18a   : > { %2619 = vst [vmem:[%s4050_s23 + $0x248] sm:$0xff] %v1819_v1  ;;  %2621 = vst [vmem:[%s4050_s23 + $0x258] sm:$0xff] %v1821_v2  ;;  %v1571_v8 = vadd.f32 %v4035_v38, %v452_v7  ;;  %v1573_v9 = vadd.f32 %v4037_v39, %v741_v0 }
 0x18b   : > { %v1826_v10 = vmax.f32 %v1570_v5, 0.0  ;;  %v1828_v11 = vmax.f32 %v1572_v6, 0.0 }
 0x18c   : > { %v1827_v12 = vmax.f32 %v1571_v8, 0.0  ;;  %v1829_v13 = vmax.f32 %v1573_v9, 0.0  ;;  %v456_v14 = vpop.f32.mrb[22].mxu0  ;;  %v745_v15 = vpop.f32.mrb[22].mxu1 }
 0x18d   : > { %2626 = vst [vmem:[%s4050_s23 + $0x280] sm:$0xff] %v1826_v10  ;;  %2628 = vst [vmem:[%s4050_s23 + $0x290] sm:$0xff] %v1828_v11  ;;  %v1578_v16 = vadd.f32 %v4029_v36, %v456_v14  ;;  %v1580_v17 = vadd.f32 %v4031_v37, %v745_v15  ;;  %v458_v18 = vpop.f32.mrb[23].mxu0  ;;  %v747_v19 = vpop.f32.mrb[23].mxu1 }
 0x18e   : > { %2627 = vst [vmem:[%s4050_s23 + $0x288] sm:$0xff] %v1827_v12  ;;  %2629 = vst [vmem:[%s4050_s23 + $0x298] sm:$0xff] %v1829_v13  ;;  %v1579_v20 = vadd.f32 %v4035_v38, %v458_v18  ;;  %v1581_v21 = vadd.f32 %v4037_v39, %v747_v19 }
 0x18f   : > { %v1834_v22 = vmax.f32 %v1578_v16, 0.0  ;;  %v1836_v23 = vmax.f32 %v1580_v17, 0.0 }
 0x190   : > { %v1835_v24 = vmax.f32 %v1579_v20, 0.0  ;;  %v1837_v25 = vmax.f32 %v1581_v21, 0.0  ;;  %v462_v27 = vpop.f32.mrb[24].mxu0  ;;  %v751_v28 = vpop.f32.mrb[24].mxu1 }
 0x191   : > { %2634 = vst [vmem:[%s4050_s23 + $0x2c0] sm:$0xff] %v1834_v22  ;;  %2636 = vst [vmem:[%s4050_s23 + $0x2d0] sm:$0xff] %v1836_v23  ;;  %v1586_v29 = vadd.f32 %v4029_v36, %v462_v27  ;;  %v1588_v30 = vadd.f32 %v4031_v37, %v751_v28  ;;  %v464_v31 = vpop.f32.mrb[25].mxu0  ;;  %v753_v32 = vpop.f32.mrb[25].mxu1 }
 0x192   : > { %2635 = vst [vmem:[%s4050_s23 + $0x2c8] sm:$0xff] %v1835_v24  ;;  %2637 = vst [vmem:[%s4050_s23 + $0x2d8] sm:$0xff] %v1837_v25  ;;  %v1587_v33 = vadd.f32 %v4035_v38, %v464_v31  ;;  %v1589_v34 = vadd.f32 %v4037_v39, %v753_v32 }
 0x193   : > { %v1842_v35 = vmax.f32 %v1586_v29, 0.0  ;;  %v1844_v40 = vmax.f32 %v1588_v30, 0.0 }
 0x194   : > { %v1843_v41 = vmax.f32 %v1587_v33, 0.0  ;;  %v1845_v42 = vmax.f32 %v1589_v34, 0.0  ;;  %v468_v43 = vpop.f32.mrb[26].mxu0  ;;  %v757_v44 = vpop.f32.mrb[26].mxu1 }
 0x195   : > { %2642 = vst [vmem:[%s4050_s23 + $0x300] sm:$0xff] %v1842_v35  ;;  %2644 = vst [vmem:[%s4050_s23 + $0x310] sm:$0xff] %v1844_v40  ;;  %v1594_v45 = vadd.f32 %v4029_v36, %v468_v43  ;;  %v1596_v46 = vadd.f32 %v4031_v37, %v757_v44  ;;  %v470_v47 = vpop.f32.mrb[27].mxu0  ;;  %v759_v48 = vpop.f32.mrb[27].mxu1 }
 0x196   : > { %2643 = vst [vmem:[%s4050_s23 + $0x308] sm:$0xff] %v1843_v41  ;;  %2645 = vst [vmem:[%s4050_s23 + $0x318] sm:$0xff] %v1845_v42  ;;  %v1595_v49 = vadd.f32 %v4035_v38, %v470_v47  ;;  %v1597_v50 = vadd.f32 %v4037_v39, %v759_v48 }
 0x197   : > { %v1850_v51 = vmax.f32 %v1594_v45, 0.0  ;;  %v1852_v52 = vmax.f32 %v1596_v46, 0.0 }
 0x198   : > { %v1851_v53 = vmax.f32 %v1595_v49, 0.0  ;;  %v1853_v54 = vmax.f32 %v1597_v50, 0.0  ;;  %v474_v55 = vpop.f32.mrb[28].mxu0  ;;  %v763_v56 = vpop.f32.mrb[28].mxu1 }
 0x199   : > { %2650 = vst [vmem:[%s4050_s23 + $0x340] sm:$0xff] %v1850_v51  ;;  %2652 = vst [vmem:[%s4050_s23 + $0x350] sm:$0xff] %v1852_v52  ;;  %v1602_v57 = vadd.f32 %v4029_v36, %v474_v55  ;;  %v1604_v58 = vadd.f32 %v4031_v37, %v763_v56  ;;  %v476_v59 = vpop.f32.mrb[29].mxu0  ;;  %v765_v60 = vpop.f32.mrb[29].mxu1 }
 0x19a   : > { %2651 = vst [vmem:[%s4050_s23 + $0x348] sm:$0xff] %v1851_v53  ;;  %2653 = vst [vmem:[%s4050_s23 + $0x358] sm:$0xff] %v1853_v54  ;;  %v1603_v61 = vadd.f32 %v4035_v38, %v476_v59  ;;  %v1605_v62 = vadd.f32 %v4037_v39, %v765_v60 }
 0x19b   : > { %v1858_v63 = vmax.f32 %v1602_v57, 0.0  ;;  %v1860_v1 = vmax.f32 %v1604_v58, 0.0 }
 0x19c   : > { %v1859_v2 = vmax.f32 %v1603_v61, 0.0  ;;  %v1861_v3 = vmax.f32 %v1605_v62, 0.0  ;;  %v480_v4 = vpop.f32.mrb[30].mxu0  ;;  %v769_v5 = vpop.f32.mrb[30].mxu1 }
 0x19d   : > { %2658 = vst [vmem:[%s4050_s23 + $0x380] sm:$0xff] %v1858_v63  ;;  %2660 = vst [vmem:[%s4050_s23 + $0x390] sm:$0xff] %v1860_v1  ;;  %v1610_v6 = vadd.f32 %v4029_v36, %v480_v4  ;;  %v1612_v7 = vadd.f32 %v4031_v37, %v769_v5  ;;  %v482_v0 = vpop.f32.mrb[31].mxu0  ;;  %v771_v8 = vpop.f32.mrb[31].mxu1 }
 0x19e   : > { %2659 = vst [vmem:[%s4050_s23 + $0x388] sm:$0xff] %v1859_v2  ;;  %2661 = vst [vmem:[%s4050_s23 + $0x398] sm:$0xff] %v1861_v3  ;;  %v1611_v9 = vadd.f32 %v4035_v38, %v482_v0  ;;  %v1613_v10 = vadd.f32 %v4037_v39, %v771_v8 }
 0x19f   : > { %v1866_v11 = vmax.f32 %v1610_v6, 0.0  ;;  %v1868_v12 = vmax.f32 %v1612_v7, 0.0 }
 0x1a0   : > { %v1867_v13 = vmax.f32 %v1611_v9, 0.0  ;;  %v1869_v14 = vmax.f32 %v1613_v10, 0.0  ;;  %v486_v15 = vpop.f32.mrb[32].mxu0  ;;  %v775_v16 = vpop.f32.mrb[32].mxu1 }
 0x1a1   : > { %2666 = vst [vmem:[%s4050_s23 + $0x3c0] sm:$0xff] %v1866_v11  ;;  %2668 = vst [vmem:[%s4050_s23 + $0x3d0] sm:$0xff] %v1868_v12  ;;  %v1618_v17 = vadd.f32 %v4029_v36, %v486_v15  ;;  %v1620_v18 = vadd.f32 %v4031_v37, %v775_v16  ;;  %v488_v19 = vpop.f32.mrb[33].mxu0  ;;  %v777_v20 = vpop.f32.mrb[33].mxu1 }
 0x1a2   : > { %2667 = vst [vmem:[%s4050_s23 + $0x3c8] sm:$0xff] %v1867_v13  ;;  %2669 = vst [vmem:[%s4050_s23 + $0x3d8] sm:$0xff] %v1869_v14  ;;  %v1619_v21 = vadd.f32 %v4035_v38, %v488_v19  ;;  %v1621_v22 = vadd.f32 %v4037_v39, %v777_v20 }
 0x1a3   : > { %v1874_v23 = vmax.f32 %v1618_v17, 0.0  ;;  %v1876_v24 = vmax.f32 %v1620_v18, 0.0 }
 0x1a4   : > { %v1875_v25 = vmax.f32 %v1619_v21, 0.0  ;;  %v1877_v27 = vmax.f32 %v1621_v22, 0.0  ;;  %v492_v28 = vpop.f32.mrb[34].mxu0  ;;  %v781_v29 = vpop.f32.mrb[34].mxu1 }
 0x1a5   : > { %2674 = vst [vmem:[%s4050_s23 + $0x400] sm:$0xff] %v1874_v23  ;;  %2676 = vst [vmem:[%s4050_s23 + $0x410] sm:$0xff] %v1876_v24  ;;  %v1626_v30 = vadd.f32 %v4029_v36, %v492_v28  ;;  %v1628_v31 = vadd.f32 %v4031_v37, %v781_v29  ;;  %v494_v32 = vpop.f32.mrb[35].mxu0  ;;  %v783_v33 = vpop.f32.mrb[35].mxu1 }
 0x1a6   : > { %2675 = vst [vmem:[%s4050_s23 + $0x408] sm:$0xff] %v1875_v25  ;;  %2677 = vst [vmem:[%s4050_s23 + $0x418] sm:$0xff] %v1877_v27  ;;  %v1627_v34 = vadd.f32 %v4035_v38, %v494_v32  ;;  %v1629_v35 = vadd.f32 %v4037_v39, %v783_v33 }
 0x1a7   : > { %v1882_v40 = vmax.f32 %v1626_v30, 0.0  ;;  %v1884_v41 = vmax.f32 %v1628_v31, 0.0 }
 0x1a8   : > { %v1883_v42 = vmax.f32 %v1627_v34, 0.0  ;;  %v1885_v43 = vmax.f32 %v1629_v35, 0.0  ;;  %v498_v44 = vpop.f32.mrb[36].mxu0  ;;  %v787_v45 = vpop.f32.mrb[36].mxu1 }
 0x1a9   : > { %2682 = vst [vmem:[%s4050_s23 + $0x440] sm:$0xff] %v1882_v40  ;;  %2684 = vst [vmem:[%s4050_s23 + $0x450] sm:$0xff] %v1884_v41  ;;  %v1634_v46 = vadd.f32 %v4029_v36, %v498_v44  ;;  %v1636_v47 = vadd.f32 %v4031_v37, %v787_v45  ;;  %v500_v48 = vpop.f32.mrb[37].mxu0  ;;  %v789_v49 = vpop.f32.mrb[37].mxu1 }
 0x1aa   : > { %2683 = vst [vmem:[%s4050_s23 + $0x448] sm:$0xff] %v1883_v42  ;;  %2685 = vst [vmem:[%s4050_s23 + $0x458] sm:$0xff] %v1885_v43  ;;  %v1635_v50 = vadd.f32 %v4035_v38, %v500_v48  ;;  %v1637_v51 = vadd.f32 %v4037_v39, %v789_v49 }
 0x1ab   : > { %v1890_v52 = vmax.f32 %v1634_v46, 0.0  ;;  %v1892_v53 = vmax.f32 %v1636_v47, 0.0 }
 0x1ac   : > { %v1891_v54 = vmax.f32 %v1635_v50, 0.0  ;;  %v1893_v55 = vmax.f32 %v1637_v51, 0.0  ;;  %v504_v56 = vpop.f32.mrb[38].mxu0  ;;  %v793_v57 = vpop.f32.mrb[38].mxu1 }
 0x1ad   : > { %2690 = vst [vmem:[%s4050_s23 + $0x480] sm:$0xff] %v1890_v52  ;;  %2692 = vst [vmem:[%s4050_s23 + $0x490] sm:$0xff] %v1892_v53  ;;  %v1642_v58 = vadd.f32 %v4029_v36, %v504_v56  ;;  %v1644_v59 = vadd.f32 %v4031_v37, %v793_v57  ;;  %v506_v60 = vpop.f32.mrb[39].mxu0  ;;  %v795_v61 = vpop.f32.mrb[39].mxu1 }
 0x1ae   : > { %2691 = vst [vmem:[%s4050_s23 + $0x488] sm:$0xff] %v1891_v54  ;;  %2693 = vst [vmem:[%s4050_s23 + $0x498] sm:$0xff] %v1893_v55  ;;  %v1643_v62 = vadd.f32 %v4035_v38, %v506_v60  ;;  %v1645_v63 = vadd.f32 %v4037_v39, %v795_v61 }
 0x1af   : > { %v1898_v1 = vmax.f32 %v1642_v58, 0.0  ;;  %v1900_v2 = vmax.f32 %v1644_v59, 0.0 }
 0x1b0   : > { %v1899_v3 = vmax.f32 %v1643_v62, 0.0  ;;  %v1901_v4 = vmax.f32 %v1645_v63, 0.0  ;;  %v510_v5 = vpop.f32.mrb[40].mxu0  ;;  %v799_v6 = vpop.f32.mrb[40].mxu1 }
 0x1b1   : > { %2698 = vst [vmem:[%s4050_s23 + $0x4c0] sm:$0xff] %v1898_v1  ;;  %2700 = vst [vmem:[%s4050_s23 + $0x4d0] sm:$0xff] %v1900_v2  ;;  %v1650_v7 = vadd.f32 %v4029_v36, %v510_v5  ;;  %v1652_v0 = vadd.f32 %v4031_v37, %v799_v6  ;;  %v512_v8 = vpop.f32.mrb[41].mxu0  ;;  %v801_v9 = vpop.f32.mrb[41].mxu1 }
 0x1b2   : > { %2699 = vst [vmem:[%s4050_s23 + $0x4c8] sm:$0xff] %v1899_v3  ;;  %2701 = vst [vmem:[%s4050_s23 + $0x4d8] sm:$0xff] %v1901_v4  ;;  %v1651_v10 = vadd.f32 %v4035_v38, %v512_v8  ;;  %v1653_v11 = vadd.f32 %v4037_v39, %v801_v9 }
 0x1b3   : > { %v1906_v12 = vmax.f32 %v1650_v7, 0.0  ;;  %v1908_v13 = vmax.f32 %v1652_v0, 0.0 }
 0x1b4   : > { %v1907_v14 = vmax.f32 %v1651_v10, 0.0  ;;  %v1909_v15 = vmax.f32 %v1653_v11, 0.0  ;;  %v516_v16 = vpop.f32.mrb[42].mxu0  ;;  %v805_v17 = vpop.f32.mrb[42].mxu1 }
 0x1b5   : > { %2706 = vst [vmem:[%s4050_s23 + $0x500] sm:$0xff] %v1906_v12  ;;  %2708 = vst [vmem:[%s4050_s23 + $0x510] sm:$0xff] %v1908_v13  ;;  %v1658_v18 = vadd.f32 %v4029_v36, %v516_v16  ;;  %v1660_v19 = vadd.f32 %v4031_v37, %v805_v17  ;;  %v518_v20 = vpop.f32.mrb[43].mxu0  ;;  %v807_v21 = vpop.f32.mrb[43].mxu1 }
 0x1b6   : > { %2707 = vst [vmem:[%s4050_s23 + $0x508] sm:$0xff] %v1907_v14  ;;  %2709 = vst [vmem:[%s4050_s23 + $0x518] sm:$0xff] %v1909_v15  ;;  %v1659_v22 = vadd.f32 %v4035_v38, %v518_v20  ;;  %v1661_v23 = vadd.f32 %v4037_v39, %v807_v21 }
 0x1b7   : > { %v1914_v24 = vmax.f32 %v1658_v18, 0.0  ;;  %v1916_v25 = vmax.f32 %v1660_v19, 0.0 }
 0x1b8   : > { %v1915_v27 = vmax.f32 %v1659_v22, 0.0  ;;  %v1917_v28 = vmax.f32 %v1661_v23, 0.0  ;;  %v522_v29 = vpop.f32.mrb[44].mxu0  ;;  %v811_v30 = vpop.f32.mrb[44].mxu1 }
 0x1b9   : > { %2714 = vst [vmem:[%s4050_s23 + $0x540] sm:$0xff] %v1914_v24  ;;  %2716 = vst [vmem:[%s4050_s23 + $0x550] sm:$0xff] %v1916_v25  ;;  %v1666_v31 = vadd.f32 %v4029_v36, %v522_v29  ;;  %v1668_v32 = vadd.f32 %v4031_v37, %v811_v30  ;;  %v524_v33 = vpop.f32.mrb[45].mxu0  ;;  %v813_v34 = vpop.f32.mrb[45].mxu1 }
 0x1ba   : > { %2715 = vst [vmem:[%s4050_s23 + $0x548] sm:$0xff] %v1915_v27  ;;  %2717 = vst [vmem:[%s4050_s23 + $0x558] sm:$0xff] %v1917_v28  ;;  %v1667_v35 = vadd.f32 %v4035_v38, %v524_v33  ;;  %v1669_v40 = vadd.f32 %v4037_v39, %v813_v34 }
 0x1bb   : > { %v1922_v41 = vmax.f32 %v1666_v31, 0.0  ;;  %v1924_v42 = vmax.f32 %v1668_v32, 0.0 }
 0x1bc   : > { %v1923_v43 = vmax.f32 %v1667_v35, 0.0  ;;  %v1925_v44 = vmax.f32 %v1669_v40, 0.0  ;;  %v528_v45 = vpop.f32.mrb[46].mxu0  ;;  %v817_v46 = vpop.f32.mrb[46].mxu1 }
 0x1bd   : > { %2722 = vst [vmem:[%s4050_s23 + $0x580] sm:$0xff] %v1922_v41  ;;  %2724 = vst [vmem:[%s4050_s23 + $0x590] sm:$0xff] %v1924_v42  ;;  %v1674_v47 = vadd.f32 %v4029_v36, %v528_v45  ;;  %v1676_v48 = vadd.f32 %v4031_v37, %v817_v46  ;;  %v530_v49 = vpop.f32.mrb[47].mxu0  ;;  %v819_v50 = vpop.f32.mrb[47].mxu1 }
 0x1be   : > { %2723 = vst [vmem:[%s4050_s23 + $0x588] sm:$0xff] %v1923_v43  ;;  %2725 = vst [vmem:[%s4050_s23 + $0x598] sm:$0xff] %v1925_v44  ;;  %v1675_v51 = vadd.f32 %v4035_v38, %v530_v49  ;;  %v1677_v52 = vadd.f32 %v4037_v39, %v819_v50 }
 0x1bf   : > { %v1930_v53 = vmax.f32 %v1674_v47, 0.0  ;;  %v1932_v54 = vmax.f32 %v1676_v48, 0.0 }
 0x1c0   : > { %v1931_v55 = vmax.f32 %v1675_v51, 0.0  ;;  %v1933_v56 = vmax.f32 %v1677_v52, 0.0  ;;  %v534_v57 = vpop.f32.mrb[48].mxu0  ;;  %v823_v58 = vpop.f32.mrb[48].mxu1 }
 0x1c1   : > { %2730 = vst [vmem:[%s4050_s23 + $0x5c0] sm:$0xff] %v1930_v53  ;;  %2732 = vst [vmem:[%s4050_s23 + $0x5d0] sm:$0xff] %v1932_v54  ;;  %v1682_v59 = vadd.f32 %v4029_v36, %v534_v57  ;;  %v1684_v60 = vadd.f32 %v4031_v37, %v823_v58  ;;  %v536_v61 = vpop.f32.mrb[49].mxu0  ;;  %v825_v62 = vpop.f32.mrb[49].mxu1 }
 0x1c2   : > { %2731 = vst [vmem:[%s4050_s23 + $0x5c8] sm:$0xff] %v1931_v55  ;;  %2733 = vst [vmem:[%s4050_s23 + $0x5d8] sm:$0xff] %v1933_v56  ;;  %v1683_v63 = vadd.f32 %v4035_v38, %v536_v61  ;;  %v1685_v1 = vadd.f32 %v4037_v39, %v825_v62 }
 0x1c3   : > { %v1938_v2 = vmax.f32 %v1682_v59, 0.0  ;;  %v1940_v3 = vmax.f32 %v1684_v60, 0.0 }
 0x1c4   : > { %v1939_v4 = vmax.f32 %v1683_v63, 0.0  ;;  %v1941_v5 = vmax.f32 %v1685_v1, 0.0  ;;  %v540_v6 = vpop.f32.mrb[50].mxu0  ;;  %v829_v7 = vpop.f32.mrb[50].mxu1 }
 0x1c5   : > { %2738 = vst [vmem:[%s4050_s23 + $0x600] sm:$0xff] %v1938_v2  ;;  %2740 = vst [vmem:[%s4050_s23 + $0x610] sm:$0xff] %v1940_v3  ;;  %v1690_v0 = vadd.f32 %v4029_v36, %v540_v6  ;;  %v1692_v8 = vadd.f32 %v4031_v37, %v829_v7  ;;  %v542_v9 = vpop.f32.mrb[51].mxu0  ;;  %v831_v10 = vpop.f32.mrb[51].mxu1 }
 0x1c6   : > { %2739 = vst [vmem:[%s4050_s23 + $0x608] sm:$0xff] %v1939_v4  ;;  %2741 = vst [vmem:[%s4050_s23 + $0x618] sm:$0xff] %v1941_v5  ;;  %v1691_v11 = vadd.f32 %v4035_v38, %v542_v9  ;;  %v1693_v12 = vadd.f32 %v4037_v39, %v831_v10 }
 0x1c7   : > { %v1946_v13 = vmax.f32 %v1690_v0, 0.0  ;;  %v1948_v14 = vmax.f32 %v1692_v8, 0.0 }
 0x1c8   : > { %v1947_v15 = vmax.f32 %v1691_v11, 0.0  ;;  %v1949_v16 = vmax.f32 %v1693_v12, 0.0  ;;  %v546_v17 = vpop.f32.mrb[52].mxu0  ;;  %v835_v18 = vpop.f32.mrb[52].mxu1  ;;  %v1468_v12 = vsub.s32 4, %v4015_v26 }
 0x1c9   : > { %2746 = vst [vmem:[%s4050_s23 + $0x640] sm:$0xff] %v1946_v13  ;;  %2748 = vst [vmem:[%s4050_s23 + $0x650] sm:$0xff] %v1948_v14  ;;  %v1698_v19 = vadd.f32 %v4029_v36, %v546_v17  ;;  %v1700_v20 = vadd.f32 %v4031_v37, %v835_v18  ;;  %v548_v21 = vpop.f32.mrb[53].mxu0  ;;  %v837_v22 = vpop.f32.mrb[53].mxu1  ;;  %v1476_v13 = vsub.s32 6, %v4015_v26  ;;  %v1480_v17 = vsub.s32 7, %v4015_v26 }
 0x1ca   : > { %2747 = vst [vmem:[%s4050_s23 + $0x648] sm:$0xff] %v1947_v15  ;;  %2749 = vst [vmem:[%s4050_s23 + $0x658] sm:$0xff] %v1949_v16  ;;  %v1699_v23 = vadd.f32 %v4035_v38, %v548_v21  ;;  %v1701_v24 = vadd.f32 %v4037_v39, %v837_v22  ;;  %v1472_v16 = vsub.s32 5, %v4015_v26 }
 0x1cb   : > { %v1954_v25 = vmax.f32 %v1698_v19, 0.0  ;;  %v1956_v27 = vmax.f32 %v1700_v20, 0.0 }
 0x1cc   : > { %v1955_v28 = vmax.f32 %v1699_v23, 0.0  ;;  %v1957_v29 = vmax.f32 %v1701_v24, 0.0  ;;  %v552_v30 = vpop.f32.mrb[54].mxu0  ;;  %v841_v31 = vpop.f32.mrb[54].mxu1 }
 0x1cd   : > { %2754 = vst [vmem:[%s4050_s23 + $0x680] sm:$0xff] %v1954_v25  ;;  %2756 = vst [vmem:[%s4050_s23 + $0x690] sm:$0xff] %v1956_v27  ;;  %v1706_v32 = vadd.f32 %v4029_v36, %v552_v30  ;;  %v1708_v33 = vadd.f32 %v4031_v37, %v841_v31  ;;  %v554_v34 = vpop.f32.mrb[55].mxu0  ;;  %v843_v35 = vpop.f32.mrb[55].mxu1 }
 0x1ce   : > { %2755 = vst [vmem:[%s4050_s23 + $0x688] sm:$0xff] %v1955_v28  ;;  %2757 = vst [vmem:[%s4050_s23 + $0x698] sm:$0xff] %v1957_v29  ;;  %v1707_v40 = vadd.f32 %v4035_v38, %v554_v34  ;;  %v1709_v41 = vadd.f32 %v4037_v39, %v843_v35  ;;  %v3205_v29 = vld [vmem:[#allocation7] sm:$0xff] }
 0x1cf   : > { %v1962_v42 = vmax.f32 %v1706_v32, 0.0  ;;  %v1964_v43 = vmax.f32 %v1708_v33, 0.0  ;;  %v4336_v26 = vrot.slane %v3205_v29, %v1468_v12  ;;  %v4338_v30 = vrot.slane %v3205_v29, %v1476_v13  ;;  %v3211_v13 = vld [vmem:[%s4050_s23 + $0x50] sm:$0xff] }
 0x1d0   : > { %v1963_v44 = vmax.f32 %v1707_v40, 0.0  ;;  %v1965_v45 = vmax.f32 %v1709_v41, 0.0  ;;  %v558_v46 = vpop.f32.mrb[56].mxu0  ;;  %v847_v47 = vpop.f32.mrb[56].mxu1 }
 0x1d1   : > { %2762 = vst [vmem:[%s4050_s23 + $0x6c0] sm:$0xff] %v1962_v42  ;;  %2764 = vst [vmem:[%s4050_s23 + $0x6d0] sm:$0xff] %v1964_v43  ;;  %v1714_v48 = vadd.f32 %v4029_v36, %v558_v46  ;;  %v1716_v49 = vadd.f32 %v4031_v37, %v847_v47  ;;  %v560_v50 = vpop.f32.mrb[57].mxu0  ;;  %v849_v51 = vpop.f32.mrb[57].mxu1 }
 0x1d2   : > { %2763 = vst [vmem:[%s4050_s23 + $0x6c8] sm:$0xff] %v1963_v44  ;;  %2765 = vst [vmem:[%s4050_s23 + $0x6d8] sm:$0xff] %v1965_v45  ;;  %v1715_v52 = vadd.f32 %v4035_v38, %v560_v50  ;;  %v1717_v53 = vadd.f32 %v4037_v39, %v849_v51 }
 0x1d3   : > { %v1970_v54 = vmax.f32 %v1714_v48, 0.0  ;;  %v1972_v55 = vmax.f32 %v1716_v49, 0.0 }
 0x1d4   : > { %v1971_v56 = vmax.f32 %v1715_v52, 0.0  ;;  %v1973_v57 = vmax.f32 %v1717_v53, 0.0  ;;  %v564_v58 = vpop.f32.mrb[58].mxu0  ;;  %v853_v59 = vpop.f32.mrb[58].mxu1  ;;  %v3206_v53 = vld [vmem:[%s4050_s23] sm:$0xff] }
 0x1d5   : > { %2770 = vst [vmem:[%s4050_s23 + $0x700] sm:$0xff] %v1970_v54  ;;  %2772 = vst [vmem:[%s4050_s23 + $0x710] sm:$0xff] %v1972_v55  ;;  %v1722_v60 = vadd.f32 %v4029_v36, %v564_v58  ;;  %v1724_v61 = vadd.f32 %v4031_v37, %v853_v59  ;;  %v566_v62 = vpop.f32.mrb[59].mxu0  ;;  %v855_v63 = vpop.f32.mrb[59].mxu1  ;;  %v3207_v55 = vld [vmem:[%s4050_s23 + $0x10] sm:$0xff] }
 0x1d6   : > { %2771 = vst [vmem:[%s4050_s23 + $0x708] sm:$0xff] %v1971_v56  ;;  %2773 = vst [vmem:[%s4050_s23 + $0x718] sm:$0xff] %v1973_v57  ;;  %v1723_v1 = vadd.f32 %v4035_v38, %v566_v62  ;;  %v1725_v2 = vadd.f32 %v4037_v39, %v855_v63  ;;  %v3209_v63 = vld [vmem:[%s4050_s23 + $0x18] sm:$0xff] }
 0x1d7   : > { %v1978_v3 = vmax.f32 %v1722_v60, 0.0  ;;  %v1980_v4 = vmax.f32 %v1724_v61, 0.0  ;;  %v3208_v61 = vld [vmem:[%s4050_s23 + $0x8] sm:$0xff] }
 0x1d8   : > { %v1979_v5 = vmax.f32 %v1723_v1, 0.0  ;;  %v1981_v6 = vmax.f32 %v1725_v2, 0.0  ;;  %v570_v7 = vpop.f32.mrb[60].mxu0  ;;  %v859_v0 = vpop.f32.mrb[60].mxu1 }
 0x1d9   : > { %2778 = vst [vmem:[%s4050_s23 + $0x740] sm:$0xff] %v1978_v3  ;;  %2780 = vst [vmem:[%s4050_s23 + $0x750] sm:$0xff] %v1980_v4  ;;  %v1730_v8 = vadd.f32 %v4029_v36, %v570_v7  ;;  %v1732_v9 = vadd.f32 %v4031_v37, %v859_v0  ;;  %v572_v10 = vpop.f32.mrb[61].mxu0  ;;  %v861_v11 = vpop.f32.mrb[61].mxu1 }
 0x1da   : > { %2779 = vst [vmem:[%s4050_s23 + $0x748] sm:$0xff] %v1979_v5  ;;  %2781 = vst [vmem:[%s4050_s23 + $0x758] sm:$0xff] %v1981_v6  ;;  %v1731_v14 = vadd.f32 %v4035_v38, %v572_v10  ;;  %v1733_v15 = vadd.f32 %v4037_v39, %v861_v11  ;;  %v3210_v11 = vld [vmem:[%s4050_s23 + $0x40] sm:$0xff] }
 0x1db   : > { %v1986_v18 = vmax.f32 %v1730_v8, 0.0  ;;  %v1988_v19 = vmax.f32 %v1732_v9, 0.0 }
 0x1dc   : > { %v1987_v20 = vmax.f32 %v1731_v14, 0.0  ;;  %v1989_v21 = vmax.f32 %v1733_v15, 0.0  ;;  %v576_v22 = vpop.f32.mrb[62].mxu0  ;;  %v865_v23 = vpop.f32.mrb[62].mxu1 }
 0x1dd   : > { %2786 = vst [vmem:[%s4050_s23 + $0x780] sm:$0xff] %v1986_v18  ;;  %2788 = vst [vmem:[%s4050_s23 + $0x790] sm:$0xff] %v1988_v19  ;;  %v1738_v24 = vadd.f32 %v4029_v36, %v576_v22  ;;  %v1740_v25 = vadd.f32 %v4031_v37, %v865_v23  ;;  %v578_v27 = vpop.f32.mrb[63].mxu0  ;;  %v867_v28 = vpop.f32.mrb[63].mxu1  ;;  %v4344_v36 = vrot.slane %v3205_v29, %v1472_v16  ;;  %v3212_v19 = vld [vmem:[%s4050_s23 + $0x48] sm:$0xff] }
 0x1de   : > { %2787 = vst [vmem:[%s4050_s23 + $0x788] sm:$0xff] %v1987_v20  ;;  %2789 = vst [vmem:[%s4050_s23 + $0x798] sm:$0xff] %v1989_v21  ;;  %v1739_v31 = vadd.f32 %v4035_v38, %v578_v27  ;;  %v1741_v32 = vadd.f32 %v4037_v39, %v867_v28  ;;  %v4346_v37 = vrot.slane %v3205_v29, %v1480_v17  ;;  %v3213_v21 = vld [vmem:[%s4050_s23 + $0x58] sm:$0xff] }
 0x1df   : > { %v1994_v33 = vmax.f32 %v1738_v24, 0.0  ;;  %v1996_v34 = vmax.f32 %v1740_v25, 0.0 }
 0x1e0   : > { %v1995_v35 = vmax.f32 %v1739_v31, 0.0  ;;  %v1997_v40 = vmax.f32 %v1741_v32, 0.0  ;;  %v968_v41 = vpop.f32.mrb[64].mxu0  ;;  %v1257_v42 = vpop.f32.mrb[64].mxu1 }
 0x1e1   : > { %2794 = vst [vmem:[%s4050_s23 + $0x7c0] sm:$0xff] %v1994_v33  ;;  %2796 = vst [vmem:[%s4050_s23 + $0x7d0] sm:$0xff] %v1996_v34  ;;  %v1494_v43 = vadd.f32 %v4336_v26, %v968_v41  ;;  %v1496_v38 = vadd.f32 %v4338_v30, %v1257_v42  ;;  %v970_v39 = vpop.f32.mrb[65].mxu0  ;;  %v1259_v44 = vpop.f32.mrb[65].mxu1  ;;  %v3215_v42 = vld [vmem:[%s4050_s23 + $0x90] sm:$0xff] }
 0x1e2   : > { %2795 = vst [vmem:[%s4050_s23 + $0x7c8] sm:$0xff] %v1995_v35  ;;  %2797 = vst [vmem:[%s4050_s23 + $0x7d8] sm:$0xff] %v1997_v40  ;;  %v1495_v45 = vadd.f32 %v4344_v36, %v970_v39  ;;  %v1497_v46 = vadd.f32 %v4346_v37, %v1259_v44  ;;  %v3214_v40 = vld [vmem:[%s4050_s23 + $0x80] sm:$0xff] }
 0x1e3   : > { %v1750_v47 = vmax.f32 %v1494_v43, 0.0  ;;  %v1752_v48 = vmax.f32 %v1496_v38, 0.0 }
 0x1e4   : > { %v1751_v49 = vmax.f32 %v1495_v45, 0.0  ;;  %v1753_v50 = vmax.f32 %v1497_v46, 0.0  ;;  %v974_v51 = vpop.f32.mrb[66].mxu0  ;;  %v1263_v52 = vpop.f32.mrb[66].mxu1  ;;  %v3216_v46 = vld [vmem:[%s4050_s23 + $0x88] sm:$0xff] }
 0x1e5   : > { %v2002_v54 = vmax.f32 %v3206_v53, %v1750_v47  ;;  %2550 = vst [vmem:[%s4050_s23 + $0x20] sm:$0xff] %v1750_v47  ;;  %v2004_v56 = vmax.f32 %v3207_v55, %v1752_v48  ;;  %2552 = vst [vmem:[%s4050_s23 + $0x30] sm:$0xff] %v1752_v48  ;;  %v1502_v57 = vadd.f32 %v4336_v26, %v974_v51  ;;  %v976_v59 = vpop.f32.mrb[67].mxu0  ;;  %v1265_v60 = vpop.f32.mrb[67].mxu1  ;;  %v3217_v48 = vld [vmem:[%s4050_s23 + $0x98] sm:$0xff] }
 0x1e6   : > { %v1504_v58 = vadd.f32 %v4338_v30, %v1263_v52  ;;  %v2003_v62 = vmax.f32 %v3208_v61, %v1751_v49  ;;  %2551 = vst [vmem:[%s4050_s23 + $0x28] sm:$0xff] %v1751_v49  ;;  %v2005_v1 = vmax.f32 %v3209_v63, %v1753_v50  ;;  %2553 = vst [vmem:[%s4050_s23 + $0x38] sm:$0xff] %v1753_v50  ;;  %v3218_v61 = vld [vmem:[%s4050_s23 + $0xd0] sm:$0xff]  ;;  %v3219_v63 = vld [vmem:[%s4050_s23 + $0xc0] sm:$0xff] }
 0x1e7   : > { %v1503_v2 = vadd.f32 %v4344_v36, %v976_v59  ;;  %v1505_v3 = vadd.f32 %v4346_v37, %v1265_v60  ;;  %v1758_v4 = vmax.f32 %v1502_v57, 0.0  ;;  %v2130_v6 = vmax.f32 %v2002_v54, %v2004_v56 }
 0x1e8   : > { %v1760_v5 = vmax.f32 %v1504_v58, 0.0  ;;  %v980_v8 = vpop.f32.mrb[68].mxu0  ;;  %v1269_v9 = vpop.f32.mrb[68].mxu1  ;;  %v2131_v10 = vmax.f32 %v2003_v62, %v2005_v1 }
 0x1e9   : > { %v1759_v7 = vmax.f32 %v1503_v2, 0.0  ;;  %v1761_v0 = vmax.f32 %v1505_v3, 0.0  ;;  %v2006_v12 = vmax.f32 %v3210_v11, %v1758_v4  ;;  %2558 = vst [vmem:[%s4050_s23 + $0x60] sm:$0xff] %v1758_v4  ;;  %v1510_v15 = vadd.f32 %v4336_v26, %v980_v8  ;;  %v982_v17 = vpop.f32.mrb[69].mxu0  ;;  %v1271_v18 = vpop.f32.mrb[69].mxu1 }
 0x1ea   : > { %v2008_v14 = vmax.f32 %v3211_v13, %v1760_v5  ;;  %2560 = vst [vmem:[%s4050_s23 + $0x70] sm:$0xff] %v1760_v5  ;;  %v1512_v16 = vadd.f32 %v4338_v30, %v1269_v9  ;;  %v1511_v23 = vadd.f32 %v4344_v36, %v982_v17  ;;  %v1513_v24 = vadd.f32 %v4346_v37, %v1271_v18 }
 0x1eb   : > { %v2007_v20 = vmax.f32 %v3212_v19, %v1759_v7  ;;  %2559 = vst [vmem:[%s4050_s23 + $0x68] sm:$0xff] %v1759_v7  ;;  %v2009_v22 = vmax.f32 %v3213_v21, %v1761_v0  ;;  %2561 = vst [vmem:[%s4050_s23 + $0x78] sm:$0xff] %v1761_v0  ;;  %v1766_v27 = vmax.f32 %v1510_v15, 0.0  ;;  %v4380_v29 = vmax.f32 %v2130_v6, %v2131_v10  ;;  %v3220_v6 = vld [vmem:[%s4050_s23 + $0xc8] sm:$0xff]  ;;  %v3221_v0 = vld [vmem:[%s4050_s23 + $0xd8] sm:$0xff] }
 0x1ec   : > { %v2132_v25 = vmax.f32 %v2006_v12, %v2008_v14  ;;  %v1768_v28 = vmax.f32 %v1512_v16, 0.0  ;;  %v1767_v32 = vmax.f32 %v1511_v23, 0.0  ;;  %v1769_v33 = vmax.f32 %v1513_v24, 0.0  ;;  %v1275_v34 = vpop.f32.mrb[70].mxu1  ;;  %v986_v35 = vpop.f32.mrb[70].mxu0 }
 0x1ed   : > { %v2133_v31 = vmax.f32 %v2007_v20, %v2009_v22  ;;  %v2010_v41 = vmax.f32 %v3214_v40, %v1766_v27  ;;  %2566 = vst [vmem:[%s4050_s23 + $0xa0] sm:$0xff] %v1766_v27  ;;  %v1520_v38 = vadd.f32 %v4338_v30, %v1275_v34  ;;  %2258 = vrot.lane.b32.xlu0 %v4380_v29, %s3500_s27  ;;  %v988_v44 = vpop.f32.mrb[71].mxu0  ;;  %v1277_v45 = vpop.f32.mrb[71].mxu1  ;;  %v3222_v20 = vld [vmem:[%s4050_s23 + $0x110] sm:$0xff]  ;;  %v3223_v22 = vld [vmem:[%s4050_s23 + $0x100] sm:$0xff] }
 0x1ee   : > { %v2012_v43 = vmax.f32 %v3215_v42, %v1768_v28  ;;  %2568 = vst [vmem:[%s4050_s23 + $0xb0] sm:$0xff] %v1768_v28  ;;  %v1518_v39 = vadd.f32 %v4336_v26, %v986_v35  ;;  %v2011_v47 = vmax.f32 %v3216_v46, %v1767_v32  ;;  %2567 = vst [vmem:[%s4050_s23 + $0xa8] sm:$0xff] %v1767_v32 }
 0x1ef   : > { %v2013_v49 = vmax.f32 %v3217_v48, %v1769_v33  ;;  %2569 = vst [vmem:[%s4050_s23 + $0xb8] sm:$0xff] %v1769_v33  ;;  %v1519_v50 = vadd.f32 %v4344_v36, %v988_v44  ;;  %v1521_v51 = vadd.f32 %v4346_v37, %v1277_v45  ;;  %v1776_v52 = vmax.f32 %v1520_v38, 0.0  ;;  %v3225_v33 = vld [vmem:[%s4050_s23 + $0x118] sm:$0xff]  ;;  %v3226_v48 = vld [vmem:[%s4050_s23 + $0x150] sm:$0xff] }
 0x1f0   : > { %v1774_v53 = vmax.f32 %v1518_v39, 0.0  ;;  %v4396_v54 = vmax.f32 %v2132_v25, %v2133_v31  ;;  %v2134_v55 = vmax.f32 %v2010_v41, %v2012_v43  ;;  %v1281_v58 = vpop.f32.mrb[72].mxu1  ;;  %v992_v59 = vpop.f32.mrb[72].mxu0  ;;  %v3224_v31 = vld [vmem:[%s4050_s23 + $0x108] sm:$0xff] }
 0x1f1   : > { %v1775_v56 = vmax.f32 %v1519_v50, 0.0  ;;  %v1777_v57 = vmax.f32 %v1521_v51, 0.0  ;;  %v2135_v60 = vmax.f32 %v2011_v47, %v2013_v49  ;;  %v2016_v62 = vmax.f32 %v3218_v61, %v1776_v52  ;;  %2576 = vst [vmem:[%s4050_s23 + $0xf0] sm:$0xff] %v1776_v52  ;;  %v994_v4 = vpop.f32.mrb[73].mxu0  ;;  %v1283_v5 = vpop.f32.mrb[73].mxu1  ;;  %v3227_v50 = vld [vmem:[%s4050_s23 + $0x140] sm:$0xff] }
 0x1f2   : > { %v2014_v1 = vmax.f32 %v3219_v63, %v1774_v53  ;;  %2574 = vst [vmem:[%s4050_s23 + $0xe0] sm:$0xff] %v1774_v53  ;;  %v1528_v2 = vadd.f32 %v4338_v30, %v1281_v58  ;;  %2260 = vrot.lane.b32.xlu0 %v4396_v54, %s3500_s27  ;;  %v1526_v3 = vadd.f32 %v4336_v26, %v992_v59  ;;  %v3229_v59 = vld [vmem:[%s4050_s23 + $0x158] sm:$0xff] }
 0x1f3   : > { %v2015_v7 = vmax.f32 %v3220_v6, %v1775_v56  ;;  %2575 = vst [vmem:[%s4050_s23 + $0xe8] sm:$0xff] %v1775_v56  ;;  %v2017_v8 = vmax.f32 %v3221_v0, %v1777_v57  ;;  %2577 = vst [vmem:[%s4050_s23 + $0xf8] sm:$0xff] %v1777_v57  ;;  %v1527_v9 = vadd.f32 %v4344_v36, %v994_v4  ;;  %v3228_v57 = vld [vmem:[%s4050_s23 + $0x148] sm:$0xff] }
 0x1f4   : > { %v1529_v10 = vadd.f32 %v4346_v37, %v1283_v5  ;;  %v2136_v11 = vmax.f32 %v2014_v1, %v2016_v62  ;;  %v1784_v12 = vmax.f32 %v1528_v2, 0.0  ;;  %v1782_v13 = vmax.f32 %v1526_v3, 0.0  ;;  %v1287_v18 = vpop.f32.mrb[74].mxu1  ;;  %v998_v19 = vpop.f32.mrb[74].mxu0 }
 0x1f5   : > { %v4412_v14 = vmax.f32 %v2134_v55, %v2135_v60  ;;  %v2137_v15 = vmax.f32 %v2015_v7, %v2017_v8  ;;  %v1783_v16 = vmax.f32 %v1527_v9, 0.0  ;;  %v1536_v24 = vadd.f32 %v4338_v30, %v1287_v18  ;;  %v1000_v27 = vpop.f32.mrb[75].mxu0  ;;  %v1289_v28 = vpop.f32.mrb[75].mxu1  ;;  %v3230_v8 = vld [vmem:[%s4050_s23 + $0x190] sm:$0xff] }
 0x1f6   : > { %v1785_v17 = vmax.f32 %v1529_v10, 0.0  ;;  %v2020_v21 = vmax.f32 %v3222_v20, %v1784_v12  ;;  %2584 = vst [vmem:[%s4050_s23 + $0x130] sm:$0xff] %v1784_v12  ;;  %v2018_v23 = vmax.f32 %v3223_v22, %v1782_v13  ;;  %2582 = vst [vmem:[%s4050_s23 + $0x120] sm:$0xff] %v1782_v13  ;;  %v1534_v25 = vadd.f32 %v4336_v26, %v998_v19  ;;  %v3231_v10 = vld [vmem:[%s4050_s23 + $0x180] sm:$0xff]  ;;  %v3233_v19 = vld [vmem:[%s4050_s23 + $0x198] sm:$0xff] }
 0x1f7   : > { %2262 = vrot.lane.b32.xlu1 %v4412_v14, %s3500_s27  ;;  %v2019_v32 = vmax.f32 %v3224_v31, %v1783_v16  ;;  %2583 = vst [vmem:[%s4050_s23 + $0x128] sm:$0xff] %v1783_v16  ;;  %v1535_v35 = vadd.f32 %v4344_v36, %v1000_v27  ;;  %v1537_v40 = vadd.f32 %v4346_v37, %v1289_v28  ;;  %v1792_v42 = vmax.f32 %v1536_v24, 0.0 }
 0x1f8   : > { %v2021_v34 = vmax.f32 %v3225_v33, %v1785_v17  ;;  %2585 = vst [vmem:[%s4050_s23 + $0x138] sm:$0xff] %v1785_v17  ;;  %v2138_v41 = vmax.f32 %v2018_v23, %v2020_v21  ;;  %v1790_v43 = vmax.f32 %v1534_v25, 0.0  ;;  %v4428_v38 = vmax.f32 %v2136_v11, %v2137_v15  ;;  %v1293_v46 = vpop.f32.mrb[76].mxu1  ;;  %v1004_v47 = vpop.f32.mrb[76].mxu0  ;;  %v3232_v17 = vld [vmem:[%s4050_s23 + $0x188] sm:$0xff] }
 0x1f9   : > { %v1791_v44 = vmax.f32 %v1535_v35, 0.0  ;;  %v1793_v45 = vmax.f32 %v1537_v40, 0.0  ;;  %v2024_v49 = vmax.f32 %v3226_v48, %v1792_v42  ;;  %2592 = vst [vmem:[%s4050_s23 + $0x170] sm:$0xff] %v1792_v42  ;;  %v1544_v52 = vadd.f32 %v4338_v30, %v1293_v46  ;;  %v1006_v55 = vpop.f32.mrb[77].mxu0  ;;  %v1295_v56 = vpop.f32.mrb[77].mxu1  ;;  %v3234_v35 = vld [vmem:[%s4050_s23 + $0x1d0] sm:$0xff] }
 0x1fa   : > { %v2139_v39 = vmax.f32 %v2019_v32, %v2021_v34  ;;  %v2022_v51 = vmax.f32 %v3227_v50, %v1790_v43  ;;  %2590 = vst [vmem:[%s4050_s23 + $0x160] sm:$0xff] %v1790_v43  ;;  %v1542_v53 = vadd.f32 %v4336_v26, %v1004_v47  ;;  %v1543_v61 = vadd.f32 %v4344_v36, %v1006_v55  ;;  %v3236_v46 = vld [vmem:[%s4050_s23 + $0x1c8] sm:$0xff]  ;;  %v3237_v48 = vld [vmem:[%s4050_s23 + $0x1d8] sm:$0xff] }
 0x1fb   : > { %2264 = vrot.lane.b32.xlu1 %v4428_v38, %s3500_s27  ;;  %v2023_v58 = vmax.f32 %v3228_v57, %v1791_v44  ;;  %2591 = vst [vmem:[%s4050_s23 + $0x168] sm:$0xff] %v1791_v44  ;;  %v2025_v60 = vmax.f32 %v3229_v59, %v1793_v45  ;;  %2593 = vst [vmem:[%s4050_s23 + $0x178] sm:$0xff] %v1793_v45  ;;  %v1545_v62 = vadd.f32 %v4346_v37, %v1295_v56 }
 0x1fc   : > { %v2140_v63 = vmax.f32 %v2022_v51, %v2024_v49  ;;  %v1800_v1 = vmax.f32 %v1544_v52, 0.0  ;;  %v1798_v2 = vmax.f32 %v1542_v53, 0.0  ;;  %v4444_v3 = vmax.f32 %v2138_v41, %v2139_v39  ;;  %v1299_v7 = vpop.f32.mrb[78].mxu1  ;;  %v1010_v0 = vpop.f32.mrb[78].mxu0  ;;  %v3235_v41 = vld [vmem:[%s4050_s23 + $0x1c0] sm:$0xff] }
 0x1fd   : > { %v2141_v4 = vmax.f32 %v2023_v58, %v2025_v60  ;;  %v1799_v5 = vmax.f32 %v1543_v61, 0.0  ;;  %v1801_v6 = vmax.f32 %v1545_v62, 0.0  ;;  %v1552_v12 = vadd.f32 %v4338_v30, %v1299_v7  ;;  %v1012_v15 = vpop.f32.mrb[79].mxu0  ;;  %v1301_v16 = vpop.f32.mrb[79].mxu1  ;;  %v3238_v62 = vld [vmem:[%s4050_s23 + $0x210] sm:$0xff] }
 0x1fe   : > { %v2028_v9 = vmax.f32 %v3230_v8, %v1800_v1  ;;  %2600 = vst [vmem:[%s4050_s23 + $0x1b0] sm:$0xff] %v1800_v1  ;;  %v2026_v11 = vmax.f32 %v3231_v10, %v1798_v2  ;;  %2598 = vst [vmem:[%s4050_s23 + $0x1a0] sm:$0xff] %v1798_v2  ;;  %2266 = vrot.lane.b32.xlu0 %v4444_v3, %s3500_s27  ;;  %v1550_v13 = vadd.f32 %v4336_v26, %v1010_v0  ;;  %v3239_v1 = vld [vmem:[%s4050_s23 + $0x200] sm:$0xff] }
 0x1ff   : > { %v2027_v18 = vmax.f32 %v3232_v17, %v1799_v5  ;;  %2599 = vst [vmem:[%s4050_s23 + $0x1a8] sm:$0xff] %v1799_v5  ;;  %v2029_v20 = vmax.f32 %v3233_v19, %v1801_v6  ;;  %2601 = vst [vmem:[%s4050_s23 + $0x1b8] sm:$0xff] %v1801_v6  ;;  %v1551_v21 = vadd.f32 %v4344_v36, %v1012_v15  ;;  %v1808_v24 = vmax.f32 %v1552_v12, 0.0  ;;  %v3240_v0 = vld [vmem:[%s4050_s23 + $0x208] sm:$0xff] }
 0x200   : > { %v1553_v22 = vadd.f32 %v4346_v37, %v1301_v16  ;;  %v2142_v23 = vmax.f32 %v2026_v11, %v2028_v9  ;;  %v1806_v25 = vmax.f32 %v1550_v13, 0.0  ;;  %v4460_v27 = vmax.f32 %v2140_v63, %v2141_v4  ;;  %v1305_v33 = vpop.f32.mrb[80].mxu1  ;;  %v1016_v34 = vpop.f32.mrb[80].mxu0  ;;  %v3241_v9 = vld [vmem:[%s4050_s23 + $0x218] sm:$0xff] }
 0x201   : > { %v2143_v28 = vmax.f32 %v2027_v18, %v2029_v20  ;;  %v1807_v31 = vmax.f32 %v1551_v21, 0.0  ;;  %v2032_v40 = vmax.f32 %v3234_v35, %v1808_v24  ;;  %2608 = vst [vmem:[%s4050_s23 + $0x1f0] sm:$0xff] %v1808_v24  ;;  %v1560_v43 = vadd.f32 %v4338_v30, %v1305_v33  ;;  %v1018_v44 = vpop.f32.mrb[81].mxu0  ;;  %v1307_v45 = vpop.f32.mrb[81].mxu1  ;;  %v3244_v35 = vld [vmem:[%s4050_s23 + $0x248] sm:$0xff] }
 0x202   : > { %v1809_v32 = vmax.f32 %v1553_v22, 0.0  ;;  %v2030_v42 = vmax.f32 %v3235_v41, %v1806_v25  ;;  %2606 = vst [vmem:[%s4050_s23 + $0x1e0] sm:$0xff] %v1806_v25  ;;  %2268 = vrot.lane.b32.xlu1 %v4460_v27, %s3500_s27  ;;  %v1558_v39 = vadd.f32 %v4336_v26, %v1016_v34  ;;  %v1559_v50 = vadd.f32 %v4344_v36, %v1018_v44  ;;  %v3243_v25 = vld [vmem:[%s4050_s23 + $0x240] sm:$0xff]  ;;  %v3245_v41 = vld [vmem:[%s4050_s23 + $0x258] sm:$0xff] }
 0x203   : > { %v2031_v47 = vmax.f32 %v3236_v46, %v1807_v31  ;;  %2607 = vst [vmem:[%s4050_s23 + $0x1e8] sm:$0xff] %v1807_v31  ;;  %v1561_v51 = vadd.f32 %v4346_v37, %v1307_v45  ;;  %v1816_v53 = vmax.f32 %v1560_v43, 0.0  ;;  %v4476_v56 = vmax.f32 %v2142_v23, %v2143_v28  ;;  %v3242_v23 = vld [vmem:[%s4050_s23 + $0x250] sm:$0xff] }
 0x204   : > { %v2033_v49 = vmax.f32 %v3237_v48, %v1809_v32  ;;  %2609 = vst [vmem:[%s4050_s23 + $0x1f8] sm:$0xff] %v1809_v32  ;;  %v2144_v52 = vmax.f32 %v2030_v42, %v2032_v40  ;;  %v1814_v55 = vmax.f32 %v1558_v39, 0.0  ;;  %v1815_v58 = vmax.f32 %v1559_v50, 0.0  ;;  %v1311_v60 = vpop.f32.mrb[82].mxu1  ;;  %v1022_v61 = vpop.f32.mrb[82].mxu0 }
 0x205   : > { %v1817_v59 = vmax.f32 %v1561_v51, 0.0  ;;  %v2036_v63 = vmax.f32 %v3238_v62, %v1816_v53  ;;  %2616 = vst [vmem:[%s4050_s23 + $0x230] sm:$0xff] %v1816_v53  ;;  %v1568_v4 = vadd.f32 %v4338_v30, %v1311_v60  ;;  %2270 = vrot.lane.b32.xlu0 %v4476_v56, %s3500_s27  ;;  %v1566_v5 = vadd.f32 %v4336_v26, %v1022_v61  ;;  %v1024_v6 = vpop.f32.mrb[83].mxu0  ;;  %v1313_v7 = vpop.f32.mrb[83].mxu1  ;;  %v3246_v53 = vld [vmem:[%s4050_s23 + $0x290] sm:$0xff] }
 0x206   : > { %v2145_v57 = vmax.f32 %v2031_v47, %v2033_v49  ;;  %v2034_v2 = vmax.f32 %v3239_v1, %v1814_v55  ;;  %2614 = vst [vmem:[%s4050_s23 + $0x220] sm:$0xff] %v1814_v55  ;;  %v2035_v8 = vmax.f32 %v3240_v0, %v1815_v58  ;;  %2615 = vst [vmem:[%s4050_s23 + $0x228] sm:$0xff] %v1815_v58 }
 0x207   : > { %v2037_v10 = vmax.f32 %v3241_v9, %v1817_v59  ;;  %2617 = vst [vmem:[%s4050_s23 + $0x238] sm:$0xff] %v1817_v59  ;;  %v1567_v11 = vadd.f32 %v4344_v36, %v1024_v6  ;;  %v1569_v12 = vadd.f32 %v4346_v37, %v1313_v7  ;;  %v1824_v15 = vmax.f32 %v1568_v4, 0.0 }
 0x208   : > { %v2146_v13 = vmax.f32 %v2034_v2, %v2036_v63  ;;  %v1822_v16 = vmax.f32 %v1566_v5, 0.0  ;;  %v4492_v17 = vmax.f32 %v2144_v52, %v2145_v57  ;;  %v1317_v21 = vpop.f32.mrb[84].mxu1  ;;  %v1028_v22 = vpop.f32.mrb[84].mxu0  ;;  %v3247_v57 = vld [vmem:[%s4050_s23 + $0x280] sm:$0xff]  ;;  %v3248_v63 = vld [vmem:[%s4050_s23 + $0x288] sm:$0xff]  ;;  %v3249_v2 = vld [vmem:[%s4050_s23 + $0x298] sm:$0xff] }
 0x209   : > { %v2147_v18 = vmax.f32 %v2035_v8, %v2037_v10  ;;  %v1823_v19 = vmax.f32 %v1567_v11, 0.0  ;;  %v1825_v20 = vmax.f32 %v1569_v12, 0.0  ;;  %v2040_v24 = vmax.f32 %v3242_v23, %v1824_v15  ;;  %2624 = vst [vmem:[%s4050_s23 + $0x270] sm:$0xff] %v1824_v15  ;;  %v1030_v33 = vpop.f32.mrb[85].mxu0  ;;  %v1319_v34 = vpop.f32.mrb[85].mxu1 }
 0x20a   : > { %v2038_v28 = vmax.f32 %v3243_v25, %v1822_v16  ;;  %2622 = vst [vmem:[%s4050_s23 + $0x260] sm:$0xff] %v1822_v16  ;;  %v1576_v31 = vadd.f32 %v4338_v30, %v1317_v21  ;;  %2272 = vrot.lane.b32.xlu1 %v4492_v17, %s3500_s27  ;;  %v1574_v32 = vadd.f32 %v4336_v26, %v1028_v22  ;;  %v3250_v16 = vld [vmem:[%s4050_s23 + $0x2d0] sm:$0xff]  ;;  %v3252_v25 = vld [vmem:[%s4050_s23 + $0x2c8] sm:$0xff] }
 0x20b   : > { %v2039_v40 = vmax.f32 %v3244_v35, %v1823_v19  ;;  %2623 = vst [vmem:[%s4050_s23 + $0x268] sm:$0xff] %v1823_v19  ;;  %v2041_v42 = vmax.f32 %v3245_v41, %v1825_v20  ;;  %2625 = vst [vmem:[%s4050_s23 + $0x278] sm:$0xff] %v1825_v20  ;;  %v1575_v43 = vadd.f32 %v4344_v36, %v1030_v33  ;;  %v3251_v19 = vld [vmem:[%s4050_s23 + $0x2c0] sm:$0xff] }
 0x20c   : > { %v1577_v39 = vadd.f32 %v4346_v37, %v1319_v34  ;;  %v2148_v44 = vmax.f32 %v2038_v28, %v2040_v24  ;;  %v1832_v45 = vmax.f32 %v1576_v31, 0.0  ;;  %v1830_v46 = vmax.f32 %v1574_v32, 0.0  ;;  %v1323_v51 = vpop.f32.mrb[86].mxu1  ;;  %v1034_v52 = vpop.f32.mrb[86].mxu0  ;;  %v3253_v31 = vld [vmem:[%s4050_s23 + $0x2d8] sm:$0xff] }
 0x20d   : > { %v4508_v47 = vmax.f32 %v2146_v13, %v2147_v18  ;;  %v2149_v48 = vmax.f32 %v2039_v40, %v2041_v42  ;;  %v1831_v49 = vmax.f32 %v1575_v43, 0.0  ;;  %v1584_v59 = vadd.f32 %v4338_v30, %v1323_v51  ;;  %v1036_v61 = vpop.f32.mrb[87].mxu0  ;;  %v1325_v62 = vpop.f32.mrb[87].mxu1 }
 0x20e   : > { %v1833_v50 = vmax.f32 %v1577_v39, 0.0  ;;  %v2044_v55 = vmax.f32 %v3246_v53, %v1832_v45  ;;  %2632 = vst [vmem:[%s4050_s23 + $0x2b0] sm:$0xff] %v1832_v45  ;;  %v2042_v58 = vmax.f32 %v3247_v57, %v1830_v46  ;;  %2630 = vst [vmem:[%s4050_s23 + $0x2a0] sm:$0xff] %v1830_v46  ;;  %v1582_v60 = vadd.f32 %v4336_v26, %v1034_v52 }
 0x20f   : > { %2274 = vrot.lane.b32.xlu0 %v4508_v47, %s3500_s27  ;;  %v2043_v1 = vmax.f32 %v3248_v63, %v1831_v49  ;;  %2631 = vst [vmem:[%s4050_s23 + $0x2a8] sm:$0xff] %v1831_v49  ;;  %v1583_v5 = vadd.f32 %v4344_v36, %v1036_v61  ;;  %v1585_v6 = vadd.f32 %v4346_v37, %v1325_v62  ;;  %v1840_v0 = vmax.f32 %v1584_v59, 0.0 }
 0x210   : > { %v2045_v4 = vmax.f32 %v3249_v2, %v1833_v50  ;;  %2633 = vst [vmem:[%s4050_s23 + $0x2b8] sm:$0xff] %v1833_v50  ;;  %v2150_v7 = vmax.f32 %v2042_v58, %v2044_v55  ;;  %v1838_v8 = vmax.f32 %v1582_v60, 0.0  ;;  %v4524_v9 = vmax.f32 %v2148_v44, %v2149_v48  ;;  %v1329_v13 = vpop.f32.mrb[88].mxu1  ;;  %v1040_v15 = vpop.f32.mrb[88].mxu0  ;;  %v3254_v48 = vld [vmem:[%s4050_s23 + $0x310] sm:$0xff]  ;;  %v3255_v50 = vld [vmem:[%s4050_s23 + $0x300] sm:$0xff] }
 0x211   : > { %v1839_v11 = vmax.f32 %v1583_v5, 0.0  ;;  %v1841_v12 = vmax.f32 %v1585_v6, 0.0  ;;  %v2048_v18 = vmax.f32 %v3250_v16, %v1840_v0  ;;  %2640 = vst [vmem:[%s4050_s23 + $0x2f0] sm:$0xff] %v1840_v0  ;;  %v1592_v21 = vadd.f32 %v4338_v30, %v1329_v13  ;;  %v1042_v23 = vpop.f32.mrb[89].mxu0  ;;  %v1331_v24 = vpop.f32.mrb[89].mxu1  ;;  %v3256_v58 = vld [vmem:[%s4050_s23 + $0x308] sm:$0xff] }
 0x212   : > { %v2151_v10 = vmax.f32 %v2043_v1, %v2045_v4  ;;  %v2046_v20 = vmax.f32 %v3251_v19, %v1838_v8  ;;  %2638 = vst [vmem:[%s4050_s23 + $0x2e0] sm:$0xff] %v1838_v8  ;;  %2276 = vrot.lane.b32.xlu1 %v4524_v9, %s3500_s27  ;;  %v1590_v22 = vadd.f32 %v4336_v26, %v1040_v15  ;;  %v3257_v60 = vld [vmem:[%s4050_s23 + $0x318] sm:$0xff]  ;;  %v3259_v13 = vld [vmem:[%s4050_s23 + $0x340] sm:$0xff] }
 0x213   : > { %v2047_v28 = vmax.f32 %v3252_v25, %v1839_v11  ;;  %2639 = vst [vmem:[%s4050_s23 + $0x2e8] sm:$0xff] %v1839_v11  ;;  %v2049_v32 = vmax.f32 %v3253_v31, %v1841_v12  ;;  %2641 = vst [vmem:[%s4050_s23 + $0x2f8] sm:$0xff] %v1841_v12  ;;  %v1591_v33 = vadd.f32 %v4344_v36, %v1042_v23  ;;  %v1848_v40 = vmax.f32 %v1592_v21, 0.0  ;;  %v3258_v11 = vld [vmem:[%s4050_s23 + $0x350] sm:$0xff]  ;;  %v3260_v21 = vld [vmem:[%s4050_s23 + $0x348] sm:$0xff] }
 0x214   : > { %v1593_v34 = vadd.f32 %v4346_v37, %v1331_v24  ;;  %v2152_v35 = vmax.f32 %v2046_v20, %v2048_v18  ;;  %v1846_v41 = vmax.f32 %v1590_v22, 0.0  ;;  %v4540_v42 = vmax.f32 %v2150_v7, %v2151_v10  ;;  %v1335_v45 = vpop.f32.mrb[90].mxu1  ;;  %v1046_v46 = vpop.f32.mrb[90].mxu0  ;;  %v3261_v23 = vld [vmem:[%s4050_s23 + $0x358] sm:$0xff] }
 0x215   : > { %v2153_v43 = vmax.f32 %v2047_v28, %v2049_v32  ;;  %v1847_v39 = vmax.f32 %v1591_v33, 0.0  ;;  %v2052_v49 = vmax.f32 %v3254_v48, %v1848_v40  ;;  %2648 = vst [vmem:[%s4050_s23 + $0x330] sm:$0xff] %v1848_v40  ;;  %v1600_v52 = vadd.f32 %v4338_v30, %v1335_v45  ;;  %v1048_v55 = vpop.f32.mrb[91].mxu0  ;;  %v1337_v57 = vpop.f32.mrb[91].mxu1 }
 0x216   : > { %v1849_v44 = vmax.f32 %v1593_v34, 0.0  ;;  %v2050_v51 = vmax.f32 %v3255_v50, %v1846_v41  ;;  %2646 = vst [vmem:[%s4050_s23 + $0x320] sm:$0xff] %v1846_v41  ;;  %2278 = vrot.lane.b32.xlu0 %v4540_v42, %s3500_s27  ;;  %v1598_v53 = vadd.f32 %v4336_v26, %v1046_v46  ;;  %v1599_v62 = vadd.f32 %v4344_v36, %v1048_v55  ;;  %v3263_v46 = vld [vmem:[%s4050_s23 + $0x380] sm:$0xff] }
 0x217   : > { %v2051_v59 = vmax.f32 %v3256_v58, %v1847_v39  ;;  %2647 = vst [vmem:[%s4050_s23 + $0x328] sm:$0xff] %v1847_v39  ;;  %v1601_v63 = vadd.f32 %v4346_v37, %v1337_v57  ;;  %v1856_v2 = vmax.f32 %v1600_v52, 0.0  ;;  %v4556_v5 = vmax.f32 %v2152_v35, %v2153_v43  ;;  %v3265_v57 = vld [vmem:[%s4050_s23 + $0x398] sm:$0xff] }
 0x218   : > { %v2053_v61 = vmax.f32 %v3257_v60, %v1849_v44  ;;  %2649 = vst [vmem:[%s4050_s23 + $0x338] sm:$0xff] %v1849_v44  ;;  %v2154_v1 = vmax.f32 %v2050_v51, %v2052_v49  ;;  %v1854_v4 = vmax.f32 %v1598_v53, 0.0  ;;  %v1855_v7 = vmax.f32 %v1599_v62, 0.0  ;;  %v1341_v8 = vpop.f32.mrb[92].mxu1  ;;  %v1052_v10 = vpop.f32.mrb[92].mxu0  ;;  %v3262_v44 = vld [vmem:[%s4050_s23 + $0x390] sm:$0xff] }
 0x219   : > { %v1857_v0 = vmax.f32 %v1601_v63, 0.0  ;;  %v2056_v12 = vmax.f32 %v3258_v11, %v1856_v2  ;;  %2656 = vst [vmem:[%s4050_s23 + $0x370] sm:$0xff] %v1856_v2  ;;  %v1608_v16 = vadd.f32 %v4338_v30, %v1341_v8  ;;  %2280 = vrot.lane.b32.xlu1 %v4556_v5, %s3500_s27  ;;  %v1606_v18 = vadd.f32 %v4336_v26, %v1052_v10  ;;  %v1054_v19 = vpop.f32.mrb[93].mxu0  ;;  %v1343_v20 = vpop.f32.mrb[93].mxu1  ;;  %v3264_v53 = vld [vmem:[%s4050_s23 + $0x388] sm:$0xff]  ;;  %v3266_v8 = vld [vmem:[%s4050_s23 + $0x3d0] sm:$0xff] }
 0x21a   : > { %v2155_v6 = vmax.f32 %v2051_v59, %v2053_v61  ;;  %v2054_v15 = vmax.f32 %v3259_v13, %v1854_v4  ;;  %2654 = vst [vmem:[%s4050_s23 + $0x360] sm:$0xff] %v1854_v4  ;;  %v2055_v22 = vmax.f32 %v3260_v21, %v1855_v7  ;;  %2655 = vst [vmem:[%s4050_s23 + $0x368] sm:$0xff] %v1855_v7  ;;  %v3267_v11 = vld [vmem:[%s4050_s23 + $0x3c0] sm:$0xff]  ;;  %v3269_v21 = vld [vmem:[%s4050_s23 + $0x3d8] sm:$0xff] }
 0x21b   : > { %v2057_v24 = vmax.f32 %v3261_v23, %v1857_v0  ;;  %2657 = vst [vmem:[%s4050_s23 + $0x378] sm:$0xff] %v1857_v0  ;;  %v1607_v25 = vadd.f32 %v4344_v36, %v1054_v19  ;;  %v1609_v28 = vadd.f32 %v4346_v37, %v1343_v20  ;;  %v1864_v32 = vmax.f32 %v1608_v16, 0.0  ;;  %v3268_v19 = vld [vmem:[%s4050_s23 + $0x3c8] sm:$0xff] }
 0x21c   : > { %v2156_v31 = vmax.f32 %v2054_v15, %v2056_v12  ;;  %v1862_v33 = vmax.f32 %v1606_v18, 0.0  ;;  %v4572_v34 = vmax.f32 %v2154_v1, %v2155_v6  ;;  %v1347_v43 = vpop.f32.mrb[94].mxu1  ;;  %v1058_v39 = vpop.f32.mrb[94].mxu0 }
 0x21d   : > { %v2157_v35 = vmax.f32 %v2055_v22, %v2057_v24  ;;  %v1863_v40 = vmax.f32 %v1607_v25, 0.0  ;;  %v1865_v41 = vmax.f32 %v1609_v28, 0.0  ;;  %v2060_v45 = vmax.f32 %v3262_v44, %v1864_v32  ;;  %2664 = vst [vmem:[%s4050_s23 + $0x3b0] sm:$0xff] %v1864_v32  ;;  %v1060_v51 = vpop.f32.mrb[95].mxu0  ;;  %v1349_v52 = vpop.f32.mrb[95].mxu1 }
 0x21e   : > { %v2058_v48 = vmax.f32 %v3263_v46, %v1862_v33  ;;  %2662 = vst [vmem:[%s4050_s23 + $0x3a0] sm:$0xff] %v1862_v33  ;;  %v1616_v49 = vadd.f32 %v4338_v30, %v1347_v43  ;;  %2282 = vrot.lane.b32.xlu0 %v4572_v34, %s3500_s27  ;;  %v1614_v50 = vadd.f32 %v4336_v26, %v1058_v39  ;;  %v3270_v39 = vld [vmem:[%s4050_s23 + $0x410] sm:$0xff] }
 0x21f   : > { %v2059_v55 = vmax.f32 %v3264_v53, %v1863_v40  ;;  %2663 = vst [vmem:[%s4050_s23 + $0x3a8] sm:$0xff] %v1863_v40  ;;  %v2061_v58 = vmax.f32 %v3265_v57, %v1865_v41  ;;  %2665 = vst [vmem:[%s4050_s23 + $0x3b8] sm:$0xff] %v1865_v41  ;;  %v1615_v59 = vadd.f32 %v4344_v36, %v1060_v51 }
 0x220   : > { %v1617_v60 = vadd.f32 %v4346_v37, %v1349_v52  ;;  %v2158_v61 = vmax.f32 %v2058_v48, %v2060_v45  ;;  %v1872_v62 = vmax.f32 %v1616_v49, 0.0  ;;  %v1870_v63 = vmax.f32 %v1614_v50, 0.0  ;;  %v1353_v7 = vpop.f32.mrb[96].mxu1  ;;  %v1064_v0 = vpop.f32.mrb[96].mxu0  ;;  %v3271_v45 = vld [vmem:[%s4050_s23 + $0x400] sm:$0xff]  ;;  %v3272_v52 = vld [vmem:[%s4050_s23 + $0x408] sm:$0xff] }
 0x221   : > { %v4588_v1 = vmax.f32 %v2156_v31, %v2157_v35  ;;  %v2159_v2 = vmax.f32 %v2059_v55, %v2061_v58  ;;  %v1871_v4 = vmax.f32 %v1615_v59, 0.0  ;;  %v1624_v13 = vadd.f32 %v4338_v30, %v1353_v7  ;;  %v1066_v16 = vpop.f32.mrb[97].mxu0  ;;  %v1355_v18 = vpop.f32.mrb[97].mxu1  ;;  %v3273_v55 = vld [vmem:[%s4050_s23 + $0x418] sm:$0xff] }
 0x222   : > { %v1873_v6 = vmax.f32 %v1617_v60, 0.0  ;;  %v2064_v10 = vmax.f32 %v3266_v8, %v1872_v62  ;;  %2672 = vst [vmem:[%s4050_s23 + $0x3f0] sm:$0xff] %v1872_v62  ;;  %v2062_v12 = vmax.f32 %v3267_v11, %v1870_v63  ;;  %2670 = vst [vmem:[%s4050_s23 + $0x3e0] sm:$0xff] %v1870_v63  ;;  %v1622_v15 = vadd.f32 %v4336_v26, %v1064_v0  ;;  %v3274_v8 = vld [vmem:[%s4050_s23 + $0x450] sm:$0xff]  ;;  %v3275_v11 = vld [vmem:[%s4050_s23 + $0x440] sm:$0xff] }
 0x223   : > { %2284 = vrot.lane.b32.xlu1 %v4588_v1, %s3500_s27  ;;  %v2063_v20 = vmax.f32 %v3268_v19, %v1871_v4  ;;  %2671 = vst [vmem:[%s4050_s23 + $0x3e8] sm:$0xff] %v1871_v4  ;;  %v1623_v23 = vadd.f32 %v4344_v36, %v1066_v16  ;;  %v1625_v24 = vadd.f32 %v4346_v37, %v1355_v18  ;;  %v1880_v28 = vmax.f32 %v1624_v13, 0.0  ;;  %v3276_v19 = vld [vmem:[%s4050_s23 + $0x448] sm:$0xff] }
 0x224   : > { %v2065_v22 = vmax.f32 %v3269_v21, %v1873_v6  ;;  %2673 = vst [vmem:[%s4050_s23 + $0x3f8] sm:$0xff] %v1873_v6  ;;  %v2160_v25 = vmax.f32 %v2062_v12, %v2064_v10  ;;  %v1878_v31 = vmax.f32 %v1622_v15, 0.0  ;;  %v4604_v32 = vmax.f32 %v2158_v61, %v2159_v2  ;;  %v1359_v41 = vpop.f32.mrb[98].mxu1  ;;  %v1070_v43 = vpop.f32.mrb[98].mxu0  ;;  %v3277_v21 = vld [vmem:[%s4050_s23 + $0x458] sm:$0xff] }
 0x225   : > { %v1879_v35 = vmax.f32 %v1623_v23, 0.0  ;;  %v1881_v40 = vmax.f32 %v1625_v24, 0.0  ;;  %v2068_v44 = vmax.f32 %v3270_v39, %v1880_v28  ;;  %2680 = vst [vmem:[%s4050_s23 + $0x430] sm:$0xff] %v1880_v28  ;;  %v1632_v48 = vadd.f32 %v4338_v30, %v1359_v41  ;;  %v1072_v50 = vpop.f32.mrb[99].mxu0  ;;  %v1361_v51 = vpop.f32.mrb[99].mxu1 }
 0x226   : > { %v2161_v33 = vmax.f32 %v2063_v20, %v2065_v22  ;;  %v2066_v46 = vmax.f32 %v3271_v45, %v1878_v31  ;;  %2678 = vst [vmem:[%s4050_s23 + $0x420] sm:$0xff] %v1878_v31  ;;  %2286 = vrot.lane.b32.xlu0 %v4604_v32, %s3500_s27  ;;  %v1630_v49 = vadd.f32 %v4336_v26, %v1070_v43 }
 0x227   : > { %v2067_v53 = vmax.f32 %v3272_v52, %v1879_v35  ;;  %2679 = vst [vmem:[%s4050_s23 + $0x428] sm:$0xff] %v1879_v35  ;;  %v2069_v57 = vmax.f32 %v3273_v55, %v1881_v40  ;;  %2681 = vst [vmem:[%s4050_s23 + $0x438] sm:$0xff] %v1881_v40  ;;  %v1631_v58 = vadd.f32 %v4344_v36, %v1072_v50  ;;  %v1888_v61 = vmax.f32 %v1632_v48, 0.0 }
 0x228   : > { %v1633_v59 = vadd.f32 %v4346_v37, %v1361_v51  ;;  %v2162_v60 = vmax.f32 %v2066_v46, %v2068_v44  ;;  %v1886_v62 = vmax.f32 %v1630_v49, 0.0  ;;  %v4620_v63 = vmax.f32 %v2160_v25, %v2161_v33  ;;  %v1365_v7 = vpop.f32.mrb[100].mxu1  ;;  %v1076_v0 = vpop.f32.mrb[100].mxu0  ;;  %v3278_v44 = vld [vmem:[%s4050_s23 + $0x490] sm:$0xff]  ;;  %v3279_v46 = vld [vmem:[%s4050_s23 + $0x480] sm:$0xff] }
 0x229   : > { %v2163_v2 = vmax.f32 %v2067_v53, %v2069_v57  ;;  %v1887_v4 = vmax.f32 %v1631_v58, 0.0  ;;  %v2072_v10 = vmax.f32 %v3274_v8, %v1888_v61  ;;  %2688 = vst [vmem:[%s4050_s23 + $0x470] sm:$0xff] %v1888_v61  ;;  %v1640_v13 = vadd.f32 %v4338_v30, %v1365_v7  ;;  %v1078_v16 = vpop.f32.mrb[101].mxu0  ;;  %v1367_v18 = vpop.f32.mrb[101].mxu1  ;;  %v3280_v53 = vld [vmem:[%s4050_s23 + $0x488] sm:$0xff]  ;;  %v3281_v57 = vld [vmem:[%s4050_s23 + $0x498] sm:$0xff] }
 0x22a   : > { %v1889_v6 = vmax.f32 %v1633_v59, 0.0  ;;  %v2070_v12 = vmax.f32 %v3275_v11, %v1886_v62  ;;  %2686 = vst [vmem:[%s4050_s23 + $0x460] sm:$0xff] %v1886_v62  ;;  %2288 = vrot.lane.b32.xlu1 %v4620_v63, %s3500_s27  ;;  %v1638_v15 = vadd.f32 %v4336_v26, %v1076_v0  ;;  %v1639_v23 = vadd.f32 %v4344_v36, %v1078_v16  ;;  %v3282_v11 = vld [vmem:[%s4050_s23 + $0x4d0] sm:$0xff] }
 0x22b   : > { %v2071_v20 = vmax.f32 %v3276_v19, %v1887_v4  ;;  %2687 = vst [vmem:[%s4050_s23 + $0x468] sm:$0xff] %v1887_v4  ;;  %v1641_v24 = vadd.f32 %v4346_v37, %v1367_v18  ;;  %v1896_v28 = vmax.f32 %v1640_v13, 0.0  ;;  %v4636_v33 = vmax.f32 %v2162_v60, %v2163_v2  ;;  %v3283_v13 = vld [vmem:[%s4050_s23 + $0x4c0] sm:$0xff] }
 0x22c   : > { %v2073_v22 = vmax.f32 %v3277_v21, %v1889_v6  ;;  %2689 = vst [vmem:[%s4050_s23 + $0x478] sm:$0xff] %v1889_v6  ;;  %v2164_v25 = vmax.f32 %v2070_v12, %v2072_v10  ;;  %v1894_v31 = vmax.f32 %v1638_v15, 0.0  ;;  %v1895_v40 = vmax.f32 %v1639_v23, 0.0  ;;  %v1371_v43 = vpop.f32.mrb[102].mxu1  ;;  %v1082_v39 = vpop.f32.mrb[102].mxu0  ;;  %v3284_v21 = vld [vmem:[%s4050_s23 + $0x4c8] sm:$0xff] }
 0x22d   : > { %v1897_v41 = vmax.f32 %v1641_v24, 0.0  ;;  %v2076_v45 = vmax.f32 %v3278_v44, %v1896_v28  ;;  %2696 = vst [vmem:[%s4050_s23 + $0x4b0] sm:$0xff] %v1896_v28  ;;  %v1648_v49 = vadd.f32 %v4338_v30, %v1371_v43  ;;  %2290 = vrot.lane.b32.xlu0 %v4636_v33, %s3500_s27  ;;  %v1646_v50 = vadd.f32 %v4336_v26, %v1082_v39  ;;  %v1084_v51 = vpop.f32.mrb[103].mxu0  ;;  %v1373_v52 = vpop.f32.mrb[103].mxu1  ;;  %v3285_v23 = vld [vmem:[%s4050_s23 + $0x4d8] sm:$0xff] }
 0x22e   : > { %v2165_v35 = vmax.f32 %v2071_v20, %v2073_v22  ;;  %v2074_v48 = vmax.f32 %v3279_v46, %v1894_v31  ;;  %2694 = vst [vmem:[%s4050_s23 + $0x4a0] sm:$0xff] %v1894_v31  ;;  %v2075_v55 = vmax.f32 %v3280_v53, %v1895_v40  ;;  %2695 = vst [vmem:[%s4050_s23 + $0x4a8] sm:$0xff] %v1895_v40 }
 0x22f   : > { %v2077_v58 = vmax.f32 %v3281_v57, %v1897_v41  ;;  %2697 = vst [vmem:[%s4050_s23 + $0x4b8] sm:$0xff] %v1897_v41  ;;  %v1647_v59 = vadd.f32 %v4344_v36, %v1084_v51  ;;  %v1649_v60 = vadd.f32 %v4346_v37, %v1373_v52  ;;  %v1904_v62 = vmax.f32 %v1648_v49, 0.0 }
 0x230   : > { %v2166_v61 = vmax.f32 %v2074_v48, %v2076_v45  ;;  %v1902_v2 = vmax.f32 %v1646_v50, 0.0  ;;  %v4652_v4 = vmax.f32 %v2164_v25, %v2165_v35  ;;  %v1377_v8 = vpop.f32.mrb[104].mxu1  ;;  %v1088_v10 = vpop.f32.mrb[104].mxu0  ;;  %v3286_v48 = vld [vmem:[%s4050_s23 + $0x510] sm:$0xff]  ;;  %v3287_v50 = vld [vmem:[%s4050_s23 + $0x500] sm:$0xff] }
 0x231   : > { %v2167_v6 = vmax.f32 %v2075_v55, %v2077_v58  ;;  %v1903_v7 = vmax.f32 %v1647_v59, 0.0  ;;  %v1905_v0 = vmax.f32 %v1649_v60, 0.0  ;;  %v2080_v12 = vmax.f32 %v3282_v11, %v1904_v62  ;;  %2704 = vst [vmem:[%s4050_s23 + $0x4f0] sm:$0xff] %v1904_v62  ;;  %v1090_v19 = vpop.f32.mrb[105].mxu0  ;;  %v1379_v20 = vpop.f32.mrb[105].mxu1  ;;  %v3288_v58 = vld [vmem:[%s4050_s23 + $0x508] sm:$0xff] }
 0x232   : > { %v2078_v15 = vmax.f32 %v3283_v13, %v1902_v2  ;;  %2702 = vst [vmem:[%s4050_s23 + $0x4e0] sm:$0xff] %v1902_v2  ;;  %v1656_v16 = vadd.f32 %v4338_v30, %v1377_v8  ;;  %2292 = vrot.lane.b32.xlu1 %v4652_v4, %s3500_s27  ;;  %v1654_v18 = vadd.f32 %v4336_v26, %v1088_v10  ;;  %v3289_v60 = vld [vmem:[%s4050_s23 + $0x518] sm:$0xff] }
 0x233   : > { %v2079_v22 = vmax.f32 %v3284_v21, %v1903_v7  ;;  %2703 = vst [vmem:[%s4050_s23 + $0x4e8] sm:$0xff] %v1903_v7  ;;  %v2081_v24 = vmax.f32 %v3285_v23, %v1905_v0  ;;  %2705 = vst [vmem:[%s4050_s23 + $0x4f8] sm:$0xff] %v1905_v0  ;;  %v1655_v25 = vadd.f32 %v4344_v36, %v1090_v19  ;;  %v3291_v19 = vld [vmem:[%s4050_s23 + $0x540] sm:$0xff] }
 0x234   : > { %v1657_v28 = vadd.f32 %v4346_v37, %v1379_v20  ;;  %v2168_v31 = vmax.f32 %v2078_v15, %v2080_v12  ;;  %v1912_v35 = vmax.f32 %v1656_v16, 0.0  ;;  %v1910_v40 = vmax.f32 %v1654_v18, 0.0  ;;  %v1383_v45 = vpop.f32.mrb[106].mxu1  ;;  %v1094_v46 = vpop.f32.mrb[106].mxu0  ;;  %v3290_v16 = vld [vmem:[%s4050_s23 + $0x550] sm:$0xff] }
 0x235   : > { %v4668_v41 = vmax.f32 %v2166_v61, %v2167_v6  ;;  %v2169_v43 = vmax.f32 %v2079_v22, %v2081_v24  ;;  %v1911_v39 = vmax.f32 %v1655_v25, 0.0  ;;  %v1664_v52 = vadd.f32 %v4338_v30, %v1383_v45  ;;  %v1096_v55 = vpop.f32.mrb[107].mxu0  ;;  %v1385_v57 = vpop.f32.mrb[107].mxu1  ;;  %v3292_v25 = vld [vmem:[%s4050_s23 + $0x548] sm:$0xff] }
 0x236   : > { %v1913_v44 = vmax.f32 %v1657_v28, 0.0  ;;  %v2084_v49 = vmax.f32 %v3286_v48, %v1912_v35  ;;  %2712 = vst [vmem:[%s4050_s23 + $0x530] sm:$0xff] %v1912_v35  ;;  %v2082_v51 = vmax.f32 %v3287_v50, %v1910_v40  ;;  %2710 = vst [vmem:[%s4050_s23 + $0x520] sm:$0xff] %v1910_v40  ;;  %v1662_v53 = vadd.f32 %v4336_v26, %v1094_v46 }
 0x237   : > { %2294 = vrot.lane.b32.xlu0 %v4668_v41, %s3500_s27  ;;  %v2083_v59 = vmax.f32 %v3288_v58, %v1911_v39  ;;  %2711 = vst [vmem:[%s4050_s23 + $0x528] sm:$0xff] %v1911_v39  ;;  %v1663_v62 = vadd.f32 %v4344_v36, %v1096_v55  ;;  %v1665_v2 = vadd.f32 %v4346_v37, %v1385_v57  ;;  %v1920_v7 = vmax.f32 %v1664_v52, 0.0  ;;  %v3295_v57 = vld [vmem:[%s4050_s23 + $0x580] sm:$0xff] }
 0x238   : > { %v2085_v61 = vmax.f32 %v3289_v60, %v1913_v44  ;;  %2713 = vst [vmem:[%s4050_s23 + $0x538] sm:$0xff] %v1913_v44  ;;  %v2170_v6 = vmax.f32 %v2082_v51, %v2084_v49  ;;  %v1918_v0 = vmax.f32 %v1662_v53, 0.0  ;;  %v4684_v8 = vmax.f32 %v2168_v31, %v2169_v43  ;;  %v1389_v13 = vpop.f32.mrb[108].mxu1  ;;  %v1100_v15 = vpop.f32.mrb[108].mxu0  ;;  %v3293_v31 = vld [vmem:[%s4050_s23 + $0x558] sm:$0xff]  ;;  %v3294_v53 = vld [vmem:[%s4050_s23 + $0x590] sm:$0xff] }
 0x239   : > { %v1919_v11 = vmax.f32 %v1663_v62, 0.0  ;;  %v1921_v12 = vmax.f32 %v1665_v2, 0.0  ;;  %v2088_v18 = vmax.f32 %v3290_v16, %v1920_v7  ;;  %2720 = vst [vmem:[%s4050_s23 + $0x570] sm:$0xff] %v1920_v7  ;;  %v1672_v21 = vadd.f32 %v4338_v30, %v1389_v13  ;;  %v1102_v23 = vpop.f32.mrb[109].mxu0  ;;  %v1391_v24 = vpop.f32.mrb[109].mxu1  ;;  %v3296_v2 = vld [vmem:[%s4050_s23 + $0x588] sm:$0xff] }
 0x23a   : > { %v2171_v10 = vmax.f32 %v2083_v59, %v2085_v61  ;;  %v2086_v20 = vmax.f32 %v3291_v19, %v1918_v0  ;;  %2718 = vst [vmem:[%s4050_s23 + $0x560] sm:$0xff] %v1918_v0  ;;  %2296 = vrot.lane.b32.xlu1 %v4684_v8, %s3500_s27  ;;  %v1670_v22 = vadd.f32 %v4336_v26, %v1100_v15  ;;  %v3297_v7 = vld [vmem:[%s4050_s23 + $0x598] sm:$0xff] }
 0x23b   : > { %v2087_v28 = vmax.f32 %v3292_v25, %v1919_v11  ;;  %2719 = vst [vmem:[%s4050_s23 + $0x568] sm:$0xff] %v1919_v11  ;;  %v2089_v35 = vmax.f32 %v3293_v31, %v1921_v12  ;;  %2721 = vst [vmem:[%s4050_s23 + $0x578] sm:$0xff] %v1921_v12  ;;  %v1671_v40 = vadd.f32 %v4344_v36, %v1102_v23  ;;  %v1928_v44 = vmax.f32 %v1672_v21, 0.0  ;;  %v3298_v23 = vld [vmem:[%s4050_s23 + $0x5d0] sm:$0xff]  ;;  %v3299_v25 = vld [vmem:[%s4050_s23 + $0x5c0] sm:$0xff] }
 0x23c   : > { %v1673_v43 = vadd.f32 %v4346_v37, %v1391_v24  ;;  %v2172_v39 = vmax.f32 %v2086_v20, %v2088_v18  ;;  %v1926_v45 = vmax.f32 %v1670_v22, 0.0  ;;  %v4700_v46 = vmax.f32 %v2170_v6, %v2171_v10  ;;  %v1395_v51 = vpop.f32.mrb[110].mxu1  ;;  %v1106_v52 = vpop.f32.mrb[110].mxu0 }
 0x23d   : > { %v2173_v48 = vmax.f32 %v2087_v28, %v2089_v35  ;;  %v1927_v49 = vmax.f32 %v1671_v40, 0.0  ;;  %v2092_v55 = vmax.f32 %v3294_v53, %v1928_v44  ;;  %2728 = vst [vmem:[%s4050_s23 + $0x5b0] sm:$0xff] %v1928_v44  ;;  %v1680_v59 = vadd.f32 %v4338_v30, %v1395_v51  ;;  %v1108_v61 = vpop.f32.mrb[111].mxu0  ;;  %v1397_v62 = vpop.f32.mrb[111].mxu1 }
 0x23e   : > { %v1929_v50 = vmax.f32 %v1673_v43, 0.0  ;;  %v2090_v58 = vmax.f32 %v3295_v57, %v1926_v45  ;;  %2726 = vst [vmem:[%s4050_s23 + $0x5a0] sm:$0xff] %v1926_v45  ;;  %2298 = vrot.lane.b32.xlu0 %v4700_v46, %s3500_s27  ;;  %v1678_v60 = vadd.f32 %v4336_v26, %v1106_v52  ;;  %v1679_v10 = vadd.f32 %v4344_v36, %v1108_v61  ;;  %v3301_v45 = vld [vmem:[%s4050_s23 + $0x5d8] sm:$0xff] }
 0x23f   : > { %v2091_v6 = vmax.f32 %v3296_v2, %v1927_v49  ;;  %2727 = vst [vmem:[%s4050_s23 + $0x5a8] sm:$0xff] %v1927_v49  ;;  %v1681_v11 = vadd.f32 %v4346_v37, %v1397_v62  ;;  %v1936_v13 = vmax.f32 %v1680_v59, 0.0  ;;  %v4716_v16 = vmax.f32 %v2172_v39, %v2173_v48  ;;  %v3300_v39 = vld [vmem:[%s4050_s23 + $0x5c8] sm:$0xff]  ;;  %v3302_v62 = vld [vmem:[%s4050_s23 + $0x610] sm:$0xff] }
 0x240   : > { %v2093_v0 = vmax.f32 %v3297_v7, %v1929_v50  ;;  %2729 = vst [vmem:[%s4050_s23 + $0x5b8] sm:$0xff] %v1929_v50  ;;  %v2174_v12 = vmax.f32 %v2090_v58, %v2092_v55  ;;  %v1934_v15 = vmax.f32 %v1678_v60, 0.0  ;;  %v1935_v19 = vmax.f32 %v1679_v10, 0.0  ;;  %v1401_v21 = vpop.f32.mrb[112].mxu1  ;;  %v1112_v22 = vpop.f32.mrb[112].mxu0 }
 0x241   : > { %v1937_v20 = vmax.f32 %v1681_v11, 0.0  ;;  %v2096_v24 = vmax.f32 %v3298_v23, %v1936_v13  ;;  %2736 = vst [vmem:[%s4050_s23 + $0x5f0] sm:$0xff] %v1936_v13  ;;  %v1688_v31 = vadd.f32 %v4338_v30, %v1401_v21  ;;  %2300 = vrot.lane.b32.xlu1 %v4716_v16, %s3500_s27  ;;  %v1686_v35 = vadd.f32 %v4336_v26, %v1112_v22  ;;  %v1114_v40 = vpop.f32.mrb[113].mxu0  ;;  %v1403_v43 = vpop.f32.mrb[113].mxu1  ;;  %v3304_v13 = vld [vmem:[%s4050_s23 + $0x608] sm:$0xff] }
 0x242   : > { %v2175_v18 = vmax.f32 %v2091_v6, %v2093_v0  ;;  %v2094_v28 = vmax.f32 %v3299_v25, %v1934_v15  ;;  %2734 = vst [vmem:[%s4050_s23 + $0x5e0] sm:$0xff] %v1934_v15  ;;  %v2095_v44 = vmax.f32 %v3300_v39, %v1935_v19  ;;  %2735 = vst [vmem:[%s4050_s23 + $0x5e8] sm:$0xff] %v1935_v19  ;;  %v3303_v6 = vld [vmem:[%s4050_s23 + $0x600] sm:$0xff]  ;;  %v3306_v39 = vld [vmem:[%s4050_s23 + $0x650] sm:$0xff] }
 0x243   : > { %v2097_v48 = vmax.f32 %v3301_v45, %v1937_v20  ;;  %2737 = vst [vmem:[%s4050_s23 + $0x5f8] sm:$0xff] %v1937_v20  ;;  %v1687_v49 = vadd.f32 %v4344_v36, %v1114_v40  ;;  %v1689_v50 = vadd.f32 %v4346_v37, %v1403_v43  ;;  %v1944_v52 = vmax.f32 %v1688_v31, 0.0  ;;  %v3307_v45 = vld [vmem:[%s4050_s23 + $0x640] sm:$0xff] }
 0x244   : > { %v2176_v51 = vmax.f32 %v2094_v28, %v2096_v24  ;;  %v1942_v53 = vmax.f32 %v1686_v35, 0.0  ;;  %v4732_v55 = vmax.f32 %v2174_v12, %v2175_v18  ;;  %v1407_v60 = vpop.f32.mrb[114].mxu1  ;;  %v1118_v61 = vpop.f32.mrb[114].mxu0  ;;  %v3305_v18 = vld [vmem:[%s4050_s23 + $0x618] sm:$0xff] }
 0x245   : > { %v2177_v57 = vmax.f32 %v2095_v44, %v2097_v48  ;;  %v1943_v58 = vmax.f32 %v1687_v49, 0.0  ;;  %v1945_v59 = vmax.f32 %v1689_v50, 0.0  ;;  %v2100_v2 = vmax.f32 %v3302_v62, %v1944_v52  ;;  %2744 = vst [vmem:[%s4050_s23 + $0x630] sm:$0xff] %v1944_v52  ;;  %v1120_v11 = vpop.f32.mrb[115].mxu0  ;;  %v1409_v12 = vpop.f32.mrb[115].mxu1 }
 0x246   : > { %v2098_v7 = vmax.f32 %v3303_v6, %v1942_v53  ;;  %2742 = vst [vmem:[%s4050_s23 + $0x620] sm:$0xff] %v1942_v53  ;;  %v1696_v0 = vadd.f32 %v4338_v30, %v1407_v60  ;;  %2302 = vrot.lane.b32.xlu0 %v4732_v55, %s3500_s27  ;;  %v1694_v10 = vadd.f32 %v4336_v26, %v1118_v61  ;;  %v3308_v53 = vld [vmem:[%s4050_s23 + $0x648] sm:$0xff] }
 0x247   : > { %v2099_v15 = vmax.f32 %v3304_v13, %v1943_v58  ;;  %2743 = vst [vmem:[%s4050_s23 + $0x628] sm:$0xff] %v1943_v58  ;;  %v2101_v19 = vmax.f32 %v3305_v18, %v1945_v59  ;;  %2745 = vst [vmem:[%s4050_s23 + $0x638] sm:$0xff] %v1945_v59  ;;  %v1695_v20 = vadd.f32 %v4344_v36, %v1120_v11  ;;  %v3309_v58 = vld [vmem:[%s4050_s23 + $0x658] sm:$0xff] }
 0x248   : > { %v1697_v21 = vadd.f32 %v4346_v37, %v1409_v12  ;;  %v2178_v22 = vmax.f32 %v2098_v7, %v2100_v2  ;;  %v1952_v23 = vmax.f32 %v1696_v0, 0.0  ;;  %v1950_v24 = vmax.f32 %v1694_v10, 0.0  ;;  %v1413_v40 = vpop.f32.mrb[116].mxu1  ;;  %v1124_v43 = vpop.f32.mrb[116].mxu0 }
 0x249   : > { %v4748_v25 = vmax.f32 %v2176_v51, %v2177_v57  ;;  %v2179_v28 = vmax.f32 %v2099_v15, %v2101_v19  ;;  %v1951_v31 = vmax.f32 %v1695_v20, 0.0  ;;  %v1704_v49 = vadd.f32 %v4338_v30, %v1413_v40  ;;  %v1126_v51 = vpop.f32.mrb[117].mxu0  ;;  %v1415_v52 = vpop.f32.mrb[117].mxu1  ;;  %v3310_v15 = vld [vmem:[%s4050_s23 + $0x690] sm:$0xff]  ;;  %v3311_v19 = vld [vmem:[%s4050_s23 + $0x680] sm:$0xff] }
 0x24a   : > { %v1953_v35 = vmax.f32 %v1697_v21, 0.0  ;;  %v2104_v44 = vmax.f32 %v3306_v39, %v1952_v23  ;;  %2752 = vst [vmem:[%s4050_s23 + $0x670] sm:$0xff] %v1952_v23  ;;  %v2102_v48 = vmax.f32 %v3307_v45, %v1950_v24  ;;  %2750 = vst [vmem:[%s4050_s23 + $0x660] sm:$0xff] %v1950_v24  ;;  %v1702_v50 = vadd.f32 %v4336_v26, %v1124_v43 }
 0x24b   : > { %2304 = vrot.lane.b32.xlu1 %v4748_v25, %s3500_s27  ;;  %v2103_v57 = vmax.f32 %v3308_v53, %v1951_v31  ;;  %2751 = vst [vmem:[%s4050_s23 + $0x668] sm:$0xff] %v1951_v31  ;;  %v1703_v60 = vadd.f32 %v4344_v36, %v1126_v51  ;;  %v1705_v61 = vadd.f32 %v4346_v37, %v1415_v52  ;;  %v1960_v2 = vmax.f32 %v1704_v49, 0.0 }
 0x24c   : > { %v2105_v59 = vmax.f32 %v3309_v58, %v1953_v35  ;;  %2753 = vst [vmem:[%s4050_s23 + $0x678] sm:$0xff] %v1953_v35  ;;  %v2180_v62 = vmax.f32 %v2102_v48, %v2104_v44  ;;  %v1958_v6 = vmax.f32 %v1702_v50, 0.0  ;;  %v4764_v7 = vmax.f32 %v2178_v22, %v2179_v28  ;;  %v1419_v12 = vpop.f32.mrb[118].mxu1  ;;  %v1130_v13 = vpop.f32.mrb[118].mxu0  ;;  %v3312_v28 = vld [vmem:[%s4050_s23 + $0x688] sm:$0xff]  ;;  %v3313_v35 = vld [vmem:[%s4050_s23 + $0x698] sm:$0xff] }
 0x24d   : > { %v1959_v10 = vmax.f32 %v1703_v60, 0.0  ;;  %v1961_v11 = vmax.f32 %v1705_v61, 0.0  ;;  %v2108_v18 = vmax.f32 %v3310_v15, %v1960_v2  ;;  %2760 = vst [vmem:[%s4050_s23 + $0x6b0] sm:$0xff] %v1960_v2  ;;  %v1712_v21 = vadd.f32 %v4338_v30, %v1419_v12  ;;  %v1132_v23 = vpop.f32.mrb[119].mxu0  ;;  %v1421_v24 = vpop.f32.mrb[119].mxu1  ;;  %v3314_v58 = vld [vmem:[%s4050_s23 + $0x6d0] sm:$0xff] }
 0x24e   : > { %v2181_v0 = vmax.f32 %v2103_v57, %v2105_v59  ;;  %v2106_v20 = vmax.f32 %v3311_v19, %v1958_v6  ;;  %2758 = vst [vmem:[%s4050_s23 + $0x6a0] sm:$0xff] %v1958_v6  ;;  %2306 = vrot.lane.b32.xlu0 %v4764_v7, %s3500_s27  ;;  %v1710_v22 = vadd.f32 %v4336_v26, %v1130_v13  ;;  %v3315_v60 = vld [vmem:[%s4050_s23 + $0x6c0] sm:$0xff]  ;;  %v3317_v12 = vld [vmem:[%s4050_s23 + $0x6d8] sm:$0xff] }
 0x24f   : > { %v2107_v31 = vmax.f32 %v3312_v28, %v1959_v10  ;;  %2759 = vst [vmem:[%s4050_s23 + $0x6a8] sm:$0xff] %v1959_v10  ;;  %v2109_v40 = vmax.f32 %v3313_v35, %v1961_v11  ;;  %2761 = vst [vmem:[%s4050_s23 + $0x6b8] sm:$0xff] %v1961_v11  ;;  %v1711_v43 = vadd.f32 %v4344_v36, %v1132_v23  ;;  %v1968_v45 = vmax.f32 %v1712_v21, 0.0  ;;  %v3316_v10 = vld [vmem:[%s4050_s23 + $0x6c8] sm:$0xff] }
 0x250   : > { %v1713_v39 = vadd.f32 %v4346_v37, %v1421_v24  ;;  %v2182_v44 = vmax.f32 %v2106_v20, %v2108_v18  ;;  %v1966_v48 = vmax.f32 %v1710_v22, 0.0  ;;  %v4780_v49 = vmax.f32 %v2180_v62, %v2181_v0  ;;  %v1425_v53 = vpop.f32.mrb[120].mxu1  ;;  %v1136_v57 = vpop.f32.mrb[120].mxu0 }
 0x251   : > { %v2183_v50 = vmax.f32 %v2107_v31, %v2109_v40  ;;  %v1967_v51 = vmax.f32 %v1711_v43, 0.0  ;;  %v2112_v59 = vmax.f32 %v3314_v58, %v1968_v45  ;;  %2768 = vst [vmem:[%s4050_s23 + $0x6f0] sm:$0xff] %v1968_v45  ;;  %v1720_v2 = vadd.f32 %v4338_v30, %v1425_v53  ;;  %v1138_v6 = vpop.f32.mrb[121].mxu0  ;;  %v1427_v0 = vpop.f32.mrb[121].mxu1  ;;  %v3318_v40 = vld [vmem:[%s4050_s23 + $0x710] sm:$0xff] }
 0x252   : > { %v1969_v52 = vmax.f32 %v1713_v39, 0.0  ;;  %v2110_v61 = vmax.f32 %v3315_v60, %v1966_v48  ;;  %2766 = vst [vmem:[%s4050_s23 + $0x6e0] sm:$0xff] %v1966_v48  ;;  %2308 = vrot.lane.b32.xlu1 %v4780_v49, %s3500_s27  ;;  %v1718_v62 = vadd.f32 %v4336_v26, %v1136_v57  ;;  %v1719_v15 = vadd.f32 %v4344_v36, %v1138_v6  ;;  %v3319_v39 = vld [vmem:[%s4050_s23 + $0x700] sm:$0xff]  ;;  %v3321_v57 = vld [vmem:[%s4050_s23 + $0x718] sm:$0xff] }
 0x253   : > { %v2111_v11 = vmax.f32 %v3316_v10, %v1967_v51  ;;  %2767 = vst [vmem:[%s4050_s23 + $0x6e8] sm:$0xff] %v1967_v51  ;;  %v1721_v18 = vadd.f32 %v4346_v37, %v1427_v0  ;;  %v1976_v20 = vmax.f32 %v1720_v2, 0.0  ;;  %v4796_v22 = vmax.f32 %v2182_v44, %v2183_v50 }
 0x254   : > { %v2113_v13 = vmax.f32 %v3317_v12, %v1969_v52  ;;  %2769 = vst [vmem:[%s4050_s23 + $0x6f8] sm:$0xff] %v1969_v52  ;;  %v2184_v19 = vmax.f32 %v2110_v61, %v2112_v59  ;;  %v1974_v21 = vmax.f32 %v1718_v62, 0.0  ;;  %v1975_v24 = vmax.f32 %v1719_v15, 0.0  ;;  %v1431_v31 = vpop.f32.mrb[122].mxu1  ;;  %v1142_v35 = vpop.f32.mrb[122].mxu0  ;;  %v3320_v52 = vld [vmem:[%s4050_s23 + $0x708] sm:$0xff] }
 0x255   : > { %v1977_v28 = vmax.f32 %v1721_v18, 0.0  ;;  %v2116_v43 = vmax.f32 %v3318_v40, %v1976_v20  ;;  %2776 = vst [vmem:[%s4050_s23 + $0x730] sm:$0xff] %v1976_v20  ;;  %v1728_v48 = vadd.f32 %v4338_v30, %v1431_v31  ;;  %2310 = vrot.lane.b32.xlu0 %v4796_v22, %s3500_s27  ;;  %v1726_v44 = vadd.f32 %v4336_v26, %v1142_v35  ;;  %v1144_v50 = vpop.f32.mrb[123].mxu0  ;;  %v1433_v51 = vpop.f32.mrb[123].mxu1  ;;  %v3322_v15 = vld [vmem:[%s4050_s23 + $0x750] sm:$0xff]  ;;  %v3323_v20 = vld [vmem:[%s4050_s23 + $0x740] sm:$0xff] }
 0x256   : > { %v2185_v23 = vmax.f32 %v2111_v11, %v2113_v13  ;;  %v2114_v45 = vmax.f32 %v3319_v39, %v1974_v21  ;;  %2774 = vst [vmem:[%s4050_s23 + $0x720] sm:$0xff] %v1974_v21  ;;  %v2115_v53 = vmax.f32 %v3320_v52, %v1975_v24  ;;  %2775 = vst [vmem:[%s4050_s23 + $0x728] sm:$0xff] %v1975_v24  ;;  %v3324_v31 = vld [vmem:[%s4050_s23 + $0x748] sm:$0xff]  ;;  %v3325_v40 = vld [vmem:[%s4050_s23 + $0x758] sm:$0xff] }
 0x257   : > { %v2117_v58 = vmax.f32 %v3321_v57, %v1977_v28  ;;  %2777 = vst [vmem:[%s4050_s23 + $0x738] sm:$0xff] %v1977_v28  ;;  %v1727_v59 = vadd.f32 %v4344_v36, %v1144_v50  ;;  %v1729_v60 = vadd.f32 %v4346_v37, %v1433_v51  ;;  %v1984_v2 = vmax.f32 %v1728_v48, 0.0 }
 0x258   : > { %v2186_v61 = vmax.f32 %v2114_v45, %v2116_v43  ;;  %v1982_v62 = vmax.f32 %v1726_v44, 0.0  ;;  %v4812_v6 = vmax.f32 %v2184_v19, %v2185_v23  ;;  %v1437_v12 = vpop.f32.mrb[124].mxu1  ;;  %v1148_v13 = vpop.f32.mrb[124].mxu0 }
 0x259   : > { %v2187_v0 = vmax.f32 %v2115_v53, %v2117_v58  ;;  %v1983_v10 = vmax.f32 %v1727_v59, 0.0  ;;  %v1985_v11 = vmax.f32 %v1729_v60, 0.0  ;;  %v2120_v18 = vmax.f32 %v3322_v15, %v1984_v2  ;;  %2784 = vst [vmem:[%s4050_s23 + $0x770] sm:$0xff] %v1984_v2  ;;  %v1150_v23 = vpop.f32.mrb[125].mxu0  ;;  %v1439_v28 = vpop.f32.mrb[125].mxu1  ;;  %v3326_v60 = vld [vmem:[%s4050_s23 + $0x790] sm:$0xff] }
 0x25a   : > { %v2118_v21 = vmax.f32 %v3323_v20, %v1982_v62  ;;  %2782 = vst [vmem:[%s4050_s23 + $0x760] sm:$0xff] %v1982_v62  ;;  %v1736_v24 = vadd.f32 %v4338_v30, %v1437_v12  ;;  %2312 = vrot.lane.b32.xlu1 %v4812_v6, %s3500_s27  ;;  %v1734_v19 = vadd.f32 %v4336_v26, %v1148_v13  ;;  %v3327_v62 = vld [vmem:[%s4050_s23 + $0x780] sm:$0xff]  ;;  %v3328_v13 = vld [vmem:[%s4050_s23 + $0x788] sm:$0xff] }
 0x25b   : > { %v2119_v35 = vmax.f32 %v3324_v31, %v1983_v10  ;;  %2783 = vst [vmem:[%s4050_s23 + $0x768] sm:$0xff] %v1983_v10  ;;  %v2121_v43 = vmax.f32 %v3325_v40, %v1985_v11  ;;  %2785 = vst [vmem:[%s4050_s23 + $0x778] sm:$0xff] %v1985_v11  ;;  %v1735_v39 = vadd.f32 %v4344_v36, %v1150_v23 }
 0x25c   : > { %v1737_v45 = vadd.f32 %v4346_v37, %v1439_v28  ;;  %v2188_v48 = vmax.f32 %v2118_v21, %v2120_v18  ;;  %v1992_v44 = vmax.f32 %v1736_v24, 0.0  ;;  %v1990_v50 = vmax.f32 %v1734_v19, 0.0  ;;  %v1443_v58 = vpop.f32.mrb[126].mxu1  ;;  %v1154_v59 = vpop.f32.mrb[126].mxu0  ;;  %v3329_v18 = vld [vmem:[%s4050_s23 + $0x798] sm:$0xff] }
 0x25d   : > { %v4828_v51 = vmax.f32 %v2186_v61, %v2187_v0  ;;  %v2189_v52 = vmax.f32 %v2119_v35, %v2121_v43  ;;  %v1991_v53 = vmax.f32 %v1735_v39, 0.0  ;;  %v1744_v11 = vadd.f32 %v4338_v30, %v1443_v58  ;;  %v1156_v0 = vpop.f32.mrb[127].mxu0  ;;  %v1445_v12 = vpop.f32.mrb[127].mxu1 }
 0x25e   : > { %v1993_v57 = vmax.f32 %v1737_v45, 0.0  ;;  %v2124_v2 = vmax.f32 %v3326_v60, %v1992_v44  ;;  %2792 = vst [vmem:[%s4050_s23 + $0x7b0] sm:$0xff] %v1992_v44  ;;  %v2122_v10 = vmax.f32 %v3327_v62, %v1990_v50  ;;  %2790 = vst [vmem:[%s4050_s23 + $0x7a0] sm:$0xff] %v1990_v50  ;;  %v1742_v61 = vadd.f32 %v4336_v26, %v1154_v59  ;;  %v3332_v44 = vld [vmem:[%s4050_s23 + $0x7c8] sm:$0xff] }
 0x25f   : > { %2314 = vrot.lane.b32.xlu0 %v4828_v51, %s3500_s27  ;;  %v2123_v15 = vmax.f32 %v3328_v13, %v1991_v53  ;;  %2791 = vst [vmem:[%s4050_s23 + $0x7a8] sm:$0xff] %v1991_v53  ;;  %v1743_v21 = vadd.f32 %v4344_v36, %v1156_v0  ;;  %v1745_v30 = vadd.f32 %v4346_v37, %v1445_v12  ;;  %v2000_v19 = vmax.f32 %v1744_v11, 0.0  ;;  %v2259_v23 = vpop.permute.xlu0 %2258  ;;  %v3330_v36 = vld [vmem:[%s4050_s23 + $0x7d0] sm:$0xff]  ;;  %v3331_v37 = vld [vmem:[%s4050_s23 + $0x7c0] sm:$0xff] }
 0x260   : > { %v2125_v20 = vmax.f32 %v3329_v18, %v1993_v57  ;;  %2793 = vst [vmem:[%s4050_s23 + $0x7b8] sm:$0xff] %v1993_v57  ;;  %v2190_v24 = vmax.f32 %v2122_v10, %v2124_v2  ;;  %v1998_v26 = vmax.f32 %v1742_v61, 0.0  ;;  %v4844_v28 = vmax.f32 %v2188_v48, %v2189_v52  ;;  %v3333_v48 = vld [vmem:[%s4050_s23 + $0x7d8] sm:$0xff] }
 0x261   : > { %v1999_v35 = vmax.f32 %v1743_v21, 0.0  ;;  %v2001_v40 = vmax.f32 %v1745_v30, 0.0  ;;  %v4847_v43 = vmax.f32 %v4380_v29, %v2259_v23  ;;  %v2128_v39 = vmax.f32 %v3330_v36, %v2000_v19  ;;  %2800 = vst [vmem:[%s4050_s23 + $0x7f0] sm:$0xff] %v2000_v19 }
 0x262   : > { %v2191_v31 = vmax.f32 %v2123_v15, %v2125_v20  ;;  %v2126_v45 = vmax.f32 %v3331_v37, %v1998_v26  ;;  %2798 = vst [vmem:[%s4050_s23 + $0x7e0] sm:$0xff] %v1998_v26  ;;  %2316 = vrot.lane.b32.xlu1 %v4844_v28, %s3500_s27 }
 0x263   : > { %v2127_v50 = vmax.f32 %v3332_v44, %v1999_v35  ;;  %2799 = vst [vmem:[%s4050_s23 + $0x7e8] sm:$0xff] %v1999_v35  ;;  %v2129_v52 = vmax.f32 %v3333_v48, %v2001_v40  ;;  %2801 = vst [vmem:[%s4050_s23 + $0x7f8] sm:$0xff] %v2001_v40  ;;  %2418 = vrot.lane.b32.xlu0 %v4847_v43, %s3501_s30  ;;  %s3426_s23 = scalar_lea.vmem %s3425_s21, 65536 }
 0x264   : > { %v4861_v29 = vmax.f32 %v2190_v24, %v2191_v31  ;;  %v2192_v53 = vmax.f32 %v2126_v45, %v2128_v39  ;;  %v2261_v57 = vpop.permute.xlu0 %2260  ;;  %p3428_p12 = scmp.lt.s32.totalorder %s3426_s23, %s3420_s26 }
 0x265   : > { %v2193_v58 = vmax.f32 %v2127_v50, %v2129_v52  ;;  %v4864_v59 = vmax.f32 %v4396_v54, %v2261_v57 }
 0x266   : > { %p3429_p2 = por %p3428_p12, %p3427_p9 }
 0x267   : > { %2420 = vrot.lane.b32.xlu1 %v4864_v59, %s3501_s30  ;;  %2318 = vrot.lane.b32.xlu0 %v4861_v29, %s3500_s27  ;;  %v4870_v60 = vmax.f32 %v2192_v53, %v2193_v58 }
 0x268   : > { %p3430_p13 = pnand %p3429_p2, %p3423_p7 }
 0x269   : > { %v2263_v2 = vpop.permute.xlu1 %2262 }
 0x26a   : > { %v4873_v62 = vmax.f32 %v4412_v14, %v2263_v2 }
 0x26b   : > { %2320 = vrot.lane.b32.xlu1 %v4870_v60, %s3500_s27 }
 0x26c   : > { %2422 = vrot.lane.b32.xlu0 %v4873_v62, %s3501_s30 }
 0x26d   : > { %v2265_v54 = vpop.permute.xlu1 %2264 }
 0x26e   : > { %v4880_v10 = vmax.f32 %v4428_v38, %v2265_v54 }
 0x270   : > { %2424 = vrot.lane.b32.xlu1 %v4880_v10, %s3501_s30  ;;  %v2267_v11 = vpop.permute.xlu0 %2266 }
 0x271   : > { %v4885_v61 = vmax.f32 %v4444_v3, %v2267_v11 }
 0x273   : > { %2426 = vrot.lane.b32.xlu0 %v4885_v61, %s3501_s30 }
 0x274   : > { %v2269_v14 = vpop.permute.xlu1 %2268 }
 0x275   : > { %v4890_v0 = vmax.f32 %v4460_v27, %v2269_v14 }
 0x277   : > { %2428 = vrot.lane.b32.xlu1 %v4890_v0, %s3501_s30  ;;  %v2271_v12 = vpop.permute.xlu0 %2270 }
 0x278   : > { %v4895_v38 = vmax.f32 %v4476_v56, %v2271_v12 }
 0x27a   : > { %2430 = vrot.lane.b32.xlu0 %v4895_v38, %s3501_s30 }
 0x27c   : > { %v2273_v13 = vpop.permute.xlu1 %2272 }
 0x27d   : > { %v4900_v3 = vmax.f32 %v4492_v17, %v2273_v13 }
 0x27f   : > { %2432 = vrot.lane.b32.xlu1 %v4900_v3, %s3501_s30 }
 0x281   : > { %v2275_v15 = vpop.permute.xlu0 %2274 }
 0x282   : > { %v4905_v27 = vmax.f32 %v4508_v47, %v2275_v15 }
 0x284   : > { %2434 = vrot.lane.b32.xlu0 %v4905_v27, %s3501_s30  ;;  %v2277_v18 = vpop.permute.xlu1 %2276 }
 0x285   : > { %v4910_v56 = vmax.f32 %v4524_v9, %v2277_v18 }
 0x287   : > { %2436 = vrot.lane.b32.xlu1 %v4910_v56, %s3501_s30 }
 0x288   : > { %v2279_v20 = vpop.permute.xlu0 %2278 }
 0x289   : > { %v4915_v17 = vmax.f32 %v4540_v42, %v2279_v20 }
 0x28b   : > { %2438 = vrot.lane.b32.xlu0 %v4915_v17, %s3501_s30  ;;  %v2281_v21 = vpop.permute.xlu1 %2280 }
 0x28c   : > { %v4920_v47 = vmax.f32 %v4556_v5, %v2281_v21 }
 0x28e   : > { %2440 = vrot.lane.b32.xlu1 %v4920_v47, %s3501_s30 }
 0x290   : > { %v2283_v30 = vpop.permute.xlu0 %2282 }
 0x291   : > { %v4925_v9 = vmax.f32 %v4572_v34, %v2283_v30 }
 0x293   : > { %2442 = vrot.lane.b32.xlu0 %v4925_v9, %s3501_s30 }
 0x295   : > { %v2285_v24 = vpop.permute.xlu1 %2284 }
 0x296   : > { %v4930_v42 = vmax.f32 %v4588_v1, %v2285_v24 }
 0x298   : > { %2444 = vrot.lane.b32.xlu1 %v4930_v42, %s3501_s30  ;;  %v2287_v19 = vpop.permute.xlu0 %2286 }
 0x299   : > { %v4935_v5 = vmax.f32 %v4604_v32, %v2287_v19 }
 0x29b   : > { %2446 = vrot.lane.b32.xlu0 %v4935_v5, %s3501_s30 }
 0x29c   : > { %v2289_v26 = vpop.permute.xlu1 %2288 }
 0x29d   : > { %v4940_v34 = vmax.f32 %v4620_v63, %v2289_v26 }
 0x29f   : > { %2448 = vrot.lane.b32.xlu1 %v4940_v34, %s3501_s30  ;;  %v2291_v23 = vpop.permute.xlu0 %2290 }
 0x2a0   : > { %v4945_v1 = vmax.f32 %v4636_v33, %v2291_v23 }
 0x2a2   : > { %2450 = vrot.lane.b32.xlu0 %v4945_v1, %s3501_s30 }
 0x2a4   : > { %v2293_v31 = vpop.permute.xlu1 %2292 }
 0x2a5   : > { %v4950_v32 = vmax.f32 %v4652_v4, %v2293_v31 }
 0x2a7   : > { %2452 = vrot.lane.b32.xlu1 %v4950_v32, %s3501_s30 }
 0x2a9   : > { %v2295_v35 = vpop.permute.xlu0 %2294 }
 0x2aa   : > { %v4955_v63 = vmax.f32 %v4668_v41, %v2295_v35 }
 0x2ac   : > { %2454 = vrot.lane.b32.xlu0 %v4955_v63, %s3501_s30  ;;  %v2297_v40 = vpop.permute.xlu1 %2296 }
 0x2ad   : > { %v4960_v33 = vmax.f32 %v4684_v8, %v2297_v40 }
 0x2af   : > { %2456 = vrot.lane.b32.xlu1 %v4960_v33, %s3501_s30 }
 0x2b0   : > { %v2299_v36 = vpop.permute.xlu0 %2298 }
 0x2b1   : > { %v4965_v4 = vmax.f32 %v4700_v46, %v2299_v36 }
 0x2b3   : > { %2458 = vrot.lane.b32.xlu0 %v4965_v4, %s3501_s30  ;;  %v2301_v41 = vpop.permute.xlu1 %2300 }
 0x2b4   : > { %v4970_v39 = vmax.f32 %v4716_v16, %v2301_v41 }
 0x2b6   : > { %2460 = vrot.lane.b32.xlu1 %v4970_v39, %s3501_s30 }
 0x2b8   : > { %v2303_v8 = vpop.permute.xlu0 %2302 }
 0x2b9   : > { %v4975_v37 = vmax.f32 %v4732_v55, %v2303_v8 }
 0x2bb   : > { %2462 = vrot.lane.b32.xlu0 %v4975_v37, %s3501_s30 }
 0x2bd   : > { %v2305_v45 = vpop.permute.xlu1 %2304 }
 0x2be   : > { %v4980_v46 = vmax.f32 %v4748_v25, %v2305_v45 }
 0x2c0   : > { %2464 = vrot.lane.b32.xlu1 %v4980_v46, %s3501_s30  ;;  %v2307_v44 = vpop.permute.xlu0 %2306 }
 0x2c1   : > { %v4985_v16 = vmax.f32 %v4764_v7, %v2307_v44 }
 0x2c3   : > { %2466 = vrot.lane.b32.xlu0 %v4985_v16, %s3501_s30 }
 0x2c4   : > { %v2309_v50 = vpop.permute.xlu1 %2308 }
 0x2c5   : > { %v4991_v55 = vmax.f32 %v4780_v49, %v2309_v50 }
 0x2c7   : > { %2468 = vrot.lane.b32.xlu1 %v4991_v55, %s3501_s30  ;;  %v2311_v25 = vpop.permute.xlu0 %2310 }
 0x2c8   : > { %v4996_v48 = vmax.f32 %v4796_v22, %v2311_v25 }
 0x2ca   : > { %2470 = vrot.lane.b32.xlu0 %v4996_v48, %s3501_s30 }
 0x2cc   : > { %v2313_v7 = vpop.permute.xlu1 %2312 }
 0x2cd   : > { %v5001_v52 = vmax.f32 %v4812_v6, %v2313_v7 }
 0x2cf   : > { %2472 = vrot.lane.b32.xlu1 %v5001_v52, %s3501_s30 }
 0x2d1   : > { %v2315_v49 = vpop.permute.xlu0 %2314 }
 0x2d2   : > { %v5006_v53 = vmax.f32 %v4828_v51, %v2315_v49 }
 0x2d4   : > { %2474 = vrot.lane.b32.xlu0 %v5006_v53, %s3501_s30  ;;  %v2317_v22 = vpop.permute.xlu1 %2316 }
 0x2d5   : > { %v5023_v6 = vmax.f32 %v4844_v28, %v2317_v22  ;;  %v2419_v51 = vpop.permute.xlu0 %2418 }
 0x2d6   : > { %v2514_v57 = vmax.f32 %v4847_v43, %v2419_v51 }
 0x2d7   : > { %3433 = shalt.err (!%p3430_p13)
}
 0x2d8   : > { %s3434_s5 = scalar_lea.hbm %s5020_s8, 32768  ;;  %s3438_s13 = scalar_lea.hbm %s5181_s3, 65536 }
 0x2d9   : > { %p3435_p6 = scmp.ne.s32.totalorder %s5020_s8, %s3434_s5  ;;  %p3439_p5 = scmp.lt.u32.totalorder %s5020_s8, %s5181_s3 }
 0x2da   : > { %p3440_p8 = scmp.lt.u32.totalorder %s3438_s13, %s3434_s5  ;;  %p3442_p0 = scmp.lt.u32.totalorder %s3434_s5, %s5020_s8 }
 0x2db   : > { %p3436_p10 = pnand %p3435_p6, %p5196_p1 }
 0x2dc   : > { %p3441_p11 = por %p3440_p8, %p3439_p5 }
 0x2dd   : > { %p3437_p4 = pneg %p3436_p10 }
 0x2de   : > { %p3443_p3 = por %p3442_p0, %p3441_p11 }
 0x2e0   : > { %p3444_p7 = pnand %p3443_p3, %p3437_p4 }
 0x2e2   : > { %3447 = shalt.err (!%p3444_p7)
}
 0x2e3   : > { %s3503_s25 = smov 1024   ;;  %2476 = vrot.lane.b32.xlu1 %v5023_v6, %s3501_s30  ;;  %2803 = vst.msk [vmem:[%s5011_s28] sm:$0xff] %vm2802_vm0, %v2514_v57  ;;  %v2421_v28 = vpop.permute.xlu1 %2420  ;;  %v2319_v43 = vpop.permute.xlu0 %2318 }
 0x2e4   : > { %3140 = dma.vmem_to_hbm [thread:$0]  (%p5196_p1), %s5025_s24, 32768, %s5020_s8, %s2836_s19, %s3503_s25, %s3503_s25, %s3500_s27   ;;  %v2515_v58 = vmax.f32 %v4864_v59, %v2421_v28  ;;  %v5059_v2 = vmax.f32 %v4861_v29, %v2319_v43 }
 0x2e6   : > { %2804 = vst.msk [vmem:[%s5011_s28 + $0x8] sm:$0xff] %vm2802_vm0, %v2515_v58  ;;  %2478 = vrot.lane.b32.xlu0 %v5059_v2, %s3501_s30 }
 0x2e7   : > { %v2423_v54 = vpop.permute.xlu0 %2422  ;;  %v2321_v11 = vpop.permute.xlu1 %2320 }
 0x2e8   : > { %v2516_v14 = vmax.f32 %v4873_v62, %v2423_v54  ;;  %v5067_v12 = vmax.f32 %v4870_v60, %v2321_v11 }
 0x2ea   : > { %2805 = vst.msk [vmem:[%s5011_s28 + $0x10] sm:$0xff] %vm2802_vm0, %v2516_v14  ;;  %2480 = vrot.lane.b32.xlu1 %v5067_v12, %s3501_s30 }
 0x2eb   : > { %v2425_v29 = vpop.permute.xlu1 %2424  ;;  %v2427_v13 = vpop.permute.xlu0 %2426 }
 0x2ec   : > { %v2517_v59 = vmax.f32 %v4880_v10, %v2425_v29  ;;  %v2518_v15 = vmax.f32 %v4885_v61, %v2427_v13 }
 0x2ee   : > { %2806 = vst.msk [vmem:[%s5011_s28 + $0x18] sm:$0xff] %vm2802_vm0, %v2517_v59  ;;  %2807 = vst.msk [vmem:[%s5011_s28 + $0x20] sm:$0xff] %vm2802_vm0, %v2518_v15 }
 0x2ef   : > { %v2429_v60 = vpop.permute.xlu1 %2428  ;;  %v2431_v18 = vpop.permute.xlu0 %2430 }
 0x2f0   : > { %v2519_v62 = vmax.f32 %v4890_v0, %v2429_v60  ;;  %v2520_v20 = vmax.f32 %v4895_v38, %v2431_v18 }
 0x2f2   : > { %2808 = vst.msk [vmem:[%s5011_s28 + $0x28] sm:$0xff] %vm2802_vm0, %v2519_v62  ;;  %2809 = vst.msk [vmem:[%s5011_s28 + $0x30] sm:$0xff] %vm2802_vm0, %v2520_v20 }
 0x2f3   : > { %v2433_v10 = vpop.permute.xlu1 %2432 }
 0x2f4   : > { %v2521_v21 = vmax.f32 %v4900_v3, %v2433_v10 }
 0x2f6   : > { %2810 = vst.msk [vmem:[%s5011_s28 + $0x38] sm:$0xff] %vm2802_vm0, %v2521_v21  ;;  %v2435_v61 = vpop.permute.xlu0 %2434 }
 0x2f7   : > { %v2522_v30 = vmax.f32 %v4905_v27, %v2435_v61 }
 0x2f9   : > { %2811 = vst.msk [vmem:[%s5011_s28 + $0x40] sm:$0xff] %vm2802_vm0, %v2522_v30  ;;  %v2437_v0 = vpop.permute.xlu1 %2436 }
 0x2fa   : > { %v2523_v24 = vmax.f32 %v4910_v56, %v2437_v0 }
 0x2fc   : > { %2812 = vst.msk [vmem:[%s5011_s28 + $0x48] sm:$0xff] %vm2802_vm0, %v2523_v24 }
 0x2fd   : > { %v2439_v38 = vpop.permute.xlu0 %2438 }
 0x2fe   : > { %v2524_v19 = vmax.f32 %v4915_v17, %v2439_v38 }
 0x300   : > { %2813 = vst.msk [vmem:[%s5011_s28 + $0x50] sm:$0xff] %vm2802_vm0, %v2524_v19  ;;  %v2441_v3 = vpop.permute.xlu1 %2440 }
 0x301   : > { %v2525_v26 = vmax.f32 %v4920_v47, %v2441_v3 }
 0x303   : > { %2814 = vst.msk [vmem:[%s5011_s28 + $0x58] sm:$0xff] %vm2802_vm0, %v2525_v26 }
 0x305   : > { %v2443_v27 = vpop.permute.xlu0 %2442 }
 0x306   : > { %v2526_v23 = vmax.f32 %v4925_v9, %v2443_v27 }
 0x308   : > { %2815 = vst.msk [vmem:[%s5011_s28 + $0x60] sm:$0xff] %vm2802_vm0, %v2526_v23 }
 0x30a   : > { %v2445_v56 = vpop.permute.xlu1 %2444 }
 0x30b   : > { %v2527_v31 = vmax.f32 %v4930_v42, %v2445_v56 }
 0x30d   : > { %2816 = vst.msk [vmem:[%s5011_s28 + $0x68] sm:$0xff] %vm2802_vm0, %v2527_v31  ;;  %v2447_v17 = vpop.permute.xlu0 %2446 }
 0x30e   : > { %v2528_v35 = vmax.f32 %v4935_v5, %v2447_v17 }
 0x310   : > { %2817 = vst.msk [vmem:[%s5011_s28 + $0x70] sm:$0xff] %vm2802_vm0, %v2528_v35 }
 0x311   : > { %v2449_v47 = vpop.permute.xlu1 %2448 }
 0x312   : > { %v2529_v40 = vmax.f32 %v4940_v34, %v2449_v47 }
 0x314   : > { %2818 = vst.msk [vmem:[%s5011_s28 + $0x78] sm:$0xff] %vm2802_vm0, %v2529_v40  ;;  %v2451_v9 = vpop.permute.xlu0 %2450 }
 0x315   : > { %v2530_v36 = vmax.f32 %v4945_v1, %v2451_v9 }
 0x317   : > { %2819 = vst.msk [vmem:[%s5011_s28 + $0x80] sm:$0xff] %vm2802_vm0, %v2530_v36 }
 0x319   : > { %v2453_v42 = vpop.permute.xlu1 %2452 }
 0x31a   : > { %v2531_v41 = vmax.f32 %v4950_v32, %v2453_v42 }
 0x31c   : > { %2820 = vst.msk [vmem:[%s5011_s28 + $0x88] sm:$0xff] %vm2802_vm0, %v2531_v41 }
 0x31e   : > { %v2455_v5 = vpop.permute.xlu0 %2454 }
 0x31f   : > { %v2532_v8 = vmax.f32 %v4955_v63, %v2455_v5 }
 0x321   : > { %2821 = vst.msk [vmem:[%s5011_s28 + $0x90] sm:$0xff] %vm2802_vm0, %v2532_v8  ;;  %v2457_v34 = vpop.permute.xlu1 %2456 }
 0x322   : > { %v2533_v45 = vmax.f32 %v4960_v33, %v2457_v34 }
 0x324   : > { %2822 = vst.msk [vmem:[%s5011_s28 + $0x98] sm:$0xff] %vm2802_vm0, %v2533_v45 }
 0x325   : > { %v2459_v1 = vpop.permute.xlu0 %2458 }
 0x326   : > { %v2534_v44 = vmax.f32 %v4965_v4, %v2459_v1 }
 0x328   : > { %2823 = vst.msk [vmem:[%s5011_s28 + $0xa0] sm:$0xff] %vm2802_vm0, %v2534_v44  ;;  %v2461_v32 = vpop.permute.xlu1 %2460 }
 0x329   : > { %v2535_v50 = vmax.f32 %v4970_v39, %v2461_v32 }
 0x32b   : > { %2824 = vst.msk [vmem:[%s5011_s28 + $0xa8] sm:$0xff] %vm2802_vm0, %v2535_v50 }
 0x32d   : > { %v2463_v63 = vpop.permute.xlu0 %2462 }
 0x32e   : > { %v2536_v25 = vmax.f32 %v4975_v37, %v2463_v63 }
 0x330   : > { %2825 = vst.msk [vmem:[%s5011_s28 + $0xb0] sm:$0xff] %vm2802_vm0, %v2536_v25 }
 0x332   : > { %v2465_v33 = vpop.permute.xlu1 %2464 }
 0x333   : > { %v2537_v7 = vmax.f32 %v4980_v46, %v2465_v33 }
 0x335   : > { %2826 = vst.msk [vmem:[%s5011_s28 + $0xb8] sm:$0xff] %vm2802_vm0, %v2537_v7  ;;  %v2467_v4 = vpop.permute.xlu0 %2466 }
 0x336   : > { %v2538_v49 = vmax.f32 %v4985_v16, %v2467_v4 }
 0x338   : > { %2827 = vst.msk [vmem:[%s5011_s28 + $0xc0] sm:$0xff] %vm2802_vm0, %v2538_v49 }
 0x339   : > { %v2469_v39 = vpop.permute.xlu1 %2468 }
 0x33a   : > { %v2539_v22 = vmax.f32 %v4991_v55, %v2469_v39 }
 0x33c   : > { %2828 = vst.msk [vmem:[%s5011_s28 + $0xc8] sm:$0xff] %vm2802_vm0, %v2539_v22  ;;  %v2471_v37 = vpop.permute.xlu0 %2470 }
 0x33d   : > { %v2540_v51 = vmax.f32 %v4996_v48, %v2471_v37 }
 0x33f   : > { %2829 = vst.msk [vmem:[%s5011_s28 + $0xd0] sm:$0xff] %vm2802_vm0, %v2540_v51 }
 0x341   : > { %v2473_v46 = vpop.permute.xlu1 %2472 }
 0x342   : > { %v2541_v57 = vmax.f32 %v5001_v52, %v2473_v46 }
 0x344   : > { %2830 = vst.msk [vmem:[%s5011_s28 + $0xd8] sm:$0xff] %vm2802_vm0, %v2541_v57 }
 0x346   : > { %v2475_v16 = vpop.permute.xlu0 %2474 }
 0x347   : > { %v2542_v28 = vmax.f32 %v5006_v53, %v2475_v16 }
 0x349   : > { %2831 = vst.msk [vmem:[%s5011_s28 + $0xe0] sm:$0xff] %vm2802_vm0, %v2542_v28 }
 0x355   : > { %v2477_v55 = vpop.permute.xlu1 %2476 }
 0x356   : > { %v2543_v43 = vmax.f32 %v5023_v6, %v2477_v55 }
 0x358   : > { %2832 = vst.msk [vmem:[%s5011_s28 + $0xe8] sm:$0xff] %vm2802_vm0, %v2543_v43  ;;  %v2479_v58 = vpop.permute.xlu0 %2478 }
 0x359   : > { %v2544_v48 = vmax.f32 %v5059_v2, %v2479_v58 }
 0x35b   : > { %2833 = vst.msk [vmem:[%s5011_s28 + $0xf0] sm:$0xff] %vm2802_vm0, %v2544_v48 }
 0x35c   : > { %v2481_v54 = vpop.permute.xlu1 %2480 }
 0x35d   : > { %v2545_v52 = vmax.f32 %v5067_v12, %v2481_v54 }
 0x35f   : > { %2834 = vst.msk [vmem:[%s5011_s28 + $0xf8] sm:$0xff] %vm2802_vm0, %v2545_v52 }
 0x360 PF: > { %s2874_s11 = sand.u32 1, %s3478_s15   ;;  %p5197_p1 = scmp.ne.s32.totalorder %s5187_s22, 0 }
 0x361   : > { %p5198_p9 = scmp.ge.s32.totalorder %s3490_s18, 2  ;;  %s2875_s7 = scalar_lea.sflag [#allocation4], %s2874_s11 }
 0x363   : > { %p3154_p12 = pnand %p5198_p9, %p5197_p1 }
 0x365   : > { %3473 = dma.done.wait (!%p3154_p12), %s2875_s7, 32768  }
 0x366   : > { %3475 = vsyncadd (!%p3154_p12), %s2875_s7, 4294934528  ;;  %p19_p2 = scmp.ge.s32.totalorder %s3639_s9, 4   ;;  %s5199_s15 = smov %s3482_s16 }
 0x367   : > { %s5200_s16 = smov %s3486_s17  ;;  %s5201_s17 = smov %s3655_s12 }
 0x368   : > { %s5202_s18 = smov %s3639_s9  ;;  %21 = sbr.rel (!%p19_p2) target bundleno = 6 (0x6), region = 97 }
 0x36f   :  { %2888 = vsyncpa [#allocation3], 1 }
 0x370   :  { %2890 = vsyncpa [#allocation3 + $0x1], 1 }
 0x371   :  { %2891 = vsyncpa [#allocation6], 1 }
 0x372   :  { %2892 = vsyncpa [#allocation4], 1 }
 0x373   :  { %2894 = vsyncpa [#allocation4 + $0x1], 1 }

</bundles_post_ra>
